<compile_context>
chip_gen: v6e
topology: v6e:2x2x1
jax: 0.10.0
libtpu: 0.0.40
codegen_flags: <defaults>
</compile_context>

<pallas_src>
import functools

import numpy as np
import jax
import jax.numpy as jnp
from jax.experimental import pallas as pl
from jax.experimental.pallas import tpu as pltpu


LAYER_DEFS = (
    # (cout, stride, use_bn, leaky_slope)
    (64, 2, False, 0.2),
    (128, 2, True, 0.2),
    (256, 2, True, 0.2),
    (512, 1, True, 0.2),
    (1, 1, False, None),
)


def _round_up(x, m):
    return (x + m - 1) // m * m


# ----------------------------- Pallas kernel ------------------------------ #
def _conv_tap_kernel(x_ref, w_ref, b_ref, o_ref, acc_ref, *, di_count, wo_p, m, slope):
    """Accumulate `di_count` shifted-slab matmuls per grid step; finalize with
    bias + LeakyReLU on the last reduction step."""
    g = pl.program_id(1)

    @pl.when(g == 0)
    def _init():
        acc_ref[...] = jnp.zeros_like(acc_ref)

    acc = acc_ref[...]
    for di in range(di_count):                           # static, unrolled (2 or 4)
        x = x_ref[pl.ds(di * wo_p, m), :]                # (m, cin) bf16, static offset
        acc += jnp.dot(x, w_ref[di], preferred_element_type=jnp.float32)
    acc_ref[...] = acc

    @pl.when(g == pl.num_programs(1) - 1)
    def _finalize():
        y = acc_ref[...] + b_ref[...]                    # f32 bias (folded BN beta)
        if slope is not None:
            y = jnp.where(y >= 0.0, y, slope * y)        # LeakyReLU(0.2)
        o_ref[...] = y.astype(o_ref.dtype)


# ------------------------------- glue (JAX) -------------------------------- #
def conv_layer_pallas(x_nhwc, w_hwio, scale, bias, stride, slope, out_dtype):
    """One Conv2d(k=4, s=stride, p=1) + per-channel affine + optional LeakyReLU."""
    bsz, h, w, cin = x_nhwc.shape
    kh, kw, cin_w, cout = w_hwio.shape
    assert (kh, kw) == (4, 4) and cin_w == cin

    if stride == 2:
        assert h % 2 == 0 and w % 2 == 0
        ho, wo = h // 2, w // 2
    else:
        ho, wo = h - 1, w - 1
    wo_p = _round_up(wo, 16)                             # sublane-aligned padded width
    cout_p = cout if cout >= 64 else _round_up(cout, 128)  # lane-dense final layer

    x = x_nhwc.astype(jnp.bfloat16)

    # 1 px top/left true conv padding; enough right padding to yield wo_p output
    # columns (the extra columns are garbage and dropped below).
    pad_right = (2 * (wo_p - wo) + 1) if stride == 2 else (wo_p - wo) + 1
    xpad = jnp.pad(x, ((0, 0), (1, 1), (1, pad_right), (0, 0)))

    # Build shifted slabs whose flattened rows are output pixels, plus the
    # matching (slab, row-shift) -> (i, j) kernel-tap ordering for the weights.
    slabs, order = [], []
    if stride == 2:
        di_count = 2
        for pi in range(2):
            for pj in range(2):
                phase = xpad[:, pi::2, pj::2, :]                  # (B, ho+1, wo_p+1, C)
                for dj in range(2):
                    slabs.append(phase[:, :, dj:dj + wo_p, :])    # (B, ho+1, wo_p, C)
                    for di in range(di_count):
                        order.append((2 * di + pi) * 4 + (2 * dj + pj))
        rows = ho + 1
    else:
        di_count = 4
        for j in range(4):
            slabs.append(xpad[:, :, j:j + wo_p, :])               # (B, ho+3, wo_p, C)
            for i in range(di_count):
                order.append(i * 4 + j)
        rows = ho + 3

    num_slabs = len(slabs)
    r = rows * wo_p
    m = ho * wo_p
    xg = jnp.stack(slabs, axis=0).reshape(num_slabs, bsz, r, cin)

    # Weights: reorder taps, fold per-channel scale, pad output channels, bf16.
    w16 = w_hwio.reshape(16, cin, cout)[np.asarray(order)]
    w16 = w16 * scale.astype(jnp.float32).reshape(1, 1, cout)
    bvec = bias.astype(jnp.float32).reshape(1, cout)
    if cout_p != cout:
        w16 = jnp.pad(w16, ((0, 0), (0, 0), (0, cout_p - cout)))
        bvec = jnp.pad(bvec, ((0, 0), (0, cout_p - cout)))
    w16 = w16.astype(jnp.bfloat16)

    out_itemsize = jnp.dtype(out_dtype).itemsize
    x_blk = r * cin * 2
    w_blk = di_count * cin * cout_p * 2
    o_blk = m * cout_p * out_itemsize
    acc_blk = m * cout_p * 4
    est = 2 * (x_blk + w_blk + cout_p * 4) + 2 * o_blk + acc_blk
    vmem_limit = int(min(max(2 * est, 16 * 1024 * 1024), 48 * 1024 * 1024))

    cost = pl.CostEstimate(
        flops=2 * bsz * m * cin * cout_p * 16,
        transcendentals=0,
        bytes_accessed=bsz * (num_slabs * r * cin * 2 + m * cout_p * out_itemsize)
        + 16 * cin * cout_p * 2 + cout_p * 4,
    )

    kernel = functools.partial(
        _conv_tap_kernel, di_count=di_count, wo_p=wo_p, m=m, slope=slope)

    out = pl.pallas_call(
        kernel,
        out_shape=jax.ShapeDtypeStruct((bsz, m, cout_p), out_dtype),
        grid_spec=pltpu.PrefetchScalarGridSpec(
            num_scalar_prefetch=0,
            grid=(bsz, num_slabs),
            in_specs=[
                pl.BlockSpec((None, None, r, cin), lambda b, g: (g, b, 0, 0)),
                pl.BlockSpec((di_count, cin, cout_p), lambda b, g: (g, 0, 0)),
                pl.BlockSpec((1, cout_p), lambda b, g: (0, 0)),
            ],
            out_specs=pl.BlockSpec((None, m, cout_p), lambda b, g: (b, 0, 0)),
            scratch_shapes=[pltpu.VMEM((m, cout_p), jnp.float32)],
        ),
        compiler_params=pltpu.CompilerParams(
            dimension_semantics=("parallel", "arbitrary"),
            vmem_limit_bytes=vmem_limit,
        ),
        cost_estimate=cost,
    )(xg, w16, bvec)

    # Drop padded output columns / channels.
    return out.reshape(bsz, ho, wo_p, cout_p)[:, :, :wo, :cout]


def discriminator_forward(x_nchw, params):
    """NCHW in -> NCHW patch map out; matches the PyTorch module (eval mode)."""
    x = jnp.transpose(x_nchw, (0, 2, 3, 1))              # NCHW -> NHWC
    for p, (cout, stride, _use_bn, slope) in zip(params, LAYER_DEFS):
        out_dtype = jnp.float32 if cout == 1 else jnp.bfloat16
        x = conv_layer_pallas(x, p["w"], p["scale"], p["bias"], stride, slope, out_dtype)
    return jnp.transpose(x, (0, 3, 1, 2))                # NHWC -> NCHW


# --------------------------- parameter creation ---------------------------- #
def init_params(key, inp):
    eps = 1e-5
    params = []
    cin = inp
    for cout, _stride, use_bn, _slope in LAYER_DEFS:
        key, k_w, k_b, k_g, k_beta = jax.random.split(key, 5)
        fan_in = 4 * 4 * cin
        w = jax.random.normal(k_w, (4, 4, cin, cout), jnp.float32) / jnp.sqrt(float(fan_in))
        if use_bn:
            gamma = 1.0 + 0.1 * jax.random.normal(k_g, (cout,), jnp.float32)
            beta = 0.1 * jax.random.normal(k_beta, (cout,), jnp.float32)
            running_mean = jnp.zeros((cout,), jnp.float32)
            running_var = jnp.ones((cout,), jnp.float32)
            scale = gamma / jnp.sqrt(running_var + eps)
            bias = beta - running_mean * scale
        else:
            scale = jnp.ones((cout,), jnp.float32)
            bias = 0.1 * jax.random.normal(k_b, (cout,), jnp.float32)   # conv bias
        params.append(dict(w=w, scale=scale, bias=bias))
        cin = cout
    return params


# ------------------------------ pure-JAX refs ------------------------------ #
def discriminator_reference(x_nchw, params, mxu_precision):
    """XLA reference.  mxu_precision=True rounds conv inputs/weights to bf16
    (matching the kernel's MXU operand precision) with exact f32 accumulation;
    mxu_precision=False is the full-f32 module reference."""
    x = jnp.transpose(x_nchw, (0, 2, 3, 1)).astype(jnp.float32)
    for p, (_cout, stride, _use_bn, slope) in zip(params, LAYER_DEFS):
        w = p["w"].astype(jnp.float32)
        if mxu_precision:
            w = (w * p["scale"].reshape(1, 1, 1, -1)).astype(jnp.bfloat16).astype(jnp.float32)
            xin = x.astype(jnp.bfloat16).astype(jnp.float32)
            y = jax.lax.conv_general_dilated(
                xin, w, window_strides=(stride, stride), padding=((1, 1), (1, 1)),
                dimension_numbers=("NHWC", "HWIO", "NHWC"),
                precision=jax.lax.Precision.HIGHEST)
            y = y + p["bias"].reshape(1, 1, 1, -1)
        else:
            y = jax.lax.conv_general_dilated(
                x, w, window_strides=(stride, stride), padding=((1, 1), (1, 1)),
                dimension_numbers=("NHWC", "HWIO", "NHWC"),
                precision=jax.lax.Precision.HIGHEST)
            y = y * p["scale"].reshape(1, 1, 1, -1) + p["bias"].reshape(1, 1, 1, -1)
        if slope is not None:
            y = jnp.where(y >= 0.0, y, slope * y)
        x = y
    return jnp.transpose(x, (0, 3, 1, 2))


# ---------------------------------- main ----------------------------------- #
if __name__ == "__main__":
    key = jax.random.PRNGKey(0)
    k_x, k_p = jax.random.split(key)

    # settings.in_channels = 2, settings.out_channels = 2  -> inp = 4
    B, in_channels, out_channels, H, W = 2, 2, 2, 32, 32
    inp = in_channels + out_channels

    x = jax.random.normal(k_x, (B, inp, H, W), jnp.float32)   # NCHW like PyTorch
    params = init_params(k_p, inp)

    fwd = jax.jit(discriminator_forward)
    out = jax.block_until_ready(fwd(x, params))
    assert out.shape == (B, 1, 2, 2), out.shape
    assert out.dtype == jnp.float32

    # Structural check vs an MXU-precision-matched reference (tight tolerance).
    ref_mxu = discriminator_reference(x, params, mxu_precision=True)
    err = float(jnp.max(jnp.abs(out - ref_mxu)))
    assert err < 3e-2, f"kernel vs bf16-matched reference: {err}"

    # Sanity check vs the full-f32 module reference (loose tol: bf16 MXU inputs).
    ref_f32 = discriminator_reference(x, params, mxu_precision=False)
    err2 = float(jnp.max(jnp.abs(out - ref_f32)))
    assert err2 < 1e-1, f"kernel vs f32 reference: {err2}"

    print("KERNEL_OK")
</pallas_src>

<mosaic_0001>
module attributes {stable_mosaic.version = 11 : i64} {
  func.func @_conv_tap_kernel(%arg0: i32, %arg1: i32, %arg2: memref<1x1x272x4xbf16, #tpu.memory_space<vmem>>, %arg3: memref<2x4x64xbf16, #tpu.memory_space<vmem>>, %arg4: memref<1x64xf32, #tpu.memory_space<vmem>>, %arg5: memref<1x256x64xbf16, #tpu.memory_space<vmem>>, %arg6: memref<256x64xf32, #tpu.memory_space<vmem>>) attributes {dimension_semantics = [#tpu.dimension_semantics<parallel>, #tpu.dimension_semantics<arbitrary>], iteration_bounds = array<i64: 2, 8>, scalar_prefetch = 0 : i64, scratch_operands = 1 : i64, tpu.core_type = #tpu.core_type<tc>, window_params = [{transform_indices = @transform_0, window_bounds = array<i64: 1, 1, 272, 4>}, {transform_indices = @transform_1, window_bounds = array<i64: 2, 4, 64>}, {pipeline_mode = #tpu.pipeline_mode<synchronous>, transform_indices = @transform_2, window_bounds = array<i64: 1, 64>}, {transform_indices = @transform_3, window_bounds = array<i64: 1, 256, 64>}]} {
    %c0_i32 = arith.constant 0 : i32
    %0 = arith.cmpi eq, %arg1, %c0_i32 : i32
    %1 = arith.extui %0 : i1 to i32
    %c0_i32_0 = arith.constant 0 : i32
    %2 = arith.cmpi ne, %1, %c0_i32_0 : i32
    scf.if %2 {
      %cst_18 = arith.constant 0.000000e+00 : f32
      %20 = vector.broadcast %cst_18 : f32 to vector<256x64xf32>
      %c0_19 = arith.constant 0 : index
      %c0_20 = arith.constant 0 : index
      %21 = vector.load %arg6[%c0_19, %c0_20] : memref<256x64xf32, #tpu.memory_space<vmem>>, vector<256x64xf32>
      tpu.vector_store %arg6[%c0_19, %c0_20], %20 {strides = array<i32>} : memref<256x64xf32, #tpu.memory_space<vmem>>, vector<256x64xf32>,
    } else {
    }
    %c0 = arith.constant 0 : index
    %c0_1 = arith.constant 0 : index
    %3 = vector.load %arg6[%c0, %c0_1] : memref<256x64xf32, #tpu.memory_space<vmem>>, vector<256x64xf32>
    %c0_2 = arith.constant 0 : index
    %c0_3 = arith.constant 0 : index
    %c0_4 = arith.constant 0 : index
    %c0_5 = arith.constant 0 : index
    %4 = vector.load %arg2[%c0_2, %c0_3, %c0_4, %c0_5] : memref<1x1x272x4xbf16, #tpu.memory_space<vmem>>, vector<1x1x256x4xbf16>
    %5 = vector.shape_cast %4 : vector<1x1x256x4xbf16> to vector<256x4xbf16>
    %c0_6 = arith.constant 0 : index
    %c0_7 = arith.constant 0 : index
    %c0_8 = arith.constant 0 : index
    %6 = vector.load %arg3[%c0_6, %c0_7, %c0_8] : memref<2x4x64xbf16, #tpu.memory_space<vmem>>, vector<1x4x64xbf16>
    %7 = vector.shape_cast %6 : vector<1x4x64xbf16> to vector<4x64xbf16>
    %cst = arith.constant dense<0.000000e+00> : vector<256x64xf32>
    %8 = tpu.matmul %5, %7, %cst {dimension_numbers = #tpu.dot_dimension_numbers<[1], [0], [0], [1], [0, 0, 1, 1], [], []>} : vector<256x4xbf16>, vector<4x64xbf16>, vector<256x64xf32> -> vector<256x64xf32>
    %9 = arith.addf %3, %8 : vector<256x64xf32>
    %c0_9 = arith.constant 0 : index
    %c0_10 = arith.constant 0 : index
    %c16 = arith.constant 16 : index
    %c0_11 = arith.constant 0 : index
    %10 = vector.load %arg2[%c0_9, %c0_10, %c16, %c0_11] : memref<1x1x272x4xbf16, #tpu.memory_space<vmem>>, vector<1x1x256x4xbf16>
    %11 = vector.shape_cast %10 : vector<1x1x256x4xbf16> to vector<256x4xbf16>
    %c1 = arith.constant 1 : index
    %c0_12 = arith.constant 0 : index
    %c0_13 = arith.constant 0 : index
    %12 = vector.load %arg3[%c1, %c0_12, %c0_13] : memref<2x4x64xbf16, #tpu.memory_space<vmem>>, vector<1x4x64xbf16>
    %13 = vector.shape_cast %12 : vector<1x4x64xbf16> to vector<4x64xbf16>
    %cst_14 = arith.constant dense<0.000000e+00> : vector<256x64xf32>
    %14 = tpu.matmul %11, %13, %cst_14 {dimension_numbers = #tpu.dot_dimension_numbers<[1], [0], [0], [1], [0, 0, 1, 1], [], []>} : vector<256x4xbf16>, vector<4x64xbf16>, vector<256x64xf32> -> vector<256x64xf32>
    %15 = arith.addf %9, %14 : vector<256x64xf32>
    %c0_15 = arith.constant 0 : index
    %c0_16 = arith.constant 0 : index
    %16 = vector.load %arg6[%c0_15, %c0_16] : memref<256x64xf32, #tpu.memory_space<vmem>>, vector<256x64xf32>
    tpu.vector_store %arg6[%c0_15, %c0_16], %15 {strides = array<i32>} : memref<256x64xf32, #tpu.memory_space<vmem>>, vector<256x64xf32>,
    %c7_i32 = arith.constant 7 : i32
    %17 = arith.cmpi eq, %arg1, %c7_i32 : i32
    %18 = arith.extui %17 : i1 to i32
    %c0_i32_17 = arith.constant 0 : i32
    %19 = arith.cmpi ne, %18, %c0_i32_17 : i32
    scf.if %19 {
      %c0_18 = arith.constant 0 : index
      %c0_19 = arith.constant 0 : index
      %20 = vector.load %arg6[%c0_18, %c0_19] : memref<256x64xf32, #tpu.memory_space<vmem>>, vector<256x64xf32>
      %c0_20 = arith.constant 0 : index
      %c0_21 = arith.constant 0 : index
      %21 = vector.load %arg4[%c0_20, %c0_21] : memref<1x64xf32, #tpu.memory_space<vmem>>, vector<1x64xf32>
      %22 = vector.broadcast %21 : vector<1x64xf32> to vector<256x64xf32>
      %23 = arith.addf %20, %22 : vector<256x64xf32>
      %cst_22 = arith.constant 0.000000e+00 : f32
      %24 = vector.broadcast %cst_22 : f32 to vector<256x64xf32>
      %25 = arith.cmpf oge, %23, %24 : vector<256x64xf32>
      %cst_23 = arith.constant 2.000000e-01 : f32
      %26 = vector.broadcast %cst_23 : f32 to vector<256x64xf32>
      %27 = arith.mulf %26, %23 : vector<256x64xf32>
      %28 = arith.select %25, %23, %27 : vector<256x64xi1>, vector<256x64xf32>
      %29 = arith.truncf %28 : vector<256x64xf32> to vector<256x64xbf16>
      %c0_24 = arith.constant 0 : index
      %c0_25 = arith.constant 0 : index
      %c0_26 = arith.constant 0 : index
      %30 = vector.load %arg5[%c0_24, %c0_25, %c0_26] : memref<1x256x64xbf16, #tpu.memory_space<vmem>>, vector<1x256x64xbf16>
      %31 = vector.shape_cast %30 : vector<1x256x64xbf16> to vector<256x64xbf16>
      %32 = vector.shape_cast %29 : vector<256x64xbf16> to vector<1x256x64xbf16>
      tpu.vector_store %arg5[%c0_24, %c0_25, %c0_26], %32 {strides = array<i32>} : memref<1x256x64xbf16, #tpu.memory_space<vmem>>, vector<1x256x64xbf16>,
    } else {
    }
    return
  }
  func.func @transform_0(%arg0: i32, %arg1: i32) -> (i32, i32, i32, i32) {
    %c0_i32 = arith.constant 0 : i32
    %c0_i32_0 = arith.constant 0 : i32
    %c0_i32_1 = arith.constant 0 : i32
    return %arg1, %arg0, %c0_i32, %c0_i32_0 : i32, i32, i32, i32
  }
  func.func @transform_1(%arg0: i32, %arg1: i32) -> (i32, i32, i32) {
    %c0_i32 = arith.constant 0 : i32
    %c0_i32_0 = arith.constant 0 : i32
    %c0_i32_1 = arith.constant 0 : i32
    return %arg1, %c0_i32, %c0_i32_0 : i32, i32, i32
  }
  func.func @transform_2(%arg0: i32, %arg1: i32) -> (i32, i32) {
    %c0_i32 = arith.constant 0 : i32
    %c0_i32_0 = arith.constant 0 : i32
    %c0_i32_1 = arith.constant 0 : i32
    return %c0_i32, %c0_i32_0 : i32, i32
  }
  func.func @transform_3(%arg0: i32, %arg1: i32) -> (i32, i32, i32) {
    %c0_i32 = arith.constant 0 : i32
    %c0_i32_0 = arith.constant 0 : i32
    %c0_i32_1 = arith.constant 0 : i32
    return %arg0, %c0_i32, %c0_i32_0 : i32, i32, i32
  }
}

module attributes {stable_mosaic.version = 11 : i64} {
  func.func @_conv_tap_kernel(%arg0: i32, %arg1: i32, %arg2: memref<1x1x144x64xbf16, #tpu.memory_space<vmem>>, %arg3: memref<2x64x128xbf16, #tpu.memory_space<vmem>>, %arg4: memref<1x128xf32, #tpu.memory_space<vmem>>, %arg5: memref<1x128x128xbf16, #tpu.memory_space<vmem>>, %arg6: memref<128x128xf32, #tpu.memory_space<vmem>>) attributes {dimension_semantics = [#tpu.dimension_semantics<parallel>, #tpu.dimension_semantics<arbitrary>], iteration_bounds = array<i64: 2, 8>, scalar_prefetch = 0 : i64, scratch_operands = 1 : i64, tpu.core_type = #tpu.core_type<tc>, window_params = [{transform_indices = @transform_0, window_bounds = array<i64: 1, 1, 144, 64>}, {transform_indices = @transform_1, window_bounds = array<i64: 2, 64, 128>}, {pipeline_mode = #tpu.pipeline_mode<synchronous>, transform_indices = @transform_2, window_bounds = array<i64: 1, 128>}, {transform_indices = @transform_3, window_bounds = array<i64: 1, 128, 128>}]} {
    %c0_i32 = arith.constant 0 : i32
    %0 = arith.cmpi eq, %arg1, %c0_i32 : i32
    %1 = arith.extui %0 : i1 to i32
    %c0_i32_0 = arith.constant 0 : i32
    %2 = arith.cmpi ne, %1, %c0_i32_0 : i32
    scf.if %2 {
      %cst_18 = arith.constant 0.000000e+00 : f32
      %20 = vector.broadcast %cst_18 : f32 to vector<128x128xf32>
      %c0_19 = arith.constant 0 : index
      %c0_20 = arith.constant 0 : index
      %21 = vector.load %arg6[%c0_19, %c0_20] : memref<128x128xf32, #tpu.memory_space<vmem>>, vector<128x128xf32>
      tpu.vector_store %arg6[%c0_19, %c0_20], %20 {strides = array<i32>} : memref<128x128xf32, #tpu.memory_space<vmem>>, vector<128x128xf32>,
    } else {
    }
    %c0 = arith.constant 0 : index
    %c0_1 = arith.constant 0 : index
    %3 = vector.load %arg6[%c0, %c0_1] : memref<128x128xf32, #tpu.memory_space<vmem>>, vector<128x128xf32>
    %c0_2 = arith.constant 0 : index
    %c0_3 = arith.constant 0 : index
    %c0_4 = arith.constant 0 : index
    %c0_5 = arith.constant 0 : index
    %4 = vector.load %arg2[%c0_2, %c0_3, %c0_4, %c0_5] : memref<1x1x144x64xbf16, #tpu.memory_space<vmem>>, vector<1x1x128x64xbf16>
    %5 = vector.shape_cast %4 : vector<1x1x128x64xbf16> to vector<128x64xbf16>
    %c0_6 = arith.constant 0 : index
    %c0_7 = arith.constant 0 : index
    %c0_8 = arith.constant 0 : index
    %6 = vector.load %arg3[%c0_6, %c0_7, %c0_8] : memref<2x64x128xbf16, #tpu.memory_space<vmem>>, vector<1x64x128xbf16>
    %7 = vector.shape_cast %6 : vector<1x64x128xbf16> to vector<64x128xbf16>
    %cst = arith.constant dense<0.000000e+00> : vector<128x128xf32>
    %8 = tpu.matmul %5, %7, %cst {dimension_numbers = #tpu.dot_dimension_numbers<[1], [0], [0], [1], [0, 0, 1, 1], [], []>} : vector<128x64xbf16>, vector<64x128xbf16>, vector<128x128xf32> -> vector<128x128xf32>
    %9 = arith.addf %3, %8 : vector<128x128xf32>
    %c0_9 = arith.constant 0 : index
    %c0_10 = arith.constant 0 : index
    %c16 = arith.constant 16 : index
    %c0_11 = arith.constant 0 : index
    %10 = vector.load %arg2[%c0_9, %c0_10, %c16, %c0_11] : memref<1x1x144x64xbf16, #tpu.memory_space<vmem>>, vector<1x1x128x64xbf16>
    %11 = vector.shape_cast %10 : vector<1x1x128x64xbf16> to vector<128x64xbf16>
    %c1 = arith.constant 1 : index
    %c0_12 = arith.constant 0 : index
    %c0_13 = arith.constant 0 : index
    %12 = vector.load %arg3[%c1, %c0_12, %c0_13] : memref<2x64x128xbf16, #tpu.memory_space<vmem>>, vector<1x64x128xbf16>
    %13 = vector.shape_cast %12 : vector<1x64x128xbf16> to vector<64x128xbf16>
    %cst_14 = arith.constant dense<0.000000e+00> : vector<128x128xf32>
    %14 = tpu.matmul %11, %13, %cst_14 {dimension_numbers = #tpu.dot_dimension_numbers<[1], [0], [0], [1], [0, 0, 1, 1], [], []>} : vector<128x64xbf16>, vector<64x128xbf16>, vector<128x128xf32> -> vector<128x128xf32>
    %15 = arith.addf %9, %14 : vector<128x128xf32>
    %c0_15 = arith.constant 0 : index
    %c0_16 = arith.constant 0 : index
    %16 = vector.load %arg6[%c0_15, %c0_16] : memref<128x128xf32, #tpu.memory_space<vmem>>, vector<128x128xf32>
    tpu.vector_store %arg6[%c0_15, %c0_16], %15 {strides = array<i32>} : memref<128x128xf32, #tpu.memory_space<vmem>>, vector<128x128xf32>,
    %c7_i32 = arith.constant 7 : i32
    %17 = arith.cmpi eq, %arg1, %c7_i32 : i32
    %18 = arith.extui %17 : i1 to i32
    %c0_i32_17 = arith.constant 0 : i32
    %19 = arith.cmpi ne, %18, %c0_i32_17 : i32
    scf.if %19 {
      %c0_18 = arith.constant 0 : index
      %c0_19 = arith.constant 0 : index
      %20 = vector.load %arg6[%c0_18, %c0_19] : memref<128x128xf32, #tpu.memory_space<vmem>>, vector<128x128xf32>
      %c0_20 = arith.constant 0 : index
      %c0_21 = arith.constant 0 : index
      %21 = vector.load %arg4[%c0_20, %c0_21] : memref<1x128xf32, #tpu.memory_space<vmem>>, vector<1x128xf32>
      %22 = vector.broadcast %21 : vector<1x128xf32> to vector<128x128xf32>
      %23 = arith.addf %20, %22 : vector<128x128xf32>
      %cst_22 = arith.constant 0.000000e+00 : f32
      %24 = vector.broadcast %cst_22 : f32 to vector<128x128xf32>
      %25 = arith.cmpf oge, %23, %24 : vector<128x128xf32>
      %cst_23 = arith.constant 2.000000e-01 : f32
      %26 = vector.broadcast %cst_23 : f32 to vector<128x128xf32>
      %27 = arith.mulf %26, %23 : vector<128x128xf32>
      %28 = arith.select %25, %23, %27 : vector<128x128xi1>, vector<128x128xf32>
      %29 = arith.truncf %28 : vector<128x128xf32> to vector<128x128xbf16>
      %c0_24 = arith.constant 0 : index
      %c0_25 = arith.constant 0 : index
      %c0_26 = arith.constant 0 : index
      %30 = vector.load %arg5[%c0_24, %c0_25, %c0_26] : memref<1x128x128xbf16, #tpu.memory_space<vmem>>, vector<1x128x128xbf16>
      %31 = vector.shape_cast %30 : vector<1x128x128xbf16> to vector<128x128xbf16>
      %32 = vector.shape_cast %29 : vector<128x128xbf16> to vector<1x128x128xbf16>
      tpu.vector_store %arg5[%c0_24, %c0_25, %c0_26], %32 {strides = array<i32>} : memref<1x128x128xbf16, #tpu.memory_space<vmem>>, vector<1x128x128xbf16>,
    } else {
    }
    return
  }
  func.func @transform_0(%arg0: i32, %arg1: i32) -> (i32, i32, i32, i32) {
    %c0_i32 = arith.constant 0 : i32
    %c0_i32_0 = arith.constant 0 : i32
    %c0_i32_1 = arith.constant 0 : i32
    return %arg1, %arg0, %c0_i32, %c0_i32_0 : i32, i32, i32, i32
  }
  func.func @transform_1(%arg0: i32, %arg1: i32) -> (i32, i32, i32) {
    %c0_i32 = arith.constant 0 : i32
    %c0_i32_0 = arith.constant 0 : i32
    %c0_i32_1 = arith.constant 0 : i32
    return %arg1, %c0_i32, %c0_i32_0 : i32, i32, i32
  }
  func.func @transform_2(%arg0: i32, %arg1: i32) -> (i32, i32) {
    %c0_i32 = arith.constant 0 : i32
    %c0_i32_0 = arith.constant 0 : i32
    %c0_i32_1 = arith.constant 0 : i32
    return %c0_i32, %c0_i32_0 : i32, i32
  }
  func.func @transform_3(%arg0: i32, %arg1: i32) -> (i32, i32, i32) {
    %c0_i32 = arith.constant 0 : i32
    %c0_i32_0 = arith.constant 0 : i32
    %c0_i32_1 = arith.constant 0 : i32
    return %arg0, %c0_i32, %c0_i32_0 : i32, i32, i32
  }
}

module attributes {stable_mosaic.version = 11 : i64} {
  func.func @_conv_tap_kernel(%arg0: i32, %arg1: i32, %arg2: memref<1x1x80x128xbf16, #tpu.memory_space<vmem>>, %arg3: memref<2x128x256xbf16, #tpu.memory_space<vmem>>, %arg4: memref<1x256xf32, #tpu.memory_space<vmem>>, %arg5: memref<1x64x256xbf16, #tpu.memory_space<vmem>>, %arg6: memref<64x256xf32, #tpu.memory_space<vmem>>) attributes {dimension_semantics = [#tpu.dimension_semantics<parallel>, #tpu.dimension_semantics<arbitrary>], iteration_bounds = array<i64: 2, 8>, scalar_prefetch = 0 : i64, scratch_operands = 1 : i64, tpu.core_type = #tpu.core_type<tc>, window_params = [{transform_indices = @transform_0, window_bounds = array<i64: 1, 1, 80, 128>}, {transform_indices = @transform_1, window_bounds = array<i64: 2, 128, 256>}, {pipeline_mode = #tpu.pipeline_mode<synchronous>, transform_indices = @transform_2, window_bounds = array<i64: 1, 256>}, {transform_indices = @transform_3, window_bounds = array<i64: 1, 64, 256>}]} {
    %c0_i32 = arith.constant 0 : i32
    %0 = arith.cmpi eq, %arg1, %c0_i32 : i32
    %1 = arith.extui %0 : i1 to i32
    %c0_i32_0 = arith.constant 0 : i32
    %2 = arith.cmpi ne, %1, %c0_i32_0 : i32
    scf.if %2 {
      %cst_18 = arith.constant 0.000000e+00 : f32
      %20 = vector.broadcast %cst_18 : f32 to vector<64x256xf32>
      %c0_19 = arith.constant 0 : index
      %c0_20 = arith.constant 0 : index
      %21 = vector.load %arg6[%c0_19, %c0_20] : memref<64x256xf32, #tpu.memory_space<vmem>>, vector<64x256xf32>
      tpu.vector_store %arg6[%c0_19, %c0_20], %20 {strides = array<i32>} : memref<64x256xf32, #tpu.memory_space<vmem>>, vector<64x256xf32>,
    } else {
    }
    %c0 = arith.constant 0 : index
    %c0_1 = arith.constant 0 : index
    %3 = vector.load %arg6[%c0, %c0_1] : memref<64x256xf32, #tpu.memory_space<vmem>>, vector<64x256xf32>
    %c0_2 = arith.constant 0 : index
    %c0_3 = arith.constant 0 : index
    %c0_4 = arith.constant 0 : index
    %c0_5 = arith.constant 0 : index
    %4 = vector.load %arg2[%c0_2, %c0_3, %c0_4, %c0_5] : memref<1x1x80x128xbf16, #tpu.memory_space<vmem>>, vector<1x1x64x128xbf16>
    %5 = vector.shape_cast %4 : vector<1x1x64x128xbf16> to vector<64x128xbf16>
    %c0_6 = arith.constant 0 : index
    %c0_7 = arith.constant 0 : index
    %c0_8 = arith.constant 0 : index
    %6 = vector.load %arg3[%c0_6, %c0_7, %c0_8] : memref<2x128x256xbf16, #tpu.memory_space<vmem>>, vector<1x128x256xbf16>
    %7 = vector.shape_cast %6 : vector<1x128x256xbf16> to vector<128x256xbf16>
    %cst = arith.constant dense<0.000000e+00> : vector<64x256xf32>
    %8 = tpu.matmul %5, %7, %cst {dimension_numbers = #tpu.dot_dimension_numbers<[1], [0], [0], [1], [0, 0, 1, 1], [], []>} : vector<64x128xbf16>, vector<128x256xbf16>, vector<64x256xf32> -> vector<64x256xf32>
    %9 = arith.addf %3, %8 : vector<64x256xf32>
    %c0_9 = arith.constant 0 : index
    %c0_10 = arith.constant 0 : index
    %c16 = arith.constant 16 : index
    %c0_11 = arith.constant 0 : index
    %10 = vector.load %arg2[%c0_9, %c0_10, %c16, %c0_11] : memref<1x1x80x128xbf16, #tpu.memory_space<vmem>>, vector<1x1x64x128xbf16>
    %11 = vector.shape_cast %10 : vector<1x1x64x128xbf16> to vector<64x128xbf16>
    %c1 = arith.constant 1 : index
    %c0_12 = arith.constant 0 : index
    %c0_13 = arith.constant 0 : index
    %12 = vector.load %arg3[%c1, %c0_12, %c0_13] : memref<2x128x256xbf16, #tpu.memory_space<vmem>>, vector<1x128x256xbf16>
    %13 = vector.shape_cast %12 : vector<1x128x256xbf16> to vector<128x256xbf16>
    %cst_14 = arith.constant dense<0.000000e+00> : vector<64x256xf32>
    %14 = tpu.matmul %11, %13, %cst_14 {dimension_numbers = #tpu.dot_dimension_numbers<[1], [0], [0], [1], [0, 0, 1, 1], [], []>} : vector<64x128xbf16>, vector<128x256xbf16>, vector<64x256xf32> -> vector<64x256xf32>
    %15 = arith.addf %9, %14 : vector<64x256xf32>
    %c0_15 = arith.constant 0 : index
    %c0_16 = arith.constant 0 : index
    %16 = vector.load %arg6[%c0_15, %c0_16] : memref<64x256xf32, #tpu.memory_space<vmem>>, vector<64x256xf32>
    tpu.vector_store %arg6[%c0_15, %c0_16], %15 {strides = array<i32>} : memref<64x256xf32, #tpu.memory_space<vmem>>, vector<64x256xf32>,
    %c7_i32 = arith.constant 7 : i32
    %17 = arith.cmpi eq, %arg1, %c7_i32 : i32
    %18 = arith.extui %17 : i1 to i32
    %c0_i32_17 = arith.constant 0 : i32
    %19 = arith.cmpi ne, %18, %c0_i32_17 : i32
    scf.if %19 {
      %c0_18 = arith.constant 0 : index
      %c0_19 = arith.constant 0 : index
      %20 = vector.load %arg6[%c0_18, %c0_19] : memref<64x256xf32, #tpu.memory_space<vmem>>, vector<64x256xf32>
      %c0_20 = arith.constant 0 : index
      %c0_21 = arith.constant 0 : index
      %21 = vector.load %arg4[%c0_20, %c0_21] : memref<1x256xf32, #tpu.memory_space<vmem>>, vector<1x256xf32>
      %22 = vector.broadcast %21 : vector<1x256xf32> to vector<64x256xf32>
      %23 = arith.addf %20, %22 : vector<64x256xf32>
      %cst_22 = arith.constant 0.000000e+00 : f32
      %24 = vector.broadcast %cst_22 : f32 to vector<64x256xf32>
      %25 = arith.cmpf oge, %23, %24 : vector<64x256xf32>
      %cst_23 = arith.constant 2.000000e-01 : f32
      %26 = vector.broadcast %cst_23 : f32 to vector<64x256xf32>
      %27 = arith.mulf %26, %23 : vector<64x256xf32>
      %28 = arith.select %25, %23, %27 : vector<64x256xi1>, vector<64x256xf32>
      %29 = arith.truncf %28 : vector<64x256xf32> to vector<64x256xbf16>
      %c0_24 = arith.constant 0 : index
      %c0_25 = arith.constant 0 : index
      %c0_26 = arith.constant 0 : index
      %30 = vector.load %arg5[%c0_24, %c0_25, %c0_26] : memref<1x64x256xbf16, #tpu.memory_space<vmem>>, vector<1x64x256xbf16>
      %31 = vector.shape_cast %30 : vector<1x64x256xbf16> to vector<64x256xbf16>
      %32 = vector.shape_cast %29 : vector<64x256xbf16> to vector<1x64x256xbf16>
      tpu.vector_store %arg5[%c0_24, %c0_25, %c0_26], %32 {strides = array<i32>} : memref<1x64x256xbf16, #tpu.memory_space<vmem>>, vector<1x64x256xbf16>,
    } else {
    }
    return
  }
  func.func @transform_0(%arg0: i32, %arg1: i32) -> (i32, i32, i32, i32) {
    %c0_i32 = arith.constant 0 : i32
    %c0_i32_0 = arith.constant 0 : i32
    %c0_i32_1 = arith.constant 0 : i32
    return %arg1, %arg0, %c0_i32, %c0_i32_0 : i32, i32, i32, i32
  }
  func.func @transform_1(%arg0: i32, %arg1: i32) -> (i32, i32, i32) {
    %c0_i32 = arith.constant 0 : i32
    %c0_i32_0 = arith.constant 0 : i32
    %c0_i32_1 = arith.constant 0 : i32
    return %arg1, %c0_i32, %c0_i32_0 : i32, i32, i32
  }
  func.func @transform_2(%arg0: i32, %arg1: i32) -> (i32, i32) {
    %c0_i32 = arith.constant 0 : i32
    %c0_i32_0 = arith.constant 0 : i32
    %c0_i32_1 = arith.constant 0 : i32
    return %c0_i32, %c0_i32_0 : i32, i32
  }
  func.func @transform_3(%arg0: i32, %arg1: i32) -> (i32, i32, i32) {
    %c0_i32 = arith.constant 0 : i32
    %c0_i32_0 = arith.constant 0 : i32
    %c0_i32_1 = arith.constant 0 : i32
    return %arg0, %c0_i32, %c0_i32_0 : i32, i32, i32
  }
}

module attributes {stable_mosaic.version = 11 : i64} {
  func.func @_conv_tap_kernel(%arg0: i32, %arg1: i32, %arg2: memref<1x1x96x256xbf16, #tpu.memory_space<vmem>>, %arg3: memref<4x256x512xbf16, #tpu.memory_space<vmem>>, %arg4: memref<1x512xf32, #tpu.memory_space<vmem>>, %arg5: memref<1x48x512xbf16, #tpu.memory_space<vmem>>, %arg6: memref<48x512xf32, #tpu.memory_space<vmem>>) attributes {dimension_semantics = [#tpu.dimension_semantics<parallel>, #tpu.dimension_semantics<arbitrary>], iteration_bounds = array<i64: 2, 4>, scalar_prefetch = 0 : i64, scratch_operands = 1 : i64, tpu.core_type = #tpu.core_type<tc>, window_params = [{transform_indices = @transform_0, window_bounds = array<i64: 1, 1, 96, 256>}, {transform_indices = @transform_1, window_bounds = array<i64: 4, 256, 512>}, {pipeline_mode = #tpu.pipeline_mode<synchronous>, transform_indices = @transform_2, window_bounds = array<i64: 1, 512>}, {transform_indices = @transform_3, window_bounds = array<i64: 1, 48, 512>}]} {
    %c0_i32 = arith.constant 0 : i32
    %0 = arith.cmpi eq, %arg1, %c0_i32 : i32
    %1 = arith.extui %0 : i1 to i32
    %c0_i32_0 = arith.constant 0 : i32
    %2 = arith.cmpi ne, %1, %c0_i32_0 : i32
    scf.if %2 {
      %cst_30 = arith.constant 0.000000e+00 : f32
      %32 = vector.broadcast %cst_30 : f32 to vector<48x512xf32>
      %c0_31 = arith.constant 0 : index
      %c0_32 = arith.constant 0 : index
      %33 = vector.load %arg6[%c0_31, %c0_32] : memref<48x512xf32, #tpu.memory_space<vmem>>, vector<48x512xf32>
      tpu.vector_store %arg6[%c0_31, %c0_32], %32 {strides = array<i32>} : memref<48x512xf32, #tpu.memory_space<vmem>>, vector<48x512xf32>,
    } else {
    }
    %c0 = arith.constant 0 : index
    %c0_1 = arith.constant 0 : index
    %3 = vector.load %arg6[%c0, %c0_1] : memref<48x512xf32, #tpu.memory_space<vmem>>, vector<48x512xf32>
    %c0_2 = arith.constant 0 : index
    %c0_3 = arith.constant 0 : index
    %c0_4 = arith.constant 0 : index
    %c0_5 = arith.constant 0 : index
    %4 = vector.load %arg2[%c0_2, %c0_3, %c0_4, %c0_5] : memref<1x1x96x256xbf16, #tpu.memory_space<vmem>>, vector<1x1x48x256xbf16>
    %5 = vector.shape_cast %4 : vector<1x1x48x256xbf16> to vector<48x256xbf16>
    %c0_6 = arith.constant 0 : index
    %c0_7 = arith.constant 0 : index
    %c0_8 = arith.constant 0 : index
    %6 = vector.load %arg3[%c0_6, %c0_7, %c0_8] : memref<4x256x512xbf16, #tpu.memory_space<vmem>>, vector<1x256x512xbf16>
    %7 = vector.shape_cast %6 : vector<1x256x512xbf16> to vector<256x512xbf16>
    %cst = arith.constant dense<0.000000e+00> : vector<48x512xf32>
    %8 = tpu.matmul %5, %7, %cst {dimension_numbers = #tpu.dot_dimension_numbers<[1], [0], [0], [1], [0, 0, 1, 1], [], []>} : vector<48x256xbf16>, vector<256x512xbf16>, vector<48x512xf32> -> vector<48x512xf32>
    %9 = arith.addf %3, %8 : vector<48x512xf32>
    %c0_9 = arith.constant 0 : index
    %c0_10 = arith.constant 0 : index
    %c16 = arith.constant 16 : index
    %c0_11 = arith.constant 0 : index
    %10 = vector.load %arg2[%c0_9, %c0_10, %c16, %c0_11] : memref<1x1x96x256xbf16, #tpu.memory_space<vmem>>, vector<1x1x48x256xbf16>
    %11 = vector.shape_cast %10 : vector<1x1x48x256xbf16> to vector<48x256xbf16>
    %c1 = arith.constant 1 : index
    %c0_12 = arith.constant 0 : index
    %c0_13 = arith.constant 0 : index
    %12 = vector.load %arg3[%c1, %c0_12, %c0_13] : memref<4x256x512xbf16, #tpu.memory_space<vmem>>, vector<1x256x512xbf16>
    %13 = vector.shape_cast %12 : vector<1x256x512xbf16> to vector<256x512xbf16>
    %cst_14 = arith.constant dense<0.000000e+00> : vector<48x512xf32>
    %14 = tpu.matmul %11, %13, %cst_14 {dimension_numbers = #tpu.dot_dimension_numbers<[1], [0], [0], [1], [0, 0, 1, 1], [], []>} : vector<48x256xbf16>, vector<256x512xbf16>, vector<48x512xf32> -> vector<48x512xf32>
    %15 = arith.addf %9, %14 : vector<48x512xf32>
    %c0_15 = arith.constant 0 : index
    %c0_16 = arith.constant 0 : index
    %c32 = arith.constant 32 : index
    %c0_17 = arith.constant 0 : index
    %16 = vector.load %arg2[%c0_15, %c0_16, %c32, %c0_17] : memref<1x1x96x256xbf16, #tpu.memory_space<vmem>>, vector<1x1x48x256xbf16>
    %17 = vector.shape_cast %16 : vector<1x1x48x256xbf16> to vector<48x256xbf16>
    %c2 = arith.constant 2 : index
    %c0_18 = arith.constant 0 : index
    %c0_19 = arith.constant 0 : index
    %18 = vector.load %arg3[%c2, %c0_18, %c0_19] : memref<4x256x512xbf16, #tpu.memory_space<vmem>>, vector<1x256x512xbf16>
    %19 = vector.shape_cast %18 : vector<1x256x512xbf16> to vector<256x512xbf16>
    %cst_20 = arith.constant dense<0.000000e+00> : vector<48x512xf32>
    %20 = tpu.matmul %17, %19, %cst_20 {dimension_numbers = #tpu.dot_dimension_numbers<[1], [0], [0], [1], [0, 0, 1, 1], [], []>} : vector<48x256xbf16>, vector<256x512xbf16>, vector<48x512xf32> -> vector<48x512xf32>
    %21 = arith.addf %15, %20 : vector<48x512xf32>
    %c0_21 = arith.constant 0 : index
    %c0_22 = arith.constant 0 : index
    %c48 = arith.constant 48 : index
    %c0_23 = arith.constant 0 : index
    %22 = vector.load %arg2[%c0_21, %c0_22, %c48, %c0_23] : memref<1x1x96x256xbf16, #tpu.memory_space<vmem>>, vector<1x1x48x256xbf16>
    %23 = vector.shape_cast %22 : vector<1x1x48x256xbf16> to vector<48x256xbf16>
    %c3 = arith.constant 3 : index
    %c0_24 = arith.constant 0 : index
    %c0_25 = arith.constant 0 : index
    %24 = vector.load %arg3[%c3, %c0_24, %c0_25] : memref<4x256x512xbf16, #tpu.memory_space<vmem>>, vector<1x256x512xbf16>
    %25 = vector.shape_cast %24 : vector<1x256x512xbf16> to vector<256x512xbf16>
    %cst_26 = arith.constant dense<0.000000e+00> : vector<48x512xf32>
    %26 = tpu.matmul %23, %25, %cst_26 {dimension_numbers = #tpu.dot_dimension_numbers<[1], [0], [0], [1], [0, 0, 1, 1], [], []>} : vector<48x256xbf16>, vector<256x512xbf16>, vector<48x512xf32> -> vector<48x512xf32>
    %27 = arith.addf %21, %26 : vector<48x512xf32>
    %c0_27 = arith.constant 0 : index
    %c0_28 = arith.constant 0 : index
    %28 = vector.load %arg6[%c0_27, %c0_28] : memref<48x512xf32, #tpu.memory_space<vmem>>, vector<48x512xf32>
    tpu.vector_store %arg6[%c0_27, %c0_28], %27 {strides = array<i32>} : memref<48x512xf32, #tpu.memory_space<vmem>>, vector<48x512xf32>,
    %c3_i32 = arith.constant 3 : i32
    %29 = arith.cmpi eq, %arg1, %c3_i32 : i32
    %30 = arith.extui %29 : i1 to i32
    %c0_i32_29 = arith.constant 0 : i32
    %31 = arith.cmpi ne, %30, %c0_i32_29 : i32
    scf.if %31 {
      %c0_30 = arith.constant 0 : index
      %c0_31 = arith.constant 0 : index
      %32 = vector.load %arg6[%c0_30, %c0_31] : memref<48x512xf32, #tpu.memory_space<vmem>>, vector<48x512xf32>
      %c0_32 = arith.constant 0 : index
      %c0_33 = arith.constant 0 : index
      %33 = vector.load %arg4[%c0_32, %c0_33] : memref<1x512xf32, #tpu.memory_space<vmem>>, vector<1x512xf32>
      %34 = vector.broadcast %33 : vector<1x512xf32> to vector<48x512xf32>
      %35 = arith.addf %32, %34 : vector<48x512xf32>
      %cst_34 = arith.constant 0.000000e+00 : f32
      %36 = vector.broadcast %cst_34 : f32 to vector<48x512xf32>
      %37 = arith.cmpf oge, %35, %36 : vector<48x512xf32>
      %cst_35 = arith.constant 2.000000e-01 : f32
      %38 = vector.broadcast %cst_35 : f32 to vector<48x512xf32>
      %39 = arith.mulf %38, %35 : vector<48x512xf32>
      %40 = arith.select %37, %35, %39 : vector<48x512xi1>, vector<48x512xf32>
      %41 = arith.truncf %40 : vector<48x512xf32> to vector<48x512xbf16>
      %c0_36 = arith.constant 0 : index
      %c0_37 = arith.constant 0 : index
      %c0_38 = arith.constant 0 : index
      %42 = vector.load %arg5[%c0_36, %c0_37, %c0_38] : memref<1x48x512xbf16, #tpu.memory_space<vmem>>, vector<1x48x512xbf16>
      %43 = vector.shape_cast %42 : vector<1x48x512xbf16> to vector<48x512xbf16>
      %44 = vector.shape_cast %41 : vector<48x512xbf16> to vector<1x48x512xbf16>
      tpu.vector_store %arg5[%c0_36, %c0_37, %c0_38], %44 {strides = array<i32>} : memref<1x48x512xbf16, #tpu.memory_space<vmem>>, vector<1x48x512xbf16>,
    } else {
    }
    return
  }
  func.func @transform_0(%arg0: i32, %arg1: i32) -> (i32, i32, i32, i32) {
    %c0_i32 = arith.constant 0 : i32
    %c0_i32_0 = arith.constant 0 : i32
    %c0_i32_1 = arith.constant 0 : i32
    return %arg1, %arg0, %c0_i32, %c0_i32_0 : i32, i32, i32, i32
  }
  func.func @transform_1(%arg0: i32, %arg1: i32) -> (i32, i32, i32) {
    %c0_i32 = arith.constant 0 : i32
    %c0_i32_0 = arith.constant 0 : i32
    %c0_i32_1 = arith.constant 0 : i32
    return %arg1, %c0_i32, %c0_i32_0 : i32, i32, i32
  }
  func.func @transform_2(%arg0: i32, %arg1: i32) -> (i32, i32) {
    %c0_i32 = arith.constant 0 : i32
    %c0_i32_0 = arith.constant 0 : i32
    %c0_i32_1 = arith.constant 0 : i32
    return %c0_i32, %c0_i32_0 : i32, i32
  }
  func.func @transform_3(%arg0: i32, %arg1: i32) -> (i32, i32, i32) {
    %c0_i32 = arith.constant 0 : i32
    %c0_i32_0 = arith.constant 0 : i32
    %c0_i32_1 = arith.constant 0 : i32
    return %arg0, %c0_i32, %c0_i32_0 : i32, i32, i32
  }
}

module attributes {stable_mosaic.version = 11 : i64} {
  func.func @_conv_tap_kernel(%arg0: i32, %arg1: i32, %arg2: memref<1x1x80x512xbf16, #tpu.memory_space<vmem>>, %arg3: memref<4x512x128xbf16, #tpu.memory_space<vmem>>, %arg4: memref<1x128xf32, #tpu.memory_space<vmem>>, %arg5: memref<1x32x128xf32, #tpu.memory_space<vmem>>, %arg6: memref<32x128xf32, #tpu.memory_space<vmem>>) attributes {dimension_semantics = [#tpu.dimension_semantics<parallel>, #tpu.dimension_semantics<arbitrary>], iteration_bounds = array<i64: 2, 4>, scalar_prefetch = 0 : i64, scratch_operands = 1 : i64, tpu.core_type = #tpu.core_type<tc>, window_params = [{transform_indices = @transform_0, window_bounds = array<i64: 1, 1, 80, 512>}, {transform_indices = @transform_1, window_bounds = array<i64: 4, 512, 128>}, {pipeline_mode = #tpu.pipeline_mode<synchronous>, transform_indices = @transform_2, window_bounds = array<i64: 1, 128>}, {transform_indices = @transform_3, window_bounds = array<i64: 1, 32, 128>}]} {
    %c0_i32 = arith.constant 0 : i32
    %0 = arith.cmpi eq, %arg1, %c0_i32 : i32
    %1 = arith.extui %0 : i1 to i32
    %c0_i32_0 = arith.constant 0 : i32
    %2 = arith.cmpi ne, %1, %c0_i32_0 : i32
    scf.if %2 {
      %cst_30 = arith.constant 0.000000e+00 : f32
      %32 = vector.broadcast %cst_30 : f32 to vector<32x128xf32>
      %c0_31 = arith.constant 0 : index
      %c0_32 = arith.constant 0 : index
      %33 = vector.load %arg6[%c0_31, %c0_32] : memref<32x128xf32, #tpu.memory_space<vmem>>, vector<32x128xf32>
      tpu.vector_store %arg6[%c0_31, %c0_32], %32 {strides = array<i32>} : memref<32x128xf32, #tpu.memory_space<vmem>>, vector<32x128xf32>,
    } else {
    }
    %c0 = arith.constant 0 : index
    %c0_1 = arith.constant 0 : index
    %3 = vector.load %arg6[%c0, %c0_1] : memref<32x128xf32, #tpu.memory_space<vmem>>, vector<32x128xf32>
    %c0_2 = arith.constant 0 : index
    %c0_3 = arith.constant 0 : index
    %c0_4 = arith.constant 0 : index
    %c0_5 = arith.constant 0 : index
    %4 = vector.load %arg2[%c0_2, %c0_3, %c0_4, %c0_5] : memref<1x1x80x512xbf16, #tpu.memory_space<vmem>>, vector<1x1x32x512xbf16>
    %5 = vector.shape_cast %4 : vector<1x1x32x512xbf16> to vector<32x512xbf16>
    %c0_6 = arith.constant 0 : index
    %c0_7 = arith.constant 0 : index
    %c0_8 = arith.constant 0 : index
    %6 = vector.load %arg3[%c0_6, %c0_7, %c0_8] : memref<4x512x128xbf16, #tpu.memory_space<vmem>>, vector<1x512x128xbf16>
    %7 = vector.shape_cast %6 : vector<1x512x128xbf16> to vector<512x128xbf16>
    %cst = arith.constant dense<0.000000e+00> : vector<32x128xf32>
    %8 = tpu.matmul %5, %7, %cst {dimension_numbers = #tpu.dot_dimension_numbers<[1], [0], [0], [1], [0, 0, 1, 1], [], []>} : vector<32x512xbf16>, vector<512x128xbf16>, vector<32x128xf32> -> vector<32x128xf32>
    %9 = arith.addf %3, %8 : vector<32x128xf32>
    %c0_9 = arith.constant 0 : index
    %c0_10 = arith.constant 0 : index
    %c16 = arith.constant 16 : index
    %c0_11 = arith.constant 0 : index
    %10 = vector.load %arg2[%c0_9, %c0_10, %c16, %c0_11] : memref<1x1x80x512xbf16, #tpu.memory_space<vmem>>, vector<1x1x32x512xbf16>
    %11 = vector.shape_cast %10 : vector<1x1x32x512xbf16> to vector<32x512xbf16>
    %c1 = arith.constant 1 : index
    %c0_12 = arith.constant 0 : index
    %c0_13 = arith.constant 0 : index
    %12 = vector.load %arg3[%c1, %c0_12, %c0_13] : memref<4x512x128xbf16, #tpu.memory_space<vmem>>, vector<1x512x128xbf16>
    %13 = vector.shape_cast %12 : vector<1x512x128xbf16> to vector<512x128xbf16>
    %cst_14 = arith.constant dense<0.000000e+00> : vector<32x128xf32>
    %14 = tpu.matmul %11, %13, %cst_14 {dimension_numbers = #tpu.dot_dimension_numbers<[1], [0], [0], [1], [0, 0, 1, 1], [], []>} : vector<32x512xbf16>, vector<512x128xbf16>, vector<32x128xf32> -> vector<32x128xf32>
    %15 = arith.addf %9, %14 : vector<32x128xf32>
    %c0_15 = arith.constant 0 : index
    %c0_16 = arith.constant 0 : index
    %c32 = arith.constant 32 : index
    %c0_17 = arith.constant 0 : index
    %16 = vector.load %arg2[%c0_15, %c0_16, %c32, %c0_17] : memref<1x1x80x512xbf16, #tpu.memory_space<vmem>>, vector<1x1x32x512xbf16>
    %17 = vector.shape_cast %16 : vector<1x1x32x512xbf16> to vector<32x512xbf16>
    %c2 = arith.constant 2 : index
    %c0_18 = arith.constant 0 : index
    %c0_19 = arith.constant 0 : index
    %18 = vector.load %arg3[%c2, %c0_18, %c0_19] : memref<4x512x128xbf16, #tpu.memory_space<vmem>>, vector<1x512x128xbf16>
    %19 = vector.shape_cast %18 : vector<1x512x128xbf16> to vector<512x128xbf16>
    %cst_20 = arith.constant dense<0.000000e+00> : vector<32x128xf32>
    %20 = tpu.matmul %17, %19, %cst_20 {dimension_numbers = #tpu.dot_dimension_numbers<[1], [0], [0], [1], [0, 0, 1, 1], [], []>} : vector<32x512xbf16>, vector<512x128xbf16>, vector<32x128xf32> -> vector<32x128xf32>
    %21 = arith.addf %15, %20 : vector<32x128xf32>
    %c0_21 = arith.constant 0 : index
    %c0_22 = arith.constant 0 : index
    %c48 = arith.constant 48 : index
    %c0_23 = arith.constant 0 : index
    %22 = vector.load %arg2[%c0_21, %c0_22, %c48, %c0_23] : memref<1x1x80x512xbf16, #tpu.memory_space<vmem>>, vector<1x1x32x512xbf16>
    %23 = vector.shape_cast %22 : vector<1x1x32x512xbf16> to vector<32x512xbf16>
    %c3 = arith.constant 3 : index
    %c0_24 = arith.constant 0 : index
    %c0_25 = arith.constant 0 : index
    %24 = vector.load %arg3[%c3, %c0_24, %c0_25] : memref<4x512x128xbf16, #tpu.memory_space<vmem>>, vector<1x512x128xbf16>
    %25 = vector.shape_cast %24 : vector<1x512x128xbf16> to vector<512x128xbf16>
    %cst_26 = arith.constant dense<0.000000e+00> : vector<32x128xf32>
    %26 = tpu.matmul %23, %25, %cst_26 {dimension_numbers = #tpu.dot_dimension_numbers<[1], [0], [0], [1], [0, 0, 1, 1], [], []>} : vector<32x512xbf16>, vector<512x128xbf16>, vector<32x128xf32> -> vector<32x128xf32>
    %27 = arith.addf %21, %26 : vector<32x128xf32>
    %c0_27 = arith.constant 0 : index
    %c0_28 = arith.constant 0 : index
    %28 = vector.load %arg6[%c0_27, %c0_28] : memref<32x128xf32, #tpu.memory_space<vmem>>, vector<32x128xf32>
    tpu.vector_store %arg6[%c0_27, %c0_28], %27 {strides = array<i32>} : memref<32x128xf32, #tpu.memory_space<vmem>>, vector<32x128xf32>,
    %c3_i32 = arith.constant 3 : i32
    %29 = arith.cmpi eq, %arg1, %c3_i32 : i32
    %30 = arith.extui %29 : i1 to i32
    %c0_i32_29 = arith.constant 0 : i32
    %31 = arith.cmpi ne, %30, %c0_i32_29 : i32
    scf.if %31 {
      %c0_30 = arith.constant 0 : index
      %c0_31 = arith.constant 0 : index
      %32 = vector.load %arg6[%c0_30, %c0_31] : memref<32x128xf32, #tpu.memory_space<vmem>>, vector<32x128xf32>
      %c0_32 = arith.constant 0 : index
      %c0_33 = arith.constant 0 : index
      %33 = vector.load %arg4[%c0_32, %c0_33] : memref<1x128xf32, #tpu.memory_space<vmem>>, vector<1x128xf32>
      %34 = vector.broadcast %33 : vector<1x128xf32> to vector<32x128xf32>
      %35 = arith.addf %32, %34 : vector<32x128xf32>
      %c0_34 = arith.constant 0 : index
      %c0_35 = arith.constant 0 : index
      %c0_36 = arith.constant 0 : index
      %36 = vector.load %arg5[%c0_34, %c0_35, %c0_36] : memref<1x32x128xf32, #tpu.memory_space<vmem>>, vector<1x32x128xf32>
      %37 = vector.shape_cast %36 : vector<1x32x128xf32> to vector<32x128xf32>
      %38 = vector.shape_cast %35 : vector<32x128xf32> to vector<1x32x128xf32>
      tpu.vector_store %arg5[%c0_34, %c0_35, %c0_36], %38 {strides = array<i32>} : memref<1x32x128xf32, #tpu.memory_space<vmem>>, vector<1x32x128xf32>,
    } else {
    }
    return
  }
  func.func @transform_0(%arg0: i32, %arg1: i32) -> (i32, i32, i32, i32) {
    %c0_i32 = arith.constant 0 : i32
    %c0_i32_0 = arith.constant 0 : i32
    %c0_i32_1 = arith.constant 0 : i32
    return %arg1, %arg0, %c0_i32, %c0_i32_0 : i32, i32, i32, i32
  }
  func.func @transform_1(%arg0: i32, %arg1: i32) -> (i32, i32, i32) {
    %c0_i32 = arith.constant 0 : i32
    %c0_i32_0 = arith.constant 0 : i32
    %c0_i32_1 = arith.constant 0 : i32
    return %arg1, %c0_i32, %c0_i32_0 : i32, i32, i32
  }
  func.func @transform_2(%arg0: i32, %arg1: i32) -> (i32, i32) {
    %c0_i32 = arith.constant 0 : i32
    %c0_i32_0 = arith.constant 0 : i32
    %c0_i32_1 = arith.constant 0 : i32
    return %c0_i32, %c0_i32_0 : i32, i32
  }
  func.func @transform_3(%arg0: i32, %arg1: i32) -> (i32, i32, i32) {
    %c0_i32 = arith.constant 0 : i32
    %c0_i32_0 = arith.constant 0 : i32
    %c0_i32_1 = arith.constant 0 : i32
    return %arg0, %c0_i32, %c0_i32_0 : i32, i32, i32
  }
}

</mosaic_0001>

<bundles_post_ra>
// kernel: discriminator_forward.5
= control target key start
LH: loop header
LB: loop body
LE: loop exit
PB: predicated region body
PF: predicated region fallthrough
CT: control target
= control target key end

     0   :  { %s1843_s12 = smov 0   ;;  %s1845_s13 = smov 0   ;;  %s2142_s0 = inlined_call_operand.vmem [shape: bf16[8,2,272,4], index: 0, kind: input, shape index: {}]   ;;  %s2143_s1 = inlined_call_operand.vmem [shape: bf16[16,4,64], index: 1, kind: input, shape index: {}]   ;;  %s2144_s2 = inlined_call_operand.vmem [shape: f32[1,64], index: 2, kind: input, shape index: {}]   ;;  %s2145_s3 = inlined_call_operand.vmem [shape: bf16[2,256,64], index: 3, kind: output, shape index: {}]  }
   0x1   :  { %s1847_s14 = smov 0   ;;  %s1849_s15 = smov 0  }
   0x2   :  { %s1851_s16 = smov 0  }
   0x3 LB: > { %s22_s17 = sadd.s32 1, %s1812_s14  ;;  %s25_s18 = sadd.s32 1, %s1816_s15  ;;  %s1820_s16 = sphi %s1851_s16, %s13_s16   ;;  %s1816_s15 = sphi %s1849_s15, %s2149_s15   ;;  %s1812_s14 = sphi %s1847_s14, %s2148_s14   ;;  %s1808_s13 = sphi %s1845_s13, %s2147_s13   ;;  %s1804_s12 = sphi %s1843_s12, %s2146_s12  }
   0x4   : > { %p23_p0 = scmp.ge.s32.totalorder %s22_s17, 8  ;;  %p1462_p1 = scmp.ge.s32.totalorder %s1820_s16, 1 }
   0x5   : > { %p166_p2 = scmp.lt.s32.totalorder %s1820_s16, 17 }
   0x6   : > { %s2151_s17 = smov (%p23_p0, %s22_s17), 0  ;;  %s2153_s18 = smov (!%p23_p0, %s25_s18), %s1816_s15 }
   0x7   : > { %p167_p3 = pnand %p1462_p1, %p166_p2  ;;  %p27_p4 = scmp.ge.s32.totalorder %s2153_s18, 2 }
   0x8   : > { %p199_p5 = scmp.lt.s32.totalorder (!%p167_p3), %s1804_s12, 7  ;;  %p201_p6 = scmp.lt.s32.totalorder (!%p167_p3), %s1808_s13, 1 }
   0x9   : > { %s2155_s18 = smov (%p27_p4, %s2153_s18), 0  ;;  %170 = sbr.rel (%p167_p3) target bundleno = 352 (0x160), region = 32 }
   0xa   : > { %s1464_s19 = sshll.u32 (!%p167_p3), %s1804_s12, 1  ;;  %p1468_p8 = scmp.ne.s32.totalorder (!%p167_p3), %s1804_s12, 0 }
   0xb   : > { %p209_p7 = scmp.lt.s32.totalorder (!%p167_p3), %s1464_s19, 15 }
   0xe   : > { %s200_s20 = scalar_select %p199_p5, %s1804_s12, 7 }
   0xf   : > { %s2157_s13 = smov (!%p201_p6, %s1808_s13), 1  ;;  %s2159_s19 = smov (!%p209_p7, %s1464_s19), 15 }
  0x10   : > { %s1708_s21 = smul.u32 68, %s200_s20  ;;  %s1570_s23 = sshll.u32 %s2157_s13, 7 }
  0x11   : > { %s1707_s22 = smul.u32 34, %s2157_s13  ;;  %s1881_s27 = scalar_lea.vmem %s2145_s3, %s1570_s23 }
  0x12   : > { %s1465_s29 = sshll.u32 %s2159_s19, 1  ;;  %223 = sbr.rel (%p1468_p8) target bundleno = 40 (0x28), region = 36 }
  0x13   : > { %s205_s24 = sadd.s32 %s1708_s21, %s1707_s22  ;;  %s1891_s8 = scalar_lea.vmem %s2143_s1, %s1465_s29 }
  0x14   : > { %s1463_s28 = sshll.u32 %s205_s24, 2 }
  0x15   : > { %s1886_s5 = scalar_lea.vmem %s2142_s0, %s1463_s28 }
  0x17   : > { %vm224_vm0 = vcmask 523264   ;;  %v1822_v0 = vmov 0.0  }
  0x18   : > { %225 = vst.msk [vmem:[#allocation2] sm:$0xff] %vm224_vm0, %v1822_v0  ;;  %226 = vst.msk [vmem:[#allocation2 + $0x8] sm:$0xff] %vm224_vm0, %v1822_v0 }
  0x19   : > { %227 = vst.msk [vmem:[#allocation2 + $0x10] sm:$0xff] %vm224_vm0, %v1822_v0  ;;  %228 = vst.msk [vmem:[#allocation2 + $0x18] sm:$0xff] %vm224_vm0, %v1822_v0 }
  0x1a   : > { %229 = vst.msk [vmem:[#allocation2 + $0x20] sm:$0xff] %vm224_vm0, %v1822_v0  ;;  %230 = vst.msk [vmem:[#allocation2 + $0x28] sm:$0xff] %vm224_vm0, %v1822_v0 }
  0x1b   : > { %231 = vst.msk [vmem:[#allocation2 + $0x30] sm:$0xff] %vm224_vm0, %v1822_v0  ;;  %232 = vst.msk [vmem:[#allocation2 + $0x38] sm:$0xff] %vm224_vm0, %v1822_v0 }
  0x1c   : > { %233 = vst.msk [vmem:[#allocation2 + $0x40] sm:$0xff] %vm224_vm0, %v1822_v0  ;;  %234 = vst.msk [vmem:[#allocation2 + $0x48] sm:$0xff] %vm224_vm0, %v1822_v0 }
  0x1d   : > { %235 = vst.msk [vmem:[#allocation2 + $0x50] sm:$0xff] %vm224_vm0, %v1822_v0  ;;  %236 = vst.msk [vmem:[#allocation2 + $0x58] sm:$0xff] %vm224_vm0, %v1822_v0 }
  0x1e   : > { %237 = vst.msk [vmem:[#allocation2 + $0x60] sm:$0xff] %vm224_vm0, %v1822_v0  ;;  %238 = vst.msk [vmem:[#allocation2 + $0x68] sm:$0xff] %vm224_vm0, %v1822_v0 }
  0x1f   : > { %239 = vst.msk [vmem:[#allocation2 + $0x70] sm:$0xff] %vm224_vm0, %v1822_v0  ;;  %240 = vst.msk [vmem:[#allocation2 + $0x78] sm:$0xff] %vm224_vm0, %v1822_v0 }
  0x20   : > { %241 = vst.msk [vmem:[#allocation2 + $0x80] sm:$0xff] %vm224_vm0, %v1822_v0  ;;  %242 = vst.msk [vmem:[#allocation2 + $0x88] sm:$0xff] %vm224_vm0, %v1822_v0 }
  0x21   : > { %243 = vst.msk [vmem:[#allocation2 + $0x90] sm:$0xff] %vm224_vm0, %v1822_v0  ;;  %244 = vst.msk [vmem:[#allocation2 + $0x98] sm:$0xff] %vm224_vm0, %v1822_v0 }
  0x22   : > { %245 = vst.msk [vmem:[#allocation2 + $0xa0] sm:$0xff] %vm224_vm0, %v1822_v0  ;;  %246 = vst.msk [vmem:[#allocation2 + $0xa8] sm:$0xff] %vm224_vm0, %v1822_v0 }
  0x23   : > { %247 = vst.msk [vmem:[#allocation2 + $0xb0] sm:$0xff] %vm224_vm0, %v1822_v0  ;;  %248 = vst.msk [vmem:[#allocation2 + $0xb8] sm:$0xff] %vm224_vm0, %v1822_v0 }
  0x24   : > { %249 = vst.msk [vmem:[#allocation2 + $0xc0] sm:$0xff] %vm224_vm0, %v1822_v0  ;;  %250 = vst.msk [vmem:[#allocation2 + $0xc8] sm:$0xff] %vm224_vm0, %v1822_v0 }
  0x25   : > { %251 = vst.msk [vmem:[#allocation2 + $0xd0] sm:$0xff] %vm224_vm0, %v1822_v0  ;;  %252 = vst.msk [vmem:[#allocation2 + $0xd8] sm:$0xff] %vm224_vm0, %v1822_v0 }
  0x26   : > { %253 = vst.msk [vmem:[#allocation2 + $0xe0] sm:$0xff] %vm224_vm0, %v1822_v0  ;;  %254 = vst.msk [vmem:[#allocation2 + $0xe8] sm:$0xff] %vm224_vm0, %v1822_v0 }
  0x27   : > { %255 = vst.msk [vmem:[#allocation2 + $0xf0] sm:$0xff] %vm224_vm0, %v1822_v0  ;;  %256 = vst.msk [vmem:[#allocation2 + $0xf8] sm:$0xff] %vm224_vm0, %v1822_v0 }
  0x28 PF: > { %v321_v1 = vld [vmem:[%s1891_s8] sm:$0x3]  ;;  %vm451_vm1 = vcmask 1041408   ;;  %v1501_v2 = vld [vmem:[%s1891_s8 + $0x2] sm:$0x3]  ;;  %vm402_vm2 = vcmask 31744  }
  0x29   : > { %v1750_v3 = vld [vmem:[%s1886_s5] sm:$0xff]   ;;  %1705 = vmatprep.subr.msk.bf16.mxu0 %vm451_vm1, %v321_v1  ;;  %1706 = vmatprep.subr.msk.bf16.mxu1 %vm451_vm1, %v1501_v2  ;;  %v453_v4 = vsel %vm451_vm1, %v321_v1, 0  ;;  %v811_v5 = vsel %vm451_vm1, %v1501_v2, 0  ;;  %v1751_v6 = vld [vmem:[%s1886_s5 + $0x8] sm:$0xff]   ;;  %v1753_v8 = vld [vmem:[%s1886_s5 + $0x10] sm:$0xff]   ;;  %vm1006_vm3 = vcmask 523264  }
  0x2a   : > { %1638 = vmatpush3.bf16.msra.mxu0 %v453_v4  ;;  %1672 = vmatpush3.bf16.msra.mxu1 %v811_v5  ;;  %v1752_v7 = vld [vmem:[%s1886_s5 + $0x8] sm:$0xff]   ;;  %v1754_v9 = vld [vmem:[%s1886_s5 + $0x10] sm:$0xff]   ;;  %v1755_v10 = vld [vmem:[%s1886_s5 + $0x18] sm:$0xff]   ;;  %p1534_p9 = scmp.ne.s32.totalorder %s1804_s12, 7 }
  0x2b   : > { %1639 = vmatprep.mubr.msk.bf16.mxu0 %vm402_vm2, %v1750_v3  ;;  %1673 = vmatprep.mubr.msk.bf16.mxu1 %vm402_vm2, %v1751_v6  ;;  %v1756_v11 = vld [vmem:[%s1886_s5 + $0x18] sm:$0xff]   ;;  %v1757_v12 = vld [vmem:[%s1886_s5 + $0x20] sm:$0xff]   ;;  %v1759_v14 = vld [vmem:[%s1886_s5 + $0x28] sm:$0xff]  }
  0x2c   : > { %v1758_v13 = vld [vmem:[%s1886_s5 + $0x20] sm:$0xff]   ;;  %v1760_v15 = vld [vmem:[%s1886_s5 + $0x28] sm:$0xff]   ;;  %v1761_v16 = vld [vmem:[%s1886_s5 + $0x30] sm:$0xff]  }
  0x2d   : > { %1640 = vmatmul.mubr.msk.bf16.vlgmr.msra.gmra.mxu0 %vm402_vm2, %v1752_v7  ;;  %1674 = vmatmul.mubr.msk.bf16.vlgmr.msra.gmra.mxu1 %vm402_vm2, %v1753_v8  ;;  %v1762_v17 = vld [vmem:[%s1886_s5 + $0x30] sm:$0xff]   ;;  %v1763_v18 = vld [vmem:[%s1886_s5 + $0x38] sm:$0xff]   ;;  %v1765_v20 = vld [vmem:[%s1886_s5 + $0x40] sm:$0xff]  }
  0x2e   : > { %1643 = vmatprep.mubr.msk.bf16.mxu0 %vm402_vm2, %v1754_v9  ;;  %1677 = vmatprep.mubr.msk.bf16.mxu1 %vm402_vm2, %v1755_v10  ;;  %v1764_v19 = vld [vmem:[%s1886_s5 + $0x38] sm:$0xff]   ;;  %v1766_v21 = vld [vmem:[%s1886_s5 + $0x40] sm:$0xff]   ;;  %v1767_v22 = vld [vmem:[%s1886_s5 + $0x48] sm:$0xff]  }
  0x2f   : > { %v1768_v23 = vld [vmem:[%s1886_s5 + $0x48] sm:$0xff]   ;;  %v1769_v24 = vld [vmem:[%s1886_s5 + $0x50] sm:$0xff]   ;;  %v1771_v26 = vld [vmem:[%s1886_s5 + $0x58] sm:$0xff]  }
  0x30   : > { %v1770_v25 = vld [vmem:[%s1886_s5 + $0x50] sm:$0xff]   ;;  %v1772_v27 = vld [vmem:[%s1886_s5 + $0x58] sm:$0xff]   ;;  %v1773_v28 = vld [vmem:[%s1886_s5 + $0x60] sm:$0xff]  }
  0x31   : > { %v1774_v29 = vld [vmem:[%s1886_s5 + $0x60] sm:$0xff]   ;;  %v1775_v30 = vld [vmem:[%s1886_s5 + $0x68] sm:$0xff]   ;;  %v1777_v32 = vld [vmem:[%s1886_s5 + $0x70] sm:$0xff]  }
  0x32   : > { %v1776_v31 = vld [vmem:[%s1886_s5 + $0x68] sm:$0xff]   ;;  %v1778_v33 = vld [vmem:[%s1886_s5 + $0x70] sm:$0xff]   ;;  %v1779_v34 = vld [vmem:[%s1886_s5 + $0x78] sm:$0xff]  }
  0x33   : > { %v1780_v35 = vld [vmem:[%s1886_s5 + $0x78] sm:$0xff]   ;;  %v1781_v36 = vld [vmem:[%s1886_s5 + $0x80] sm:$0xff]   ;;  %v259_v37 = vld [vmem:[#allocation2 + $0x10] sm:$0xff] }
  0x34   : > { %v257_v39 = vld [vmem:[#allocation2] sm:$0xff]  ;;  %v260_v43 = vld [vmem:[#allocation2 + $0x18] sm:$0xff]  ;;  %v258_v48 = vld [vmem:[#allocation2 + $0x8] sm:$0xff] }
  0x35   : > { %1644 = vmatmul.mubr.msk.bf16.gmra.mxu0 %vm402_vm2, %v1756_v11  ;;  %1678 = vmatmul.mubr.msk.bf16.gmra.mxu1 %vm402_vm2, %v1757_v12  ;;  %v263_v53 = vld [vmem:[#allocation2 + $0x30] sm:$0xff]  ;;  %v261_v58 = vld [vmem:[#allocation2 + $0x20] sm:$0xff]  ;;  %v264_v63 = vld [vmem:[#allocation2 + $0x38] sm:$0xff] }
  0x36   : > { %1647 = vmatprep.mubr.msk.bf16.mxu0 %vm402_vm2, %v1758_v13  ;;  %1681 = vmatprep.mubr.msk.bf16.mxu1 %vm402_vm2, %v1759_v14  ;;  %v262_v4 = vld [vmem:[#allocation2 + $0x28] sm:$0xff]  ;;  %v267_v9 = vld [vmem:[#allocation2 + $0x50] sm:$0xff]  ;;  %v265_v14 = vld [vmem:[#allocation2 + $0x40] sm:$0xff] }
  0x3d   : > { %1648 = vmatmul.mubr.msk.bf16.gmra.mxu0 %vm402_vm2, %v1760_v15  ;;  %1682 = vmatmul.mubr.msk.bf16.gmra.mxu1 %vm402_vm2, %v1761_v16 }
  0x3e   : > { %1651 = vmatprep.mubr.msk.bf16.mxu0 %vm402_vm2, %v1762_v17  ;;  %1685 = vmatprep.mubr.msk.bf16.mxu1 %vm402_vm2, %v1763_v18 }
  0x45   : > { %1652 = vmatmul.mubr.msk.bf16.gmra.mxu0 %vm402_vm2, %v1764_v19  ;;  %1686 = vmatmul.mubr.msk.bf16.gmra.mxu1 %vm402_vm2, %v1765_v20  ;;  %v268_v19 = vld [vmem:[#allocation2 + $0x58] sm:$0xff] }
  0x46   : > { %1655 = vmatprep.mubr.msk.bf16.mxu0 %vm402_vm2, %v1766_v21  ;;  %1689 = vmatprep.mubr.msk.bf16.mxu1 %vm402_vm2, %v1767_v22 }
  0x4d   : > { %1656 = vmatmul.mubr.msk.bf16.gmra.mxu0 %vm402_vm2, %v1768_v23  ;;  %1690 = vmatmul.mubr.msk.bf16.gmra.mxu1 %vm402_vm2, %v1769_v24  ;;  %v266_v24 = vld [vmem:[#allocation2 + $0x48] sm:$0xff] }
  0x4e   : > { %1659 = vmatprep.mubr.msk.bf16.mxu0 %vm402_vm2, %v1770_v25  ;;  %1693 = vmatprep.mubr.msk.bf16.mxu1 %vm402_vm2, %v1771_v26 }
  0x55   : > { %1660 = vmatmul.mubr.msk.bf16.gmra.mxu0 %vm402_vm2, %v1772_v27  ;;  %1694 = vmatmul.mubr.msk.bf16.gmra.mxu1 %vm402_vm2, %v1773_v28 }
  0x56   : > { %1663 = vmatprep.mubr.msk.bf16.mxu0 %vm402_vm2, %v1774_v29  ;;  %1697 = vmatprep.mubr.msk.bf16.mxu1 %vm402_vm2, %v1775_v30  ;;  %v271_v29 = vld [vmem:[#allocation2 + $0x70] sm:$0xff] }
  0x5d   : > { %1664 = vmatmul.mubr.msk.bf16.gmra.mxu0 %vm402_vm2, %v1776_v31  ;;  %1698 = vmatmul.mubr.msk.bf16.gmra.mxu1 %vm402_vm2, %v1777_v32 }
  0x5e   : > { %1667 = vmatprep.mubr.msk.bf16.mxu0 %vm402_vm2, %v1778_v33  ;;  %1701 = vmatprep.mubr.msk.bf16.mxu1 %vm402_vm2, %v1779_v34  ;;  %v269_v34 = vld [vmem:[#allocation2 + $0x60] sm:$0xff] }
  0x65   : > { %1668 = vmatmul.mubr.msk.bf16.gmra.mxu0 %vm402_vm2, %v1780_v35  ;;  %1702 = vmatmul.mubr.msk.bf16.gmra.mxu1 %vm402_vm2, %v1781_v36 }
  0xed   : > { %v1641_v38 = vpop.f32.mrf.mxu0  ;;  %v1675_v41 = vpop.f32.mrf.mxu1 }
  0xee   : > { %v618_v40 = vadd.f32 %v1641_v38, %v259_v37 }
  0xef   : > { %v489_v42 = vpop.f32.mrf.mxu0  ;;  %v847_v46 = vpop.f32.mrf.mxu1 }
  0xf0   : > { %v976_v44 = vadd.f32 %v1675_v41, %v618_v40  ;;  %v616_v45 = vadd.f32 %v489_v42, %v257_v39  ;;  %v272_v39 = vld [vmem:[#allocation2 + $0x78] sm:$0xff] }
  0xf1   : > { %v1642_v47 = vpop.f32.mrf.mxu0  ;;  %v1676_v51 = vpop.f32.mrf.mxu1 }
  0xf2   : > { %1009 = vst.msk [vmem:[#allocation2 + $0x10] sm:$0xff] %vm1006_vm3, %v976_v44  ;;  %v974_v49 = vadd.f32 %v847_v46, %v616_v45  ;;  %v619_v50 = vadd.f32 %v1642_v47, %v260_v43  ;;  %v270_v44 = vld [vmem:[#allocation2 + $0x68] sm:$0xff] }
  0xf3   : > { %v492_v52 = vpop.f32.mrf.mxu0  ;;  %v850_v56 = vpop.f32.mrf.mxu1 }
  0xf4   : > { %1007 = vst.msk [vmem:[#allocation2] sm:$0xff] %vm1006_vm3, %v974_v49  ;;  %v977_v54 = vadd.f32 %v1676_v51, %v619_v50  ;;  %v617_v55 = vadd.f32 %v492_v52, %v258_v48  ;;  %v275_v49 = vld [vmem:[#allocation2 + $0x90] sm:$0xff] }
  0xf5   : > { %v1645_v57 = vpop.f32.mrf.mxu0  ;;  %v1679_v61 = vpop.f32.mrf.mxu1 }
  0xf6   : > { %1010 = vst.msk [vmem:[#allocation2 + $0x18] sm:$0xff] %vm1006_vm3, %v977_v54  ;;  %v975_v59 = vadd.f32 %v850_v56, %v617_v55  ;;  %v622_v60 = vadd.f32 %v1645_v57, %v263_v53  ;;  %v273_v54 = vld [vmem:[#allocation2 + $0x80] sm:$0xff] }
  0xf7   : > { %v505_v62 = vpop.f32.mrf.mxu0  ;;  %v863_v2 = vpop.f32.mrf.mxu1 }
  0xf8   : > { %1008 = vst.msk [vmem:[#allocation2 + $0x8] sm:$0xff] %vm1006_vm3, %v975_v59  ;;  %v980_v0 = vadd.f32 %v1679_v61, %v622_v60  ;;  %v620_v1 = vadd.f32 %v505_v62, %v261_v58  ;;  %v276_v59 = vld [vmem:[#allocation2 + $0x98] sm:$0xff] }
  0xf9   : > { %v1646_v3 = vpop.f32.mrf.mxu0  ;;  %v1680_v7 = vpop.f32.mrf.mxu1 }
  0xfa   : > { %1013 = vst.msk [vmem:[#allocation2 + $0x30] sm:$0xff] %vm1006_vm3, %v980_v0  ;;  %v978_v5 = vadd.f32 %v863_v2, %v620_v1  ;;  %v623_v6 = vadd.f32 %v1646_v3, %v264_v63  ;;  %v274_v0 = vld [vmem:[#allocation2 + $0x88] sm:$0xff] }
  0xfb   : > { %v508_v8 = vpop.f32.mrf.mxu0  ;;  %v866_v12 = vpop.f32.mrf.mxu1 }
  0xfc   : > { %1011 = vst.msk [vmem:[#allocation2 + $0x20] sm:$0xff] %vm1006_vm3, %v978_v5  ;;  %v981_v10 = vadd.f32 %v1680_v7, %v623_v6  ;;  %v621_v11 = vadd.f32 %v508_v8, %v262_v4  ;;  %v279_v5 = vld [vmem:[#allocation2 + $0xb0] sm:$0xff] }
  0xfd   : > { %v1649_v13 = vpop.f32.mrf.mxu0  ;;  %v1683_v17 = vpop.f32.mrf.mxu1 }
  0xfe   : > { %1014 = vst.msk [vmem:[#allocation2 + $0x38] sm:$0xff] %vm1006_vm3, %v981_v10  ;;  %v979_v15 = vadd.f32 %v866_v12, %v621_v11  ;;  %v626_v16 = vadd.f32 %v1649_v13, %v267_v9  ;;  %v277_v10 = vld [vmem:[#allocation2 + $0xa0] sm:$0xff] }
  0xff   : > { %v521_v18 = vpop.f32.mrf.mxu0  ;;  %v879_v22 = vpop.f32.mrf.mxu1 }
 0x100   : > { %1012 = vst.msk [vmem:[#allocation2 + $0x28] sm:$0xff] %vm1006_vm3, %v979_v15  ;;  %v984_v20 = vadd.f32 %v1683_v17, %v626_v16  ;;  %v624_v21 = vadd.f32 %v521_v18, %v265_v14  ;;  %v280_v15 = vld [vmem:[#allocation2 + $0xb8] sm:$0xff] }
 0x101   : > { %v1650_v23 = vpop.f32.mrf.mxu0  ;;  %v1684_v27 = vpop.f32.mrf.mxu1 }
 0x102   : > { %1017 = vst.msk [vmem:[#allocation2 + $0x50] sm:$0xff] %vm1006_vm3, %v984_v20  ;;  %v982_v25 = vadd.f32 %v879_v22, %v624_v21  ;;  %v627_v26 = vadd.f32 %v1650_v23, %v268_v19  ;;  %v278_v20 = vld [vmem:[#allocation2 + $0xa8] sm:$0xff] }
 0x103   : > { %v524_v28 = vpop.f32.mrf.mxu0  ;;  %v882_v32 = vpop.f32.mrf.mxu1 }
 0x104   : > { %1015 = vst.msk [vmem:[#allocation2 + $0x40] sm:$0xff] %vm1006_vm3, %v982_v25  ;;  %v985_v30 = vadd.f32 %v1684_v27, %v627_v26  ;;  %v625_v31 = vadd.f32 %v524_v28, %v266_v24  ;;  %v283_v25 = vld [vmem:[#allocation2 + $0xd0] sm:$0xff] }
 0x105   : > { %v1653_v33 = vpop.f32.mrf.mxu0  ;;  %v1687_v37 = vpop.f32.mrf.mxu1 }
 0x106   : > { %1018 = vst.msk [vmem:[#allocation2 + $0x58] sm:$0xff] %vm1006_vm3, %v985_v30  ;;  %v983_v35 = vadd.f32 %v882_v32, %v625_v31  ;;  %v630_v36 = vadd.f32 %v1653_v33, %v271_v29  ;;  %v281_v30 = vld [vmem:[#allocation2 + $0xc0] sm:$0xff] }
 0x107   : > { %v537_v38 = vpop.f32.mrf.mxu0  ;;  %v895_v42 = vpop.f32.mrf.mxu1 }
 0x108   : > { %1016 = vst.msk [vmem:[#allocation2 + $0x48] sm:$0xff] %vm1006_vm3, %v983_v35  ;;  %v988_v40 = vadd.f32 %v1687_v37, %v630_v36  ;;  %v628_v41 = vadd.f32 %v537_v38, %v269_v34  ;;  %v284_v35 = vld [vmem:[#allocation2 + $0xd8] sm:$0xff] }
 0x109   : > { %v1654_v43 = vpop.f32.mrf.mxu0  ;;  %v1688_v47 = vpop.f32.mrf.mxu1 }
 0x10a   : > { %1021 = vst.msk [vmem:[#allocation2 + $0x70] sm:$0xff] %vm1006_vm3, %v988_v40  ;;  %v986_v45 = vadd.f32 %v895_v42, %v628_v41  ;;  %v631_v46 = vadd.f32 %v1654_v43, %v272_v39  ;;  %v282_v40 = vld [vmem:[#allocation2 + $0xc8] sm:$0xff] }
 0x10b   : > { %v540_v48 = vpop.f32.mrf.mxu0  ;;  %v898_v52 = vpop.f32.mrf.mxu1 }
 0x10c   : > { %1019 = vst.msk [vmem:[#allocation2 + $0x60] sm:$0xff] %vm1006_vm3, %v986_v45  ;;  %v989_v50 = vadd.f32 %v1688_v47, %v631_v46  ;;  %v629_v51 = vadd.f32 %v540_v48, %v270_v44  ;;  %v287_v45 = vld [vmem:[#allocation2 + $0xf0] sm:$0xff] }
 0x10d   : > { %v1657_v53 = vpop.f32.mrf.mxu0  ;;  %v1691_v57 = vpop.f32.mrf.mxu1 }
 0x10e   : > { %1022 = vst.msk [vmem:[#allocation2 + $0x78] sm:$0xff] %vm1006_vm3, %v989_v50  ;;  %v987_v55 = vadd.f32 %v898_v52, %v629_v51  ;;  %v634_v56 = vadd.f32 %v1657_v53, %v275_v49  ;;  %v285_v50 = vld [vmem:[#allocation2 + $0xe0] sm:$0xff] }
 0x10f   : > { %v553_v58 = vpop.f32.mrf.mxu0  ;;  %v911_v62 = vpop.f32.mrf.mxu1 }
 0x110   : > { %1020 = vst.msk [vmem:[#allocation2 + $0x68] sm:$0xff] %vm1006_vm3, %v987_v55  ;;  %v992_v60 = vadd.f32 %v1691_v57, %v634_v56  ;;  %v632_v61 = vadd.f32 %v553_v58, %v273_v54  ;;  %v288_v55 = vld [vmem:[#allocation2 + $0xf8] sm:$0xff] }
 0x111   : > { %v1658_v63 = vpop.f32.mrf.mxu0  ;;  %v1692_v3 = vpop.f32.mrf.mxu1 }
 0x112   : > { %1025 = vst.msk [vmem:[#allocation2 + $0x90] sm:$0xff] %vm1006_vm3, %v992_v60  ;;  %v990_v1 = vadd.f32 %v911_v62, %v632_v61  ;;  %v635_v2 = vadd.f32 %v1658_v63, %v276_v59  ;;  %v286_v60 = vld [vmem:[#allocation2 + $0xe8] sm:$0xff] }
 0x113   : > { %v556_v4 = vpop.f32.mrf.mxu0  ;;  %v914_v8 = vpop.f32.mrf.mxu1 }
 0x114   : > { %1023 = vst.msk [vmem:[#allocation2 + $0x80] sm:$0xff] %vm1006_vm3, %v990_v1  ;;  %v993_v6 = vadd.f32 %v1692_v3, %v635_v2  ;;  %v633_v7 = vadd.f32 %v556_v4, %v274_v0 }
 0x115   : > { %v1661_v9 = vpop.f32.mrf.mxu0  ;;  %v1695_v13 = vpop.f32.mrf.mxu1 }
 0x116   : > { %1026 = vst.msk [vmem:[#allocation2 + $0x98] sm:$0xff] %vm1006_vm3, %v993_v6  ;;  %v991_v11 = vadd.f32 %v914_v8, %v633_v7  ;;  %v638_v12 = vadd.f32 %v1661_v9, %v279_v5 }
 0x117   : > { %v569_v14 = vpop.f32.mrf.mxu0  ;;  %v927_v18 = vpop.f32.mrf.mxu1 }
 0x118   : > { %1024 = vst.msk [vmem:[#allocation2 + $0x88] sm:$0xff] %vm1006_vm3, %v991_v11  ;;  %v996_v16 = vadd.f32 %v1695_v13, %v638_v12  ;;  %v636_v17 = vadd.f32 %v569_v14, %v277_v10 }
 0x119   : > { %v1662_v19 = vpop.f32.mrf.mxu0  ;;  %v1696_v23 = vpop.f32.mrf.mxu1 }
 0x11a   : > { %1029 = vst.msk [vmem:[#allocation2 + $0xb0] sm:$0xff] %vm1006_vm3, %v996_v16  ;;  %v994_v21 = vadd.f32 %v927_v18, %v636_v17  ;;  %v639_v22 = vadd.f32 %v1662_v19, %v280_v15 }
 0x11b   : > { %v572_v24 = vpop.f32.mrf.mxu0  ;;  %v930_v28 = vpop.f32.mrf.mxu1 }
 0x11c   : > { %1027 = vst.msk [vmem:[#allocation2 + $0xa0] sm:$0xff] %vm1006_vm3, %v994_v21  ;;  %v997_v26 = vadd.f32 %v1696_v23, %v639_v22  ;;  %v637_v27 = vadd.f32 %v572_v24, %v278_v20 }
 0x11d   : > { %v1665_v29 = vpop.f32.mrf.mxu0  ;;  %v1699_v33 = vpop.f32.mrf.mxu1 }
 0x11e   : > { %1030 = vst.msk [vmem:[#allocation2 + $0xb8] sm:$0xff] %vm1006_vm3, %v997_v26  ;;  %v995_v31 = vadd.f32 %v930_v28, %v637_v27  ;;  %v642_v32 = vadd.f32 %v1665_v29, %v283_v25 }
 0x11f   : > { %v585_v34 = vpop.f32.mrf.mxu0  ;;  %v943_v38 = vpop.f32.mrf.mxu1 }
 0x120   : > { %1028 = vst.msk [vmem:[#allocation2 + $0xa8] sm:$0xff] %vm1006_vm3, %v995_v31  ;;  %v1000_v36 = vadd.f32 %v1699_v33, %v642_v32  ;;  %v640_v37 = vadd.f32 %v585_v34, %v281_v30 }
 0x121   : > { %v1666_v39 = vpop.f32.mrf.mxu0  ;;  %v1700_v43 = vpop.f32.mrf.mxu1 }
 0x122   : > { %1033 = vst.msk [vmem:[#allocation2 + $0xd0] sm:$0xff] %vm1006_vm3, %v1000_v36  ;;  %v998_v41 = vadd.f32 %v943_v38, %v640_v37  ;;  %v643_v42 = vadd.f32 %v1666_v39, %v284_v35 }
 0x123   : > { %v588_v44 = vpop.f32.mrf.mxu0  ;;  %v946_v48 = vpop.f32.mrf.mxu1 }
 0x124   : > { %1031 = vst.msk [vmem:[#allocation2 + $0xc0] sm:$0xff] %vm1006_vm3, %v998_v41  ;;  %v1001_v46 = vadd.f32 %v1700_v43, %v643_v42  ;;  %v641_v47 = vadd.f32 %v588_v44, %v282_v40 }
 0x125   : > { %v1669_v49 = vpop.f32.mrf.mxu0  ;;  %v1703_v53 = vpop.f32.mrf.mxu1 }
 0x126   : > { %1034 = vst.msk [vmem:[#allocation2 + $0xd8] sm:$0xff] %vm1006_vm3, %v1001_v46  ;;  %v999_v51 = vadd.f32 %v946_v48, %v641_v47  ;;  %v646_v52 = vadd.f32 %v1669_v49, %v287_v45 }
 0x127   : > { %v601_v54 = vpop.f32.mrf.mxu0  ;;  %v959_v58 = vpop.f32.mrf.mxu1 }
 0x128   : > { %1032 = vst.msk [vmem:[#allocation2 + $0xc8] sm:$0xff] %vm1006_vm3, %v999_v51  ;;  %v1004_v56 = vadd.f32 %v1703_v53, %v646_v52  ;;  %v644_v57 = vadd.f32 %v601_v54, %v285_v50 }
 0x129   : > { %v1670_v59 = vpop.f32.mrf.mxu0  ;;  %v1704_v63 = vpop.f32.mrf.mxu1 }
 0x12a   : > { %1037 = vst.msk [vmem:[#allocation2 + $0xf0] sm:$0xff] %vm1006_vm3, %v1004_v56  ;;  %v1002_v61 = vadd.f32 %v959_v58, %v644_v57  ;;  %v647_v62 = vadd.f32 %v1670_v59, %v288_v55 }
 0x12b   : > { %v604_v0 = vpop.f32.mrf.mxu0  ;;  %v962_v3 = vpop.f32.mrf.mxu1 }
 0x12c   : > { %1035 = vst.msk [vmem:[#allocation2 + $0xe0] sm:$0xff] %vm1006_vm3, %v1002_v61  ;;  %v1005_v1 = vadd.f32 %v1704_v63, %v647_v62  ;;  %v645_v2 = vadd.f32 %v604_v0, %v286_v60  ;;  %1042 = sbr.rel (%p1534_p9) target bundleno = 352 (0x160), region = 40 }
 0x12e   : > { %1038 = vst.msk [vmem:[#allocation2 + $0xf8] sm:$0xff] %vm1006_vm3, %v1005_v1  ;;  %v1003_v4 = vadd.f32 %v962_v3, %v645_v2 }
 0x130   : > { %1036 = vst.msk [vmem:[#allocation2 + $0xe8] sm:$0xff] %vm1006_vm3, %v1003_v4 }
 0x131   : > { %v1043_v5 = vld [vmem:[#allocation2] sm:$0xff]  ;;  %v1044_v7 = vld [vmem:[#allocation2 + $0x8] sm:$0xff]  ;;  %v1045_v10 = vld [vmem:[#allocation2 + $0x10] sm:$0xff]  ;;  %vm1338_vm4 = vcmask 519168  }
 0x132   : > { %v2028_v6 = vld [vmem:[%s2144_s2] ss:$0 sm:$0xff]  ;;  %v1046_v11 = vld [vmem:[#allocation2 + $0x18] sm:$0xff]  ;;  %v1048_v16 = vld [vmem:[#allocation2 + $0x28] sm:$0xff] }
 0x133   : > { %v1082_v8 = vadd.f32 %v2028_v6, %v1043_v5  ;;  %v1083_v9 = vadd.f32 %v2028_v6, %v1044_v7  ;;  %v1047_v12 = vld [vmem:[#allocation2 + $0x20] sm:$0xff]  ;;  %v1084_v13 = vadd.f32 %v2028_v6, %v1045_v10  ;;  %v1085_v14 = vadd.f32 %v2028_v6, %v1046_v11  ;;  %v1049_v24 = vld [vmem:[#allocation2 + $0x30] sm:$0xff]  ;;  %v1050_v25 = vld [vmem:[#allocation2 + $0x38] sm:$0xff] }
 0x134   : > { %v1086_v15 = vadd.f32 %v2028_v6, %v1047_v12  ;;  %v1051_v26 = vld [vmem:[#allocation2 + $0x40] sm:$0xff]  ;;  %v1052_v31 = vld [vmem:[#allocation2 + $0x48] sm:$0xff]  ;;  %v1053_v32 = vld [vmem:[#allocation2 + $0x50] sm:$0xff]  ;;  %v1087_v36 = vadd.f32 %v2028_v6, %v1048_v16  ;;  %v1088_v38 = vadd.f32 %v2028_v6, %v1049_v24  ;;  %v1089_v39 = vadd.f32 %v2028_v6, %v1050_v25 }
 0x135   : > { %vm1114_vm5 = vcmp.ge.f32.partialorder %v1082_v8, 0.0  ;;  %v1146_v17 = vmul.f32 0.2, %v1082_v8  ;;  %vm1115_vm6 = vcmp.ge.f32.partialorder %v1083_v9, 0.0  ;;  %v1147_v18 = vmul.f32 0.2, %v1083_v9 }
 0x136   : > { %vm1116_vm7 = vcmp.ge.f32.partialorder %v1084_v13, 0.0  ;;  %v1148_v19 = vmul.f32 0.2, %v1084_v13  ;;  %vm1117_vm8 = vcmp.ge.f32.partialorder %v1085_v14, 0.0  ;;  %v1149_v20 = vmul.f32 0.2, %v1085_v14 }
 0x137   : > { %v1178_v21 = vsel %vm1114_vm5, %v1082_v8, %v1146_v17  ;;  %v1179_v22 = vsel %vm1115_vm6, %v1083_v9, %v1147_v18  ;;  %vm1118_vm9 = vcmp.ge.f32.partialorder %v1086_v15, 0.0  ;;  %v1150_v23 = vmul.f32 0.2, %v1086_v15  ;;  %v1054_v48 = vld [vmem:[#allocation2 + $0x58] sm:$0xff]  ;;  %v1055_v53 = vld [vmem:[#allocation2 + $0x60] sm:$0xff]  ;;  %v1056_v54 = vld [vmem:[#allocation2 + $0x68] sm:$0xff] }
 0x138   : > { %v1571_v27 = vpack.c.bf16 %v1178_v21, %v1178_v21  ;;  %v1572_v28 = vpack.c.bf16 %v1179_v22, %v1179_v22  ;;  %v1180_v29 = vsel %vm1116_vm7, %v1084_v13, %v1148_v19  ;;  %v1181_v30 = vsel %vm1117_vm8, %v1085_v14, %v1149_v20  ;;  %v1057_v55 = vld [vmem:[#allocation2 + $0x70] sm:$0xff]  ;;  %v1058_v59 = vld [vmem:[#allocation2 + $0x78] sm:$0xff]  ;;  %v1059_v10 = vld [vmem:[#allocation2 + $0x80] sm:$0xff] }
 0x139   : > { %v1573_v33 = vpack.c.bf16 %v1180_v29, %v1180_v29  ;;  %v1574_v34 = vpack.c.bf16 %v1181_v30, %v1181_v30  ;;  %v1182_v35 = vsel %vm1118_vm9, %v1086_v15, %v1150_v23  ;;  %v1090_v40 = vadd.f32 %v2028_v6, %v1051_v26  ;;  %v1060_v14 = vld [vmem:[#allocation2 + $0x88] sm:$0xff]  ;;  %v1061_v18 = vld [vmem:[#allocation2 + $0x90] sm:$0xff]  ;;  %v1062_v23 = vld [vmem:[#allocation2 + $0x98] sm:$0xff] }
 0x13a   : > { %1339 = vst.msk [vmem:[%s1881_s27] sm:$0xf] %vm1338_vm4, %v1571_v27  ;;  %1340 = vst.msk [vmem:[%s1881_s27 + $0x4] sm:$0xf] %vm1338_vm4, %v1572_v28  ;;  %v1575_v37 = vpack.c.bf16 %v1182_v35, %v1182_v35  ;;  %vm1119_vm10 = vcmp.ge.f32.partialorder %v1087_v36, 0.0  ;;  %v1091_v42 = vadd.f32 %v2028_v6, %v1052_v31  ;;  %v1092_v43 = vadd.f32 %v2028_v6, %v1053_v32  ;;  %v1063_v24 = vld [vmem:[#allocation2 + $0xa0] sm:$0xff] }
 0x13b   : > { %1341 = vst.msk [vmem:[%s1881_s27 + $0x8] sm:$0xf] %vm1338_vm4, %v1573_v33  ;;  %1342 = vst.msk [vmem:[%s1881_s27 + $0xc] sm:$0xf] %vm1338_vm4, %v1574_v34  ;;  %v1151_v41 = vmul.f32 0.2, %v1087_v36  ;;  %v1093_v63 = vadd.f32 %v2028_v6, %v1054_v48  ;;  %v1094_v1 = vadd.f32 %v2028_v6, %v1055_v53  ;;  %v1095_v2 = vadd.f32 %v2028_v6, %v1056_v54 }
 0x13c   : > { %1343 = vst.msk [vmem:[%s1881_s27 + $0x10] sm:$0xf] %vm1338_vm4, %v1575_v37  ;;  %vm1120_vm11 = vcmp.ge.f32.partialorder %v1088_v38, 0.0  ;;  %v1152_v44 = vmul.f32 0.2, %v1088_v38  ;;  %vm1121_vm12 = vcmp.ge.f32.partialorder %v1089_v39, 0.0  ;;  %v1096_v3 = vadd.f32 %v2028_v6, %v1057_v55 }
 0x13d   : > { %v1153_v45 = vmul.f32 0.2, %v1089_v39  ;;  %v1183_v46 = vsel %vm1119_vm10, %v1087_v36, %v1151_v41  ;;  %vm1122_vm13 = vcmp.ge.f32.partialorder %v1090_v40, 0.0  ;;  %v1154_v47 = vmul.f32 0.2, %v1090_v40  ;;  %v1064_v29 = vld [vmem:[#allocation2 + $0xa8] sm:$0xff] }
 0x13e   : > { %vm1123_vm14 = vcmp.ge.f32.partialorder %v1091_v42, 0.0  ;;  %v1576_v49 = vpack.c.bf16 %v1183_v46, %v1183_v46  ;;  %v1184_v50 = vsel %vm1120_vm11, %v1088_v38, %v1152_v44  ;;  %v1155_v52 = vmul.f32 0.2, %v1091_v42  ;;  %v1068_v48 = vld [vmem:[#allocation2 + $0xc8] sm:$0xff] }
 0x13f   : > { %v1185_v51 = vsel %vm1121_vm12, %v1089_v39, %v1153_v45  ;;  %v1577_v56 = vpack.c.bf16 %v1184_v50, %v1184_v50  ;;  %v1186_v58 = vsel %vm1122_vm13, %v1090_v40, %v1154_v47  ;;  %vm1124_vm15 = vcmp.ge.f32.partialorder %v1092_v43, 0.0  ;;  %v1067_v47 = vld [vmem:[#allocation2 + $0xc0] sm:$0xff] }
 0x140   : > { %v1578_v57 = vpack.c.bf16 %v1185_v51, %v1185_v51  ;;  %1344 = vst.msk [vmem:[%s1881_s27 + $0x14] sm:$0xf] %vm1338_vm4, %v1576_v49  ;;  %v1579_v60 = vpack.c.bf16 %v1186_v58, %v1186_v58  ;;  %v1187_v61 = vsel %vm1123_vm14, %v1091_v42, %v1155_v52  ;;  %v1156_v62 = vmul.f32 0.2, %v1092_v43  ;;  %v1065_v42 = vld [vmem:[#allocation2 + $0xb0] sm:$0xff] }
 0x141   : > { %1345 = vst.msk [vmem:[%s1881_s27 + $0x18] sm:$0xf] %vm1338_vm4, %v1577_v56  ;;  %v1580_v0 = vpack.c.bf16 %v1187_v61, %v1187_v61  ;;  %vm1125_vm0 = vcmp.ge.f32.partialorder %v1093_v63, 0.0  ;;  %v1157_v5 = vmul.f32 0.2, %v1093_v63  ;;  %v1097_v7 = vadd.f32 %v2028_v6, %v1058_v59  ;;  %v1070_v61 = vld [vmem:[#allocation2 + $0xd8] sm:$0xff] }
 0x142   : > { %1346 = vst.msk [vmem:[%s1881_s27 + $0x1c] sm:$0xf] %vm1338_vm4, %v1578_v57  ;;  %1347 = vst.msk [vmem:[%s1881_s27 + $0x20] sm:$0xf] %vm1338_vm4, %v1579_v60  ;;  %v1188_v4 = vsel %vm1124_vm15, %v1092_v43, %v1156_v62  ;;  %vm1126_vm1 = vcmp.ge.f32.partialorder %v1094_v1, 0.0  ;;  %vm1127_vm2 = vcmp.ge.f32.partialorder %v1095_v2, 0.0  ;;  %v1098_v22 = vadd.f32 %v2028_v6, %v1059_v10 }
 0x143   : > { %1348 = vst.msk [vmem:[%s1881_s27 + $0x24] sm:$0xf] %vm1338_vm4, %v1580_v0  ;;  %v1581_v8 = vpack.c.bf16 %v1188_v4, %v1188_v4  ;;  %v1158_v9 = vmul.f32 0.2, %v1094_v1  ;;  %v1189_v11 = vsel %vm1125_vm0, %v1093_v63, %v1157_v5  ;;  %v1159_v12 = vmul.f32 0.2, %v1095_v2 }
 0x144   : > { %vm1128_vm3 = vcmp.ge.f32.partialorder %v1096_v3, 0.0  ;;  %v1160_v13 = vmul.f32 0.2, %v1096_v3  ;;  %v1582_v15 = vpack.c.bf16 %v1189_v11, %v1189_v11  ;;  %vm1129_vm5 = vcmp.ge.f32.partialorder %v1097_v7, 0.0  ;;  %v1066_v43 = vld [vmem:[#allocation2 + $0xb8] sm:$0xff]  ;;  %v1069_v60 = vld [vmem:[#allocation2 + $0xd0] sm:$0xff] }
 0x145   : > { %1349 = vst.msk [vmem:[%s1881_s27 + $0x28] sm:$0xf] %vm1338_vm4, %v1581_v8  ;;  %v1190_v16 = vsel %vm1126_vm1, %v1094_v1, %v1158_v9  ;;  %v1161_v17 = vmul.f32 0.2, %v1097_v7  ;;  %v1191_v20 = vsel %vm1127_vm2, %v1095_v2, %v1159_v12  ;;  %v1099_v28 = vadd.f32 %v2028_v6, %v1060_v14  ;;  %v1071_v0 = vld [vmem:[#allocation2 + $0xe0] sm:$0xff]  ;;  %v1072_v12 = vld [vmem:[#allocation2 + $0xe8] sm:$0xff] }
 0x146   : > { %v1583_v19 = vpack.c.bf16 %v1190_v16, %v1190_v16  ;;  %v1192_v21 = vsel %vm1128_vm3, %v1096_v3, %v1160_v13  ;;  %1350 = vst.msk [vmem:[%s1881_s27 + $0x2c] sm:$0xf] %vm1338_vm4, %v1582_v15  ;;  %v1584_v25 = vpack.c.bf16 %v1191_v20, %v1191_v20  ;;  %vm1130_vm6 = vcmp.ge.f32.partialorder %v1098_v22, 0.0  ;;  %v1073_v13 = vld [vmem:[#allocation2 + $0xf0] sm:$0xff] }
 0x147   : > { %v1585_v26 = vpack.c.bf16 %v1192_v21, %v1192_v21  ;;  %v1193_v27 = vsel %vm1129_vm5, %v1097_v7, %v1161_v17  ;;  %v1162_v31 = vmul.f32 0.2, %v1098_v22  ;;  %v1100_v32 = vadd.f32 %v2028_v6, %v1061_v18  ;;  %v1074_v17 = vld [vmem:[#allocation2 + $0xf8] sm:$0xff] }
 0x148   : > { %1351 = vst.msk [vmem:[%s1881_s27 + $0x30] sm:$0xf] %vm1338_vm4, %v1583_v19  ;;  %v1586_v30 = vpack.c.bf16 %v1193_v27, %v1193_v27  ;;  %1352 = vst.msk [vmem:[%s1881_s27 + $0x34] sm:$0xf] %vm1338_vm4, %v1584_v25  ;;  %vm1131_vm7 = vcmp.ge.f32.partialorder %v1099_v28, 0.0  ;;  %v1101_v34 = vadd.f32 %v2028_v6, %v1062_v23  ;;  %v1102_v35 = vadd.f32 %v2028_v6, %v1063_v24 }
 0x149   : > { %1353 = vst.msk [vmem:[%s1881_s27 + $0x38] sm:$0xf] %vm1338_vm4, %v1585_v26  ;;  %v1163_v33 = vmul.f32 0.2, %v1099_v28  ;;  %v1194_v36 = vsel %vm1130_vm6, %v1098_v22, %v1162_v31  ;;  %vm1132_vm8 = vcmp.ge.f32.partialorder %v1100_v32, 0.0  ;;  %v1103_v38 = vadd.f32 %v2028_v6, %v1064_v29 }
 0x14a   : > { %1354 = vst.msk [vmem:[%s1881_s27 + $0x3c] sm:$0xf] %vm1338_vm4, %v1586_v30  ;;  %v1164_v37 = vmul.f32 0.2, %v1100_v32  ;;  %v1587_v39 = vpack.c.bf16 %v1194_v36, %v1194_v36  ;;  %vm1133_vm9 = vcmp.ge.f32.partialorder %v1101_v34, 0.0  ;;  %vm1134_vm10 = vcmp.ge.f32.partialorder %v1102_v35, 0.0 }
 0x14b   : > { %v1195_v40 = vsel %vm1131_vm7, %v1099_v28, %v1163_v33  ;;  %v1165_v41 = vmul.f32 0.2, %v1101_v34  ;;  %v1166_v46 = vmul.f32 0.2, %v1102_v35  ;;  %vm1135_vm11 = vcmp.ge.f32.partialorder %v1103_v38, 0.0 }
 0x14c   : > { %v1588_v44 = vpack.c.bf16 %v1195_v40, %v1195_v40  ;;  %v1196_v45 = vsel %vm1132_vm8, %v1100_v32, %v1164_v37  ;;  %1355 = vst.msk [vmem:[%s1881_s27 + $0x40] sm:$0xf] %vm1338_vm4, %v1587_v39  ;;  %v1167_v51 = vmul.f32 0.2, %v1103_v38  ;;  %v1104_v54 = vadd.f32 %v2028_v6, %v1065_v42 }
 0x14d   : > { %v1589_v49 = vpack.c.bf16 %v1196_v45, %v1196_v45  ;;  %v1197_v50 = vsel %vm1133_vm9, %v1101_v34, %v1165_v41  ;;  %v1198_v53 = vsel %vm1134_vm10, %v1102_v35, %v1166_v46  ;;  %v1105_v55 = vadd.f32 %v2028_v6, %v1066_v43 }
 0x14e   : > { %1356 = vst.msk [vmem:[%s1881_s27 + $0x44] sm:$0xf] %vm1338_vm4, %v1588_v44  ;;  %v1590_v52 = vpack.c.bf16 %v1197_v50, %v1197_v50  ;;  %v1591_v56 = vpack.c.bf16 %v1198_v53, %v1198_v53  ;;  %v1199_v57 = vsel %vm1135_vm11, %v1103_v38, %v1167_v51  ;;  %v1106_v58 = vadd.f32 %v2028_v6, %v1067_v47 }
 0x14f   : > { %1357 = vst.msk [vmem:[%s1881_s27 + $0x48] sm:$0xf] %vm1338_vm4, %v1589_v49  ;;  %v1107_v59 = vadd.f32 %v2028_v6, %v1068_v48  ;;  %v1592_v62 = vpack.c.bf16 %v1199_v57, %v1199_v57  ;;  %vm1136_vm12 = vcmp.ge.f32.partialorder %v1104_v54, 0.0  ;;  %v1168_v63 = vmul.f32 0.2, %v1104_v54 }
 0x150   : > { %1358 = vst.msk [vmem:[%s1881_s27 + $0x4c] sm:$0xf] %vm1338_vm4, %v1590_v52  ;;  %vm1137_vm13 = vcmp.ge.f32.partialorder %v1105_v55, 0.0  ;;  %1359 = vst.msk [vmem:[%s1881_s27 + $0x50] sm:$0xf] %vm1338_vm4, %v1591_v56  ;;  %vm1138_vm14 = vcmp.ge.f32.partialorder %v1106_v58, 0.0  ;;  %v1108_v5 = vadd.f32 %v2028_v6, %v1069_v60  ;;  %v1109_v7 = vadd.f32 %v2028_v6, %v1070_v61 }
 0x151   : > { %v1169_v1 = vmul.f32 0.2, %v1105_v55  ;;  %v1170_v2 = vmul.f32 0.2, %v1106_v58  ;;  %vm1139_vm15 = vcmp.ge.f32.partialorder %v1107_v59, 0.0  ;;  %v1200_v3 = vsel %vm1136_vm12, %v1104_v54, %v1168_v63 }
 0x152   : > { %1360 = vst.msk [vmem:[%s1881_s27 + $0x54] sm:$0xf] %vm1338_vm4, %v1592_v62  ;;  %v1171_v4 = vmul.f32 0.2, %v1107_v59  ;;  %v1593_v8 = vpack.c.bf16 %v1200_v3, %v1200_v3  ;;  %v1110_v11 = vadd.f32 %v2028_v6, %v1071_v0  ;;  %vm1140_vm0 = vcmp.ge.f32.partialorder %v1108_v5, 0.0 }
 0x153   : > { %v1201_v9 = vsel %vm1137_vm13, %v1105_v55, %v1169_v1  ;;  %v1202_v10 = vsel %vm1138_vm14, %v1106_v58, %v1170_v2  ;;  %v1172_v19 = vmul.f32 0.2, %v1108_v5  ;;  %vm1141_vm1 = vcmp.ge.f32.partialorder %v1109_v7, 0.0 }
 0x154   : > { %v1594_v14 = vpack.c.bf16 %v1201_v9, %v1201_v9  ;;  %v1595_v15 = vpack.c.bf16 %v1202_v10, %v1202_v10  ;;  %v1203_v16 = vsel %vm1139_vm15, %v1107_v59, %v1171_v4  ;;  %1361 = vst.msk [vmem:[%s1881_s27 + $0x58] sm:$0xf] %vm1338_vm4, %v1593_v8  ;;  %v1173_v20 = vmul.f32 0.2, %v1109_v7 }
 0x155   : > { %v1596_v18 = vpack.c.bf16 %v1203_v16, %v1203_v16  ;;  %vm1142_vm2 = vcmp.ge.f32.partialorder %v1110_v11, 0.0  ;;  %v1174_v21 = vmul.f32 0.2, %v1110_v11  ;;  %v1111_v22 = vadd.f32 %v2028_v6, %v1072_v12 }
 0x156   : > { %1362 = vst.msk [vmem:[%s1881_s27 + $0x5c] sm:$0xf] %vm1338_vm4, %v1594_v14  ;;  %1363 = vst.msk [vmem:[%s1881_s27 + $0x60] sm:$0xf] %vm1338_vm4, %v1595_v15  ;;  %v1112_v23 = vadd.f32 %v2028_v6, %v1073_v13  ;;  %v1204_v24 = vsel %vm1140_vm0, %v1108_v5, %v1172_v19  ;;  %v1205_v25 = vsel %vm1141_vm1, %v1109_v7, %v1173_v20 }
 0x157   : > { %1364 = vst.msk [vmem:[%s1881_s27 + $0x64] sm:$0xf] %vm1338_vm4, %v1596_v18  ;;  %v1113_v26 = vadd.f32 %v2028_v6, %v1074_v17  ;;  %v1597_v27 = vpack.c.bf16 %v1204_v24, %v1204_v24  ;;  %v1598_v28 = vpack.c.bf16 %v1205_v25, %v1205_v25  ;;  %v1206_v29 = vsel %vm1142_vm2, %v1110_v11, %v1174_v21 }
 0x158   : > { %vm1143_vm3 = vcmp.ge.f32.partialorder %v1111_v22, 0.0  ;;  %v1599_v30 = vpack.c.bf16 %v1206_v29, %v1206_v29  ;;  %v1175_v31 = vmul.f32 0.2, %v1111_v22  ;;  %vm1144_vm5 = vcmp.ge.f32.partialorder %v1112_v23, 0.0 }
 0x159   : > { %v1176_v32 = vmul.f32 0.2, %v1112_v23  ;;  %1365 = vst.msk [vmem:[%s1881_s27 + $0x68] sm:$0xf] %vm1338_vm4, %v1597_v27  ;;  %1366 = vst.msk [vmem:[%s1881_s27 + $0x6c] sm:$0xf] %vm1338_vm4, %v1598_v28 }
 0x15a   : > { %vm1145_vm6 = vcmp.ge.f32.partialorder %v1113_v26, 0.0  ;;  %v1177_v33 = vmul.f32 0.2, %v1113_v26  ;;  %1367 = vst.msk [vmem:[%s1881_s27 + $0x70] sm:$0xf] %vm1338_vm4, %v1599_v30  ;;  %v1207_v6 = vsel %vm1143_vm3, %v1111_v22, %v1175_v31 }
 0x15b   : > { %v1208_v34 = vsel %vm1144_vm5, %v1112_v23, %v1176_v32  ;;  %v1600_v35 = vpack.c.bf16 %v1207_v6, %v1207_v6 }
 0x15c   : > { %v1601_v36 = vpack.c.bf16 %v1208_v34, %v1208_v34  ;;  %v1209_v37 = vsel %vm1145_vm6, %v1113_v26, %v1177_v33 }
 0x15d   : > { %v1602_v38 = vpack.c.bf16 %v1209_v37, %v1209_v37  ;;  %1368 = vst.msk [vmem:[%s1881_s27 + $0x74] sm:$0xf] %vm1338_vm4, %v1600_v35 }
 0x15e   : > { %1369 = vst.msk [vmem:[%s1881_s27 + $0x78] sm:$0xf] %vm1338_vm4, %v1601_v36 }
 0x15f   : > { %1370 = vst.msk [vmem:[%s1881_s27 + $0x7c] sm:$0xf] %vm1338_vm4, %v1602_v38 }
 0x160 PF: > { %s13_s16 = sadd.s32 1, %s1820_s16   ;;  %s2146_s12 = smov %s1812_s14 }
 0x161   : > { %p10_p10 = scmp.ge.s32.totalorder %s13_s16, 18   ;;  %s2147_s13 = smov %s1816_s15 }
 0x162   : > { %s2148_s14 = smov %s2151_s17  ;;  %s2149_s15 = smov %s2155_s18 }
 0x163   :  { %12 = sbr.rel (!%p10_p10) target bundleno = 3 (0x3), region = 74 }

// kernel: discriminator_forward.6
= control target key start
LH: loop header
LB: loop body
LE: loop exit
PB: predicated region body
PF: predicated region fallthrough
CT: control target
= control target key end

     0   :  { %s1330_s12 = smov 0   ;;  %s1332_s13 = smov 0   ;;  %s1466_s0 = inlined_call_operand.vmem [shape: bf16[8,2,144,64], index: 0, kind: input, shape index: {}]   ;;  %s1467_s1 = inlined_call_operand.vmem [shape: bf16[16,64,128], index: 1, kind: input, shape index: {}]   ;;  %s1468_s2 = inlined_call_operand.vmem [shape: f32[1,128], index: 2, kind: input, shape index: {}]   ;;  %s1469_s3 = inlined_call_operand.vmem [shape: bf16[2,128,128], index: 3, kind: output, shape index: {}]  }
   0x1   :  { %s1334_s14 = smov 0   ;;  %s1336_s15 = smov 0  }
   0x2   :  { %s1338_s16 = smov 0  }
   0x3 LB: > { %s22_s17 = sadd.s32 1, %s1299_s14  ;;  %s25_s18 = sadd.s32 1, %s1303_s15  ;;  %s1307_s16 = sphi %s1338_s16, %s13_s16   ;;  %s1303_s15 = sphi %s1336_s15, %s1473_s15   ;;  %s1299_s14 = sphi %s1334_s14, %s1472_s14   ;;  %s1295_s13 = sphi %s1332_s13, %s1471_s13   ;;  %s1291_s12 = sphi %s1330_s12, %s1470_s12  }
   0x4   : > { %p23_p0 = scmp.ge.s32.totalorder %s22_s17, 8  ;;  %p989_p1 = scmp.ge.s32.totalorder %s1307_s16, 1 }
   0x5   : > { %p167_p2 = scmp.lt.s32.totalorder %s1307_s16, 17 }
   0x6   : > { %s1475_s17 = smov (%p23_p0, %s22_s17), 0  ;;  %s1477_s18 = smov (!%p23_p0, %s25_s18), %s1303_s15 }
   0x7   : > { %p168_p3 = pnand %p989_p1, %p167_p2  ;;  %p27_p4 = scmp.ge.s32.totalorder %s1477_s18, 2 }
   0x8   : > { %p201_p5 = scmp.lt.s32.totalorder (!%p168_p3), %s1291_s12, 7  ;;  %p203_p6 = scmp.lt.s32.totalorder (!%p168_p3), %s1295_s13, 1 }
   0x9   : > { %s1479_s18 = smov (%p27_p4, %s1477_s18), 0  ;;  %171 = sbr.rel (%p168_p3) target bundleno = 301 (0x12d), region = 32 }
   0xa   : > { %s991_s19 = sshll.u32 (!%p168_p3), %s1291_s12, 1  ;;  %p996_p8 = scmp.ne.s32.totalorder (!%p168_p3), %s1291_s12, 0 }
   0xb   : > { %p211_p7 = scmp.lt.s32.totalorder (!%p168_p3), %s991_s19, 15 }
   0xe   : > { %s202_s20 = scalar_select %p201_p5, %s1291_s12, 7 }
   0xf   : > { %s1481_s13 = smov (!%p203_p6, %s1295_s13), 1  ;;  %s1483_s19 = smov (!%p211_p7, %s991_s19), 15 }
  0x10   : > { %s1203_s21 = smul.u32 36, %s202_s20  ;;  %s1066_s23 = sshll.u32 %s1481_s13, 6 }
  0x11   : > { %s1202_s22 = smul.u32 18, %s1481_s13  ;;  %s1368_s27 = scalar_lea.vmem %s1469_s3, %s1066_s23 }
  0x12   : > { %s1065_s29 = sshll.u32 %s1483_s19, 5  ;;  %226 = sbr.rel (%p996_p8) target bundleno = 32 (0x20), region = 36 }
  0x13   : > { %s207_s24 = sadd.s32 %s1203_s21, %s1202_s22  ;;  %s1378_s8 = scalar_lea.vmem %s1467_s1, %s1065_s29 }
  0x14   : > { %s990_s28 = sshll.u32 %s207_s24, 2 }
  0x15   : > { %s1373_s5 = scalar_lea.vmem %s1466_s0, %s990_s28 }
  0x17   : > { %v1309_v0 = vmov 0.0  }
  0x18   : > { %227 = vst [vmem:[#allocation2 + $0x30] sm:$0xff] %v1309_v0  ;;  %228 = vst [vmem:[#allocation2] sm:$0xff] %v1309_v0 }
  0x19   : > { %229 = vst [vmem:[#allocation2 + $0x58] sm:$0xff] %v1309_v0  ;;  %230 = vst [vmem:[#allocation2 + $0x18] sm:$0xff] %v1309_v0 }
  0x1a   : > { %231 = vst [vmem:[#allocation2 + $0x50] sm:$0xff] %v1309_v0  ;;  %232 = vst [vmem:[#allocation2 + $0x68] sm:$0xff] %v1309_v0 }
  0x1b   : > { %233 = vst [vmem:[#allocation2 + $0x8] sm:$0xff] %v1309_v0  ;;  %234 = vst [vmem:[#allocation2 + $0x48] sm:$0xff] %v1309_v0 }
  0x1c   : > { %235 = vst [vmem:[#allocation2 + $0x40] sm:$0xff] %v1309_v0  ;;  %236 = vst [vmem:[#allocation2 + $0x20] sm:$0xff] %v1309_v0 }
  0x1d   : > { %237 = vst [vmem:[#allocation2 + $0x10] sm:$0xff] %v1309_v0  ;;  %238 = vst [vmem:[#allocation2 + $0x38] sm:$0xff] %v1309_v0 }
  0x1e   : > { %239 = vst [vmem:[#allocation2 + $0x60] sm:$0xff] %v1309_v0  ;;  %240 = vst [vmem:[#allocation2 + $0x70] sm:$0xff] %v1309_v0 }
  0x1f   : > { %241 = vst [vmem:[#allocation2 + $0x78] sm:$0xff] %v1309_v0  ;;  %242 = vst [vmem:[#allocation2 + $0x28] sm:$0xff] %v1309_v0 }
  0x20 PF: > { %v1245_v1 = vld [vmem:[%s1378_s8 + $0x18] sm:$0xff]   ;;  %v1247_v3 = vld [vmem:[%s1378_s8 + $0x10] sm:$0xff]   ;;  %v1249_v5 = vld [vmem:[%s1378_s8 + $0x8] sm:$0xff]   ;;  %vm347_vm0 = vcmask 523264   ;;  %p1045_p9 = scmp.ne.s32.totalorder %s1291_s12, 7 }
  0x21   : > { %v1246_v2 = vld [vmem:[%s1378_s8 + $0x38] sm:$0xff]   ;;  %1154 = vmatprep.subr.bf16.mxu0 %v1245_v1  ;;  %v1248_v4 = vld [vmem:[%s1378_s8 + $0x30] sm:$0xff]   ;;  %v1250_v6 = vld [vmem:[%s1378_s8 + $0x28] sm:$0xff]  }
  0x22   : > { %1178 = vmatprep.subr.bf16.mxu1 %v1246_v2  ;;  %1155 = vmatpush3.bf16.msra.mxu0 %v1245_v1  ;;  %v1251_v7 = vld [vmem:[%s1378_s8] sm:$0xff]   ;;  %v1254_v10 = vld [vmem:[%s1373_s5 + $0x8] sm:$0xff]   ;;  %v1256_v12 = vld [vmem:[%s1373_s5 + $0x10] sm:$0xff]  }
  0x23   : > { %1179 = vmatpush3.bf16.msra.mxu1 %v1246_v2  ;;  %1156 = vmatprep.subr.bf16.mxu0 %v1247_v3  ;;  %v1252_v8 = vld [vmem:[%s1378_s8 + $0x20] sm:$0xff]   ;;  %v1255_v11 = vld [vmem:[%s1373_s5 + $0x8] sm:$0xff]   ;;  %v1257_v13 = vld [vmem:[%s1373_s5 + $0x10] sm:$0xff]  }
  0x24   : > { %1180 = vmatprep.subr.bf16.mxu1 %v1248_v4  ;;  %v1253_v9 = vld [vmem:[%s1373_s5] sm:$0xff]   ;;  %1186 = vmatprep.mubr.msk.bf16.mxu1 %vm347_vm0, %v1254_v10  ;;  %v1258_v14 = vld [vmem:[%s1373_s5 + $0x18] sm:$0xff]   ;;  %v1262_v18 = vld [vmem:[%s1373_s5 + $0x28] sm:$0xff]  }
  0x25   : > { %1162 = vmatprep.mubr.msk.bf16.mxu0 %vm347_vm0, %v1253_v9  ;;  %v1259_v15 = vld [vmem:[%s1373_s5 + $0x18] sm:$0xff]   ;;  %v1260_v16 = vld [vmem:[%s1373_s5 + $0x20] sm:$0xff]   ;;  %v1263_v19 = vld [vmem:[%s1373_s5 + $0x28] sm:$0xff]  }
  0x26   : > { %1157 = vmatpush3.bf16.msra.mxu0 %v1247_v3  ;;  %v1261_v17 = vld [vmem:[%s1373_s5 + $0x20] sm:$0xff]   ;;  %v1264_v20 = vld [vmem:[%s1373_s5 + $0x30] sm:$0xff]   ;;  %v1266_v22 = vld [vmem:[%s1373_s5 + $0x38] sm:$0xff]  }
  0x27   : > { %1181 = vmatpush3.bf16.msra.mxu1 %v1248_v4  ;;  %1158 = vmatprep.subr.bf16.mxu0 %v1249_v5  ;;  %v1265_v21 = vld [vmem:[%s1373_s5 + $0x30] sm:$0xff]   ;;  %v1267_v23 = vld [vmem:[%s1373_s5 + $0x38] sm:$0xff]   ;;  %v1268_v24 = vld [vmem:[%s1373_s5 + $0x40] sm:$0xff]  }
  0x28   : > { %1182 = vmatprep.subr.bf16.mxu1 %v1250_v6  ;;  %v245_v25 = vld [vmem:[#allocation2 + $0x58] sm:$0xff]  ;;  %v243_v27 = vld [vmem:[#allocation2 + $0x30] sm:$0xff]  ;;  %v244_v36 = vld [vmem:[#allocation2] sm:$0xff] }
  0x29   : > { %v246_v31 = vld [vmem:[#allocation2 + $0x18] sm:$0xff]  ;;  %v249_v41 = vld [vmem:[#allocation2 + $0x8] sm:$0xff]  ;;  %v247_v46 = vld [vmem:[#allocation2 + $0x50] sm:$0xff] }
  0x2a   : > { %1159 = vmatpush3.bf16.msra.mxu0 %v1249_v5  ;;  %v250_v51 = vld [vmem:[#allocation2 + $0x48] sm:$0xff]  ;;  %v253_v61 = vld [vmem:[#allocation2 + $0x10] sm:$0xff]  ;;  %v251_v2 = vld [vmem:[#allocation2 + $0x40] sm:$0xff] }
  0x2b   : > { %1183 = vmatpush3.bf16.msra.mxu1 %v1250_v6  ;;  %1160 = vmatprep.subr.bf16.mxu0 %v1251_v7  ;;  %v248_v56 = vld [vmem:[#allocation2 + $0x68] sm:$0xff] }
  0x2c   : > { %1184 = vmatprep.subr.bf16.mxu1 %v1252_v8 }
  0x2e   : > { %1161 = vmatpush3.bf16.msra.mxu0 %v1251_v7  ;;  %v254_v7 = vld [vmem:[#allocation2 + $0x38] sm:$0xff] }
  0x2f   : > { %1185 = vmatpush3.bf16.msra.mxu1 %v1252_v8 }
  0x31   : > { %1163 = vmatmul.mubr.msk.bf16.vlgmr.msra.gmra.mxu0 %vm347_vm0, %v1255_v11 }
  0x32   : > { %1187 = vmatmul.mubr.msk.bf16.vlgmr.msra.gmra.mxu1 %vm347_vm0, %v1256_v12  ;;  %1166 = vmatprep.mubr.msk.bf16.mxu0 %vm347_vm0, %v1257_v13  ;;  %v252_v12 = vld [vmem:[#allocation2 + $0x20] sm:$0xff] }
  0x33   : > { %1190 = vmatprep.mubr.msk.bf16.mxu1 %vm347_vm0, %v1258_v14 }
  0x39   : > { %1167 = vmatmul.mubr.msk.bf16.gmra.mxu0 %vm347_vm0, %v1259_v15 }
  0x3a   : > { %1191 = vmatmul.mubr.msk.bf16.gmra.mxu1 %vm347_vm0, %v1260_v16  ;;  %1170 = vmatprep.mubr.msk.bf16.mxu0 %vm347_vm0, %v1261_v17  ;;  %v257_v17 = vld [vmem:[#allocation2 + $0x78] sm:$0xff] }
  0x3b   : > { %1194 = vmatprep.mubr.msk.bf16.mxu1 %vm347_vm0, %v1262_v18 }
  0x41   : > { %1171 = vmatmul.mubr.msk.bf16.gmra.mxu0 %vm347_vm0, %v1263_v19 }
  0x42   : > { %1195 = vmatmul.mubr.msk.bf16.gmra.mxu1 %vm347_vm0, %v1264_v20  ;;  %1174 = vmatprep.mubr.msk.bf16.mxu0 %vm347_vm0, %v1265_v21 }
  0x43   : > { %1198 = vmatprep.mubr.msk.bf16.mxu1 %vm347_vm0, %v1266_v22  ;;  %v255_v22 = vld [vmem:[#allocation2 + $0x60] sm:$0xff] }
  0x49   : > { %1175 = vmatmul.mubr.msk.bf16.gmra.mxu0 %vm347_vm0, %v1267_v23 }
  0x4a   : > { %1199 = vmatmul.mubr.msk.bf16.gmra.mxu1 %vm347_vm0, %v1268_v24 }
  0xf1   : > { %v1164_v26 = vpop.f32.mrf.mxu0 }
  0xf2   : > { %v471_v28 = vadd.f32 %v1164_v26, %v245_v25  ;;  %v1188_v29 = vpop.f32.mrf.mxu1 }
  0xf3   : > { %v406_v30 = vpop.f32.mrf.mxu0 }
  0xf4   : > { %v697_v32 = vadd.f32 %v1188_v29, %v471_v28  ;;  %v469_v33 = vadd.f32 %v406_v30, %v243_v27  ;;  %v632_v34 = vpop.f32.mrf.mxu1  ;;  %v258_v27 = vld [vmem:[#allocation2 + $0x28] sm:$0xff] }
  0xf5   : > { %v1165_v35 = vpop.f32.mrf.mxu0 }
  0xf6   : > { %713 = vst [vmem:[#allocation2 + $0x58] sm:$0xff] %v697_v32  ;;  %v695_v37 = vadd.f32 %v632_v34, %v469_v33  ;;  %v472_v38 = vadd.f32 %v1165_v35, %v246_v31  ;;  %v1189_v39 = vpop.f32.mrf.mxu1  ;;  %v256_v32 = vld [vmem:[#allocation2 + $0x70] sm:$0xff] }
  0xf7   : > { %v409_v40 = vpop.f32.mrf.mxu0 }
  0xf8   : > { %711 = vst [vmem:[#allocation2 + $0x30] sm:$0xff] %v695_v37  ;;  %v698_v42 = vadd.f32 %v1189_v39, %v472_v38  ;;  %v470_v43 = vadd.f32 %v409_v40, %v244_v36  ;;  %v635_v44 = vpop.f32.mrf.mxu1 }
  0xf9   : > { %v1168_v45 = vpop.f32.mrf.mxu0 }
  0xfa   : > { %714 = vst [vmem:[#allocation2 + $0x18] sm:$0xff] %v698_v42  ;;  %v696_v47 = vadd.f32 %v635_v44, %v470_v43  ;;  %v475_v48 = vadd.f32 %v1168_v45, %v249_v41  ;;  %v1192_v49 = vpop.f32.mrf.mxu1 }
  0xfb   : > { %v422_v50 = vpop.f32.mrf.mxu0 }
  0xfc   : > { %712 = vst [vmem:[#allocation2] sm:$0xff] %v696_v47  ;;  %v701_v52 = vadd.f32 %v1192_v49, %v475_v48  ;;  %v473_v53 = vadd.f32 %v422_v50, %v247_v46  ;;  %v648_v54 = vpop.f32.mrf.mxu1 }
  0xfd   : > { %v1169_v55 = vpop.f32.mrf.mxu0 }
  0xfe   : > { %717 = vst [vmem:[#allocation2 + $0x8] sm:$0xff] %v701_v52  ;;  %v699_v57 = vadd.f32 %v648_v54, %v473_v53  ;;  %v476_v58 = vadd.f32 %v1169_v55, %v250_v51  ;;  %v1193_v59 = vpop.f32.mrf.mxu1 }
  0xff   : > { %v425_v60 = vpop.f32.mrf.mxu0 }
 0x100   : > { %715 = vst [vmem:[#allocation2 + $0x50] sm:$0xff] %v699_v57  ;;  %v702_v62 = vadd.f32 %v1193_v59, %v476_v58  ;;  %v474_v63 = vadd.f32 %v425_v60, %v248_v56  ;;  %v651_v0 = vpop.f32.mrf.mxu1 }
 0x101   : > { %v1172_v1 = vpop.f32.mrf.mxu0 }
 0x102   : > { %718 = vst [vmem:[#allocation2 + $0x48] sm:$0xff] %v702_v62  ;;  %v700_v3 = vadd.f32 %v651_v0, %v474_v63  ;;  %v479_v4 = vadd.f32 %v1172_v1, %v253_v61  ;;  %v1196_v5 = vpop.f32.mrf.mxu1 }
 0x103   : > { %v438_v6 = vpop.f32.mrf.mxu0 }
 0x104   : > { %716 = vst [vmem:[#allocation2 + $0x68] sm:$0xff] %v700_v3  ;;  %v705_v8 = vadd.f32 %v1196_v5, %v479_v4  ;;  %v477_v9 = vadd.f32 %v438_v6, %v251_v2  ;;  %v664_v10 = vpop.f32.mrf.mxu1 }
 0x105   : > { %v1173_v11 = vpop.f32.mrf.mxu0 }
 0x106   : > { %721 = vst [vmem:[#allocation2 + $0x10] sm:$0xff] %v705_v8  ;;  %v703_v13 = vadd.f32 %v664_v10, %v477_v9  ;;  %v480_v14 = vadd.f32 %v1173_v11, %v254_v7  ;;  %v1197_v15 = vpop.f32.mrf.mxu1 }
 0x107   : > { %v441_v16 = vpop.f32.mrf.mxu0 }
 0x108   : > { %719 = vst [vmem:[#allocation2 + $0x40] sm:$0xff] %v703_v13  ;;  %v706_v18 = vadd.f32 %v1197_v15, %v480_v14  ;;  %v478_v19 = vadd.f32 %v441_v16, %v252_v12  ;;  %v667_v20 = vpop.f32.mrf.mxu1 }
 0x109   : > { %v1176_v21 = vpop.f32.mrf.mxu0 }
 0x10a   : > { %722 = vst [vmem:[#allocation2 + $0x38] sm:$0xff] %v706_v18  ;;  %v704_v23 = vadd.f32 %v667_v20, %v478_v19  ;;  %v483_v24 = vadd.f32 %v1176_v21, %v257_v17  ;;  %v1200_v25 = vpop.f32.mrf.mxu1 }
 0x10b   : > { %v454_v26 = vpop.f32.mrf.mxu0 }
 0x10c   : > { %720 = vst [vmem:[#allocation2 + $0x20] sm:$0xff] %v704_v23  ;;  %v709_v28 = vadd.f32 %v1200_v25, %v483_v24  ;;  %v481_v29 = vadd.f32 %v454_v26, %v255_v22  ;;  %v680_v30 = vpop.f32.mrf.mxu1 }
 0x10d   : > { %v1177_v31 = vpop.f32.mrf.mxu0 }
 0x10e   : > { %725 = vst [vmem:[#allocation2 + $0x78] sm:$0xff] %v709_v28  ;;  %v707_v33 = vadd.f32 %v680_v30, %v481_v29  ;;  %v484_v34 = vadd.f32 %v1177_v31, %v258_v27  ;;  %v1201_v35 = vpop.f32.mrf.mxu1 }
 0x10f   : > { %v457_v36 = vpop.f32.mrf.mxu0 }
 0x110   : > { %723 = vst [vmem:[#allocation2 + $0x60] sm:$0xff] %v707_v33  ;;  %v710_v37 = vadd.f32 %v1201_v35, %v484_v34  ;;  %v482_v38 = vadd.f32 %v457_v36, %v256_v32  ;;  %v683_v39 = vpop.f32.mrf.mxu1  ;;  %730 = sbr.rel (%p1045_p9) target bundleno = 301 (0x12d), region = 40 }
 0x112   : > { %726 = vst [vmem:[#allocation2 + $0x28] sm:$0xff] %v710_v37  ;;  %v708_v40 = vadd.f32 %v683_v39, %v482_v38 }
 0x114   : > { %724 = vst [vmem:[#allocation2 + $0x70] sm:$0xff] %v708_v40 }
 0x115   : > { %v731_v41 = vld [vmem:[#allocation2 + $0x30] sm:$0xff]  ;;  %v732_v42 = vld [vmem:[#allocation2] sm:$0xff]  ;;  %v733_v46 = vld [vmem:[#allocation2 + $0x58] sm:$0xff] }
 0x116   : > { %v1425_v43 = vld [vmem:[%s1468_s2] ss:$0 sm:$0xff]  ;;  %v734_v47 = vld [vmem:[#allocation2 + $0x18] sm:$0xff]  ;;  %v735_v48 = vld [vmem:[#allocation2 + $0x50] sm:$0xff] }
 0x117   : > { %v754_v44 = vadd.f32 %v1425_v43, %v731_v41  ;;  %v755_v45 = vadd.f32 %v1425_v43, %v732_v42  ;;  %v756_v49 = vadd.f32 %v1425_v43, %v733_v46  ;;  %v757_v50 = vadd.f32 %v1425_v43, %v734_v47  ;;  %v736_v51 = vld [vmem:[#allocation2 + $0x68] sm:$0xff]  ;;  %v739_v62 = vld [vmem:[#allocation2 + $0x40] sm:$0xff]  ;;  %v741_v4 = vld [vmem:[#allocation2 + $0x10] sm:$0xff] }
 0x118   : > { %v758_v52 = vadd.f32 %v1425_v43, %v735_v48  ;;  %v737_v53 = vld [vmem:[#allocation2 + $0x8] sm:$0xff]  ;;  %v759_v60 = vadd.f32 %v1425_v43, %v736_v51  ;;  %v740_v63 = vld [vmem:[#allocation2 + $0x20] sm:$0xff]  ;;  %v762_v10 = vadd.f32 %v1425_v43, %v739_v62  ;;  %v742_v14 = vld [vmem:[#allocation2 + $0x38] sm:$0xff]  ;;  %v764_v15 = vadd.f32 %v1425_v43, %v741_v4 }
 0x119   : > { %vm770_vm1 = vcmp.ge.f32.partialorder %v754_v44, 0.0  ;;  %vm771_vm2 = vcmp.ge.f32.partialorder %v755_v45, 0.0  ;;  %v786_v54 = vmul.f32 0.2, %v754_v44  ;;  %v787_v55 = vmul.f32 0.2, %v755_v45 }
 0x11a   : > { %vm772_vm3 = vcmp.ge.f32.partialorder %v756_v49, 0.0  ;;  %vm773_vm4 = vcmp.ge.f32.partialorder %v757_v50, 0.0  ;;  %v788_v56 = vmul.f32 0.2, %v756_v49  ;;  %v789_v57 = vmul.f32 0.2, %v757_v50 }
 0x11b   : > { %v802_v58 = vsel %vm770_vm1, %v754_v44, %v786_v54  ;;  %v803_v59 = vsel %vm771_vm2, %v755_v45, %v787_v55  ;;  %vm774_vm5 = vcmp.ge.f32.partialorder %v758_v52, 0.0  ;;  %v738_v61 = vld [vmem:[#allocation2 + $0x48] sm:$0xff]  ;;  %v790_v3 = vmul.f32 0.2, %v758_v52  ;;  %v743_v18 = vld [vmem:[#allocation2 + $0x60] sm:$0xff]  ;;  %v744_v25 = vld [vmem:[#allocation2 + $0x70] sm:$0xff] }
 0x11c   : > { %v1086_v0 = vpack.c.bf16 %v803_v59, %v802_v58  ;;  %v804_v1 = vsel %vm772_vm3, %v756_v49, %v788_v56  ;;  %v805_v2 = vsel %vm773_vm4, %v757_v50, %v789_v57  ;;  %vm775_vm6 = vcmp.ge.f32.partialorder %v759_v60, 0.0  ;;  %v745_v26 = vld [vmem:[#allocation2 + $0x78] sm:$0xff]  ;;  %v746_v31 = vld [vmem:[#allocation2 + $0x28] sm:$0xff] }
 0x11d   : > { %v1091_v5 = vpack.c.bf16 %v805_v2, %v804_v1  ;;  %v791_v6 = vmul.f32 0.2, %v759_v60  ;;  %v760_v7 = vadd.f32 %v1425_v43, %v737_v53  ;;  %v806_v8 = vsel %vm774_vm5, %v758_v52, %v790_v3 }
 0x11e   : > { %1087 = vst [vmem:[%s1368_s27] sm:$0xff] %v1086_v0   ;;  %v761_v9 = vadd.f32 %v1425_v43, %v738_v61  ;;  %v763_v11 = vadd.f32 %v1425_v43, %v740_v63  ;;  %vm778_vm9 = vcmp.ge.f32.partialorder %v762_v10, 0.0  ;;  %v794_v20 = vmul.f32 0.2, %v762_v10 }
 0x11f   : > { %1123 = vst [vmem:[%s1368_s27 + $0x8] sm:$0xff] %v1091_v5   ;;  %v807_v12 = vsel %vm775_vm6, %v759_v60, %v791_v6  ;;  %vm776_vm7 = vcmp.ge.f32.partialorder %v760_v7, 0.0  ;;  %v792_v13 = vmul.f32 0.2, %v760_v7  ;;  %v765_v23 = vadd.f32 %v1425_v43, %v742_v14 }
 0x120   : > { %v1096_v16 = vpack.c.bf16 %v807_v12, %v806_v8  ;;  %vm777_vm8 = vcmp.ge.f32.partialorder %v761_v9, 0.0  ;;  %v793_v17 = vmul.f32 0.2, %v761_v9  ;;  %vm779_vm10 = vcmp.ge.f32.partialorder %v763_v11, 0.0 }
 0x121   : > { %v808_v19 = vsel %vm776_vm7, %v760_v7, %v792_v13  ;;  %v795_v21 = vmul.f32 0.2, %v763_v11  ;;  %vm780_vm11 = vcmp.ge.f32.partialorder %v764_v15, 0.0  ;;  %v796_v24 = vmul.f32 0.2, %v764_v15 }
 0x122   : > { %1124 = vst [vmem:[%s1368_s27 + $0x10] sm:$0xff] %v1096_v16   ;;  %v809_v22 = vsel %vm777_vm8, %v761_v9, %v793_v17  ;;  %v810_v28 = vsel %vm778_vm9, %v762_v10, %v794_v20  ;;  %v766_v30 = vadd.f32 %v1425_v43, %v743_v18  ;;  %vm781_vm12 = vcmp.ge.f32.partialorder %v765_v23, 0.0 }
 0x123   : > { %v1101_v27 = vpack.c.bf16 %v809_v22, %v808_v19  ;;  %v811_v29 = vsel %vm779_vm10, %v763_v11, %v795_v21  ;;  %v797_v33 = vmul.f32 0.2, %v765_v23  ;;  %v812_v34 = vsel %vm780_vm11, %v764_v15, %v796_v24 }
 0x124   : > { %v1106_v32 = vpack.c.bf16 %v811_v29, %v810_v28  ;;  %v767_v35 = vadd.f32 %v1425_v43, %v744_v25  ;;  %vm782_vm13 = vcmp.ge.f32.partialorder %v766_v30, 0.0  ;;  %v798_v36 = vmul.f32 0.2, %v766_v30 }
 0x125   : > { %1125 = vst [vmem:[%s1368_s27 + $0x18] sm:$0xff] %v1101_v27   ;;  %v768_v37 = vadd.f32 %v1425_v43, %v745_v26  ;;  %v813_v38 = vsel %vm781_vm12, %v765_v23, %v797_v33  ;;  %v769_v39 = vadd.f32 %v1425_v43, %v746_v31 }
 0x126   : > { %1126 = vst [vmem:[%s1368_s27 + $0x20] sm:$0xff] %v1106_v32   ;;  %v1111_v40 = vpack.c.bf16 %v813_v38, %v812_v34  ;;  %vm783_vm14 = vcmp.ge.f32.partialorder %v767_v35, 0.0  ;;  %v799_v41 = vmul.f32 0.2, %v767_v35  ;;  %v814_v42 = vsel %vm782_vm13, %v766_v30, %v798_v36 }
 0x127   : > { %vm784_vm15 = vcmp.ge.f32.partialorder %v768_v37, 0.0  ;;  %vm785_vm0 = vcmp.ge.f32.partialorder %v769_v39, 0.0  ;;  %v800_v44 = vmul.f32 0.2, %v768_v37  ;;  %v801_v45 = vmul.f32 0.2, %v769_v39 }
 0x128   : > { %1127 = vst [vmem:[%s1368_s27 + $0x28] sm:$0xff] %v1111_v40   ;;  %v815_v46 = vsel %vm783_vm14, %v767_v35, %v799_v41 }
 0x129   : > { %v1116_v47 = vpack.c.bf16 %v815_v46, %v814_v42  ;;  %v816_v48 = vsel %vm784_vm15, %v768_v37, %v800_v44  ;;  %v817_v49 = vsel %vm785_vm0, %v769_v39, %v801_v45 }
 0x12a   : > { %v1121_v50 = vpack.c.bf16 %v817_v49, %v816_v48 }
 0x12b   : > { %1128 = vst [vmem:[%s1368_s27 + $0x30] sm:$0xff] %v1116_v47  }
 0x12c   : > { %1129 = vst [vmem:[%s1368_s27 + $0x38] sm:$0xff] %v1121_v50  }
 0x12d PF: > { %s13_s16 = sadd.s32 1, %s1307_s16   ;;  %s1470_s12 = smov %s1299_s14 }
 0x12e   : > { %p10_p10 = scmp.ge.s32.totalorder %s13_s16, 18   ;;  %s1471_s13 = smov %s1303_s15 }
 0x12f   : > { %s1472_s14 = smov %s1475_s17  ;;  %s1473_s15 = smov %s1479_s18 }
 0x130   :  { %12 = sbr.rel (!%p10_p10) target bundleno = 3 (0x3), region = 74 }

// kernel: discriminator_forward.7
= control target key start
LH: loop header
LB: loop body
LE: loop exit
PB: predicated region body
PF: predicated region fallthrough
CT: control target
= control target key end

     0   :  { %s1200_s12 = smov 0   ;;  %s1202_s13 = smov 0   ;;  %s1347_s0 = inlined_call_operand.vmem [shape: bf16[8,2,80,128], index: 0, kind: input, shape index: {}]   ;;  %s1348_s1 = inlined_call_operand.vmem [shape: bf16[16,128,256], index: 1, kind: input, shape index: {}]   ;;  %s1349_s2 = inlined_call_operand.vmem [shape: f32[1,256], index: 2, kind: input, shape index: {}]   ;;  %s1350_s3 = inlined_call_operand.vmem [shape: bf16[2,64,256], index: 3, kind: output, shape index: {}]  }
   0x1   :  { %s1204_s14 = smov 0   ;;  %s1206_s15 = smov 0  }
   0x2   :  { %s1208_s16 = smov 0  }
   0x3 LB: > { %s22_s17 = sadd.s32 1, %s1168_s14  ;;  %s25_s18 = sadd.s32 1, %s1172_s15  ;;  %s1176_s16 = sphi %s1208_s16, %s13_s16   ;;  %s1172_s15 = sphi %s1206_s15, %s1354_s15   ;;  %s1168_s14 = sphi %s1204_s14, %s1353_s14   ;;  %s1164_s13 = sphi %s1202_s13, %s1352_s13   ;;  %s1160_s12 = sphi %s1200_s12, %s1351_s12  }
   0x4   : > { %p23_p0 = scmp.ge.s32.totalorder %s22_s17, 8  ;;  %p953_p1 = scmp.ge.s32.totalorder %s1176_s16, 1 }
   0x5   : > { %p167_p2 = scmp.lt.s32.totalorder %s1176_s16, 17 }
   0x6   : > { %s1356_s17 = smov (%p23_p0, %s22_s17), 0  ;;  %s1358_s18 = smov (!%p23_p0, %s25_s18), %s1172_s15 }
   0x7   : > { %p168_p3 = pnand %p953_p1, %p167_p2  ;;  %p27_p4 = scmp.ge.s32.totalorder %s1358_s18, 2 }
   0x8   : > { %p201_p5 = scmp.lt.s32.totalorder (!%p168_p3), %s1160_s12, 7  ;;  %p203_p6 = scmp.lt.s32.totalorder (!%p168_p3), %s1164_s13, 1 }
   0x9   : > { %s1360_s18 = smov (%p27_p4, %s1358_s18), 0  ;;  %171 = sbr.rel (%p168_p3) target bundleno = 325 (0x145), region = 32 }
   0xa   : > { %s955_s19 = sshll.u32 (!%p168_p3), %s1160_s12, 1  ;;  %p960_p8 = scmp.ne.s32.totalorder (!%p168_p3), %s1160_s12, 0 }
   0xb   : > { %p211_p7 = scmp.lt.s32.totalorder (!%p168_p3), %s955_s19, 15 }
   0xe   : > { %s202_s20 = scalar_select %p201_p5, %s1160_s12, 7 }
   0xf   : > { %s1362_s13 = smov (!%p203_p6, %s1164_s13), 1  ;;  %s1364_s19 = smov (!%p211_p7, %s955_s19), 15 }
  0x10   : > { %s1039_s21 = smul.u32 20, %s202_s20  ;;  %s1029_s23 = sshll.u32 %s1362_s13, 6 }
  0x11   : > { %s1038_s22 = smul.u32 10, %s1362_s13  ;;  %s1238_s27 = scalar_lea.vmem %s1350_s3, %s1029_s23 }
  0x12   : > { %s1028_s29 = sshll.u32 %s1364_s19, 7  ;;  %226 = sbr.rel (%p960_p8) target bundleno = 32 (0x20), region = 36 }
  0x13   : > { %s207_s24 = sadd.s32 %s1039_s21, %s1038_s22  ;;  %s1248_s8 = scalar_lea.vmem %s1348_s1, %s1028_s29 }
  0x14   : > { %s954_s28 = sshll.u32 %s207_s24, 2 }
  0x15   : > { %s1243_s5 = scalar_lea.vmem %s1347_s0, %s954_s28 }
  0x17   : > { %v1178_v0 = vmov 0.0  }
  0x18   : > { %227 = vst [vmem:[#allocation2 + $0x30] sm:$0xff] %v1178_v0  ;;  %228 = vst [vmem:[#allocation2] sm:$0xff] %v1178_v0 }
  0x19   : > { %229 = vst [vmem:[#allocation2 + $0x58] sm:$0xff] %v1178_v0  ;;  %230 = vst [vmem:[#allocation2 + $0x18] sm:$0xff] %v1178_v0 }
  0x1a   : > { %231 = vst [vmem:[#allocation2 + $0x50] sm:$0xff] %v1178_v0  ;;  %232 = vst [vmem:[#allocation2 + $0x68] sm:$0xff] %v1178_v0 }
  0x1b   : > { %233 = vst [vmem:[#allocation2 + $0x8] sm:$0xff] %v1178_v0  ;;  %234 = vst [vmem:[#allocation2 + $0x48] sm:$0xff] %v1178_v0 }
  0x1c   : > { %235 = vst [vmem:[#allocation2 + $0x40] sm:$0xff] %v1178_v0  ;;  %236 = vst [vmem:[#allocation2 + $0x20] sm:$0xff] %v1178_v0 }
  0x1d   : > { %237 = vst [vmem:[#allocation2 + $0x10] sm:$0xff] %v1178_v0  ;;  %238 = vst [vmem:[#allocation2 + $0x38] sm:$0xff] %v1178_v0 }
  0x1e   : > { %239 = vst [vmem:[#allocation2 + $0x60] sm:$0xff] %v1178_v0  ;;  %240 = vst [vmem:[#allocation2 + $0x70] sm:$0xff] %v1178_v0 }
  0x1f   : > { %241 = vst [vmem:[#allocation2 + $0x78] sm:$0xff] %v1178_v0  ;;  %242 = vst [vmem:[#allocation2 + $0x28] sm:$0xff] %v1178_v0 }
  0x20 PF: > { %v1082_v1 = vld [vmem:[%s1248_s8 + $0x74] ss:$8 sps:$4 sm:$0xff]   ;;  %v1179_v3 = vmov 0   ;;  %v1086_v4 = vld [vmem:[%s1248_s8 + $0x70] ss:$8 sps:$4 sm:$0xff]   ;;  %v1130_v34 = vld [vmem:[%s1243_s5] sm:$0xff]  }
  0x21   : > { %v1084_v2 = vld [vmem:[%s1248_s8 + $0xf4] ss:$8 sps:$4 sm:$0xff]   ;;  %419 = vmatprep.mubr.bf16.mxu0 %v1179_v3  ;;  %637 = vmatprep.mubr.bf16.mxu1 %v1179_v3  ;;  %v1087_v5 = vld [vmem:[%s1248_s8 + $0xf0] ss:$8 sps:$4 sm:$0xff]   ;;  %v1088_v6 = vld [vmem:[%s1248_s8 + $0x64] ss:$8 sps:$4 sm:$0xff]  }
  0x22   : > { %387 = vmatprep.subr.bf16.mxu0 %v1082_v1  ;;  %605 = vmatprep.subr.bf16.mxu1 %v1084_v2  ;;  %v1090_v7 = vld [vmem:[%s1248_s8 + $0xe4] ss:$8 sps:$4 sm:$0xff]   ;;  %v1092_v8 = vld [vmem:[%s1248_s8 + $0x60] ss:$8 sps:$4 sm:$0xff]   ;;  %v1094_v10 = vld [vmem:[%s1248_s8 + $0x54] ss:$8 sps:$4 sm:$0xff]  }
  0x23   : > { %388 = vmatpush1.bf16.msra.mxu0 %v1086_v4  ;;  %606 = vmatpush1.bf16.msra.mxu1 %v1087_v5  ;;  %v1093_v9 = vld [vmem:[%s1248_s8 + $0xe0] ss:$8 sps:$4 sm:$0xff]   ;;  %v1096_v11 = vld [vmem:[%s1248_s8 + $0xd4] ss:$8 sps:$4 sm:$0xff]   ;;  %v1098_v12 = vld [vmem:[%s1248_s8 + $0x50] ss:$8 sps:$4 sm:$0xff]  }
  0x24   : > { %389 = vmatprep.subr.bf16.mxu0 %v1088_v6  ;;  %607 = vmatprep.subr.bf16.mxu1 %v1090_v7  ;;  %v1099_v13 = vld [vmem:[%s1248_s8 + $0xd0] ss:$8 sps:$4 sm:$0xff]   ;;  %v1100_v14 = vld [vmem:[%s1248_s8 + $0x44] ss:$8 sps:$4 sm:$0xff]   ;;  %v1104_v16 = vld [vmem:[%s1248_s8 + $0x40] ss:$8 sps:$4 sm:$0xff]  }
  0x25   : > { %v1102_v15 = vld [vmem:[%s1248_s8 + $0xc4] ss:$8 sps:$4 sm:$0xff]   ;;  %v1105_v17 = vld [vmem:[%s1248_s8 + $0xc0] ss:$8 sps:$4 sm:$0xff]   ;;  %v1106_v18 = vld [vmem:[%s1248_s8 + $0x34] ss:$8 sps:$4 sm:$0xff]  }
  0x26   : > { %v1108_v19 = vld [vmem:[%s1248_s8 + $0xb4] ss:$8 sps:$4 sm:$0xff]   ;;  %v1110_v20 = vld [vmem:[%s1248_s8 + $0x30] ss:$8 sps:$4 sm:$0xff]   ;;  %v1112_v22 = vld [vmem:[%s1248_s8 + $0x24] ss:$8 sps:$4 sm:$0xff]  }
  0x27   : > { %390 = vmatpush1.bf16.msra.mxu0 %v1092_v8  ;;  %608 = vmatpush1.bf16.msra.mxu1 %v1093_v9  ;;  %v1111_v21 = vld [vmem:[%s1248_s8 + $0xb0] ss:$8 sps:$4 sm:$0xff]   ;;  %v1114_v23 = vld [vmem:[%s1248_s8 + $0xa4] ss:$8 sps:$4 sm:$0xff]   ;;  %v1116_v24 = vld [vmem:[%s1248_s8 + $0x20] ss:$8 sps:$4 sm:$0xff]  }
  0x28   : > { %391 = vmatprep.subr.bf16.mxu0 %v1094_v10  ;;  %609 = vmatprep.subr.bf16.mxu1 %v1096_v11  ;;  %v1117_v25 = vld [vmem:[%s1248_s8 + $0xa0] ss:$8 sps:$4 sm:$0xff]   ;;  %v1118_v26 = vld [vmem:[%s1248_s8 + $0x14] ss:$8 sps:$4 sm:$0xff]   ;;  %v1122_v28 = vld [vmem:[%s1248_s8 + $0x10] ss:$8 sps:$4 sm:$0xff]  }
  0x29   : > { %v1120_v27 = vld [vmem:[%s1248_s8 + $0x94] ss:$8 sps:$4 sm:$0xff]   ;;  %v1123_v29 = vld [vmem:[%s1248_s8 + $0x90] ss:$8 sps:$4 sm:$0xff]   ;;  %v1124_v30 = vld [vmem:[%s1248_s8 + $0x4] ss:$8 sps:$4 sm:$0xff]  }
  0x2a   : > { %v1126_v31 = vld [vmem:[%s1248_s8 + $0x84] ss:$8 sps:$4 sm:$0xff]   ;;  %v1128_v32 = vld [vmem:[%s1248_s8] ss:$8 sps:$4 sm:$0xff]   ;;  %v1133_v37 = vld [vmem:[%s1243_s5 + $0x10] sm:$0xff]   ;;  %p1017_p9 = scmp.ne.s32.totalorder %s1160_s12, 7 }
  0x2b   : > { %392 = vmatpush1.bf16.msra.mxu0 %v1098_v12  ;;  %610 = vmatpush1.bf16.msra.mxu1 %v1099_v13  ;;  %v1129_v33 = vld [vmem:[%s1248_s8 + $0x80] ss:$8 sps:$4 sm:$0xff]   ;;  %v1134_v38 = vld [vmem:[%s1243_s5 + $0x10] sm:$0xff]   ;;  %v1135_v39 = vld [vmem:[%s1243_s5 + $0x18] sm:$0xff]  }
  0x2c   : > { %393 = vmatprep.subr.bf16.mxu0 %v1100_v14  ;;  %611 = vmatprep.subr.bf16.mxu1 %v1102_v15  ;;  %v1131_v35 = vld [vmem:[%s1243_s5 + $0x8] sm:$0xff]   ;;  %v1136_v40 = vld [vmem:[%s1243_s5 + $0x18] sm:$0xff]   ;;  %v1137_v41 = vld [vmem:[%s1243_s5 + $0x20] sm:$0xff]  }
  0x2d   : > { %v1132_v36 = vld [vmem:[%s1243_s5 + $0x8] sm:$0xff]   ;;  %v243_v42 = vld [vmem:[#allocation2 + $0x30] sm:$0xff]  ;;  %v244_v45 = vld [vmem:[#allocation2] sm:$0xff] }
  0x2e   : > { %v245_v49 = vld [vmem:[#allocation2 + $0x58] sm:$0xff]  ;;  %v247_v59 = vld [vmem:[#allocation2 + $0x50] sm:$0xff]  ;;  %v248_v0 = vld [vmem:[#allocation2 + $0x68] sm:$0xff] }
  0x2f   : > { %394 = vmatpush1.bf16.msra.mxu0 %v1104_v16  ;;  %612 = vmatpush1.bf16.msra.mxu1 %v1105_v17  ;;  %v246_v54 = vld [vmem:[#allocation2 + $0x18] sm:$0xff]  ;;  %v249_v5 = vld [vmem:[#allocation2 + $0x8] sm:$0xff]  ;;  %v251_v15 = vld [vmem:[#allocation2 + $0x40] sm:$0xff] }
  0x30   : > { %395 = vmatprep.subr.bf16.mxu0 %v1106_v18  ;;  %613 = vmatprep.subr.bf16.mxu1 %v1108_v19  ;;  %v250_v10 = vld [vmem:[#allocation2 + $0x48] sm:$0xff] }
  0x33   : > { %396 = vmatpush1.bf16.msra.mxu0 %v1110_v20  ;;  %614 = vmatpush1.bf16.msra.mxu1 %v1111_v21  ;;  %v252_v20 = vld [vmem:[#allocation2 + $0x20] sm:$0xff] }
  0x34   : > { %397 = vmatprep.subr.bf16.mxu0 %v1112_v22  ;;  %615 = vmatprep.subr.bf16.mxu1 %v1114_v23 }
  0x37   : > { %398 = vmatpush1.bf16.msra.mxu0 %v1116_v24  ;;  %616 = vmatpush1.bf16.msra.mxu1 %v1117_v25  ;;  %v253_v25 = vld [vmem:[#allocation2 + $0x10] sm:$0xff] }
  0x38   : > { %399 = vmatprep.subr.bf16.mxu0 %v1118_v26  ;;  %617 = vmatprep.subr.bf16.mxu1 %v1120_v27 }
  0x3b   : > { %400 = vmatpush1.bf16.msra.mxu0 %v1122_v28  ;;  %618 = vmatpush1.bf16.msra.mxu1 %v1123_v29 }
  0x3c   : > { %401 = vmatprep.subr.bf16.mxu0 %v1124_v30  ;;  %619 = vmatprep.subr.bf16.mxu1 %v1126_v31  ;;  %v254_v30 = vld [vmem:[#allocation2 + $0x38] sm:$0xff] }
  0x3f   : > { %402 = vmatpush1.bf16.msra.mxu0 %v1128_v32  ;;  %620 = vmatpush1.bf16.msra.mxu1 %v1129_v33 }
  0x42   : > { %420 = vmatmul.mubr.bf16.vlgmr.msra.gmra.mxu0 %v1130_v34  ;;  %638 = vmatmul.mubr.bf16.vlgmr.msra.gmra.mxu1 %v1131_v35  ;;  %v255_v35 = vld [vmem:[#allocation2 + $0x60] sm:$0xff] }
  0x43   : > { %429 = vmatprep.mubr.bf16.mxu0 %v1179_v3  ;;  %647 = vmatprep.mubr.bf16.mxu1 %v1179_v3 }
  0x4a   : > { %430 = vmatmul.mubr.bf16.gmra.mxu0 %v1132_v36  ;;  %648 = vmatmul.mubr.bf16.gmra.mxu1 %v1133_v37 }
  0x4b   : > { %439 = vmatprep.mubr.bf16.mxu0 %v1179_v3  ;;  %657 = vmatprep.mubr.bf16.mxu1 %v1179_v3 }
  0x52   : > { %440 = vmatmul.mubr.bf16.gmra.mxu0 %v1134_v38  ;;  %658 = vmatmul.mubr.bf16.gmra.mxu1 %v1135_v39 }
  0x53   : > { %449 = vmatprep.mubr.bf16.mxu0 %v1179_v3  ;;  %667 = vmatprep.mubr.bf16.mxu1 %v1179_v3 }
  0x5a   : > { %450 = vmatmul.mubr.bf16.gmra.mxu0 %v1136_v40  ;;  %668 = vmatmul.mubr.bf16.gmra.mxu1 %v1137_v41  ;;  %v256_v40 = vld [vmem:[#allocation2 + $0x70] sm:$0xff] }
 0x102   : > { %v421_v43 = vpop.f32.mrf.mxu0  ;;  %v639_v44 = vpop.f32.mrf.mxu1 }
 0x103   : > { %v460_v46 = vadd.f32 %v421_v43, %v243_v42 }
 0x104   : > { %v423_v47 = vpop.f32.mrf.mxu0  ;;  %v641_v48 = vpop.f32.mrf.mxu1 }
 0x105   : > { %v678_v50 = vadd.f32 %v639_v44, %v460_v46  ;;  %v461_v51 = vadd.f32 %v423_v47, %v244_v45  ;;  %v257_v45 = vld [vmem:[#allocation2 + $0x78] sm:$0xff] }
 0x106   : > { %v425_v52 = vpop.f32.mrf.mxu0  ;;  %v643_v53 = vpop.f32.mrf.mxu1 }
 0x107   : > { %694 = vst [vmem:[#allocation2 + $0x30] sm:$0xff] %v678_v50  ;;  %v679_v55 = vadd.f32 %v641_v48, %v461_v51  ;;  %v462_v56 = vadd.f32 %v425_v52, %v245_v49  ;;  %v258_v50 = vld [vmem:[#allocation2 + $0x28] sm:$0xff] }
 0x108   : > { %v427_v57 = vpop.f32.mrf.mxu0  ;;  %v645_v58 = vpop.f32.mrf.mxu1 }
 0x109   : > { %695 = vst [vmem:[#allocation2] sm:$0xff] %v679_v55  ;;  %v680_v60 = vadd.f32 %v643_v53, %v462_v56  ;;  %v463_v61 = vadd.f32 %v427_v57, %v246_v54 }
 0x10a   : > { %v431_v62 = vpop.f32.mrf.mxu0  ;;  %v649_v63 = vpop.f32.mrf.mxu1 }
 0x10b   : > { %696 = vst [vmem:[#allocation2 + $0x58] sm:$0xff] %v680_v60  ;;  %v681_v1 = vadd.f32 %v645_v58, %v463_v61  ;;  %v464_v2 = vadd.f32 %v431_v62, %v247_v59 }
 0x10c   : > { %v433_v3 = vpop.f32.mrf.mxu0  ;;  %v651_v4 = vpop.f32.mrf.mxu1 }
 0x10d   : > { %697 = vst [vmem:[#allocation2 + $0x18] sm:$0xff] %v681_v1  ;;  %v682_v6 = vadd.f32 %v649_v63, %v464_v2  ;;  %v465_v7 = vadd.f32 %v433_v3, %v248_v0 }
 0x10e   : > { %v435_v8 = vpop.f32.mrf.mxu0  ;;  %v653_v9 = vpop.f32.mrf.mxu1 }
 0x10f   : > { %698 = vst [vmem:[#allocation2 + $0x50] sm:$0xff] %v682_v6  ;;  %v683_v11 = vadd.f32 %v651_v4, %v465_v7  ;;  %v466_v12 = vadd.f32 %v435_v8, %v249_v5 }
 0x110   : > { %v437_v13 = vpop.f32.mrf.mxu0  ;;  %v655_v14 = vpop.f32.mrf.mxu1 }
 0x111   : > { %699 = vst [vmem:[#allocation2 + $0x68] sm:$0xff] %v683_v11  ;;  %v684_v16 = vadd.f32 %v653_v9, %v466_v12  ;;  %v467_v17 = vadd.f32 %v437_v13, %v250_v10 }
 0x112   : > { %v441_v18 = vpop.f32.mrf.mxu0  ;;  %v659_v19 = vpop.f32.mrf.mxu1 }
 0x113   : > { %700 = vst [vmem:[#allocation2 + $0x8] sm:$0xff] %v684_v16  ;;  %v685_v21 = vadd.f32 %v655_v14, %v467_v17  ;;  %v468_v22 = vadd.f32 %v441_v18, %v251_v15 }
 0x114   : > { %v443_v23 = vpop.f32.mrf.mxu0  ;;  %v661_v24 = vpop.f32.mrf.mxu1 }
 0x115   : > { %701 = vst [vmem:[#allocation2 + $0x48] sm:$0xff] %v685_v21  ;;  %v686_v26 = vadd.f32 %v659_v19, %v468_v22  ;;  %v469_v27 = vadd.f32 %v443_v23, %v252_v20 }
 0x116   : > { %v445_v28 = vpop.f32.mrf.mxu0  ;;  %v663_v29 = vpop.f32.mrf.mxu1 }
 0x117   : > { %702 = vst [vmem:[#allocation2 + $0x40] sm:$0xff] %v686_v26  ;;  %v687_v31 = vadd.f32 %v661_v24, %v469_v27  ;;  %v470_v32 = vadd.f32 %v445_v28, %v253_v25 }
 0x118   : > { %v447_v33 = vpop.f32.mrf.mxu0  ;;  %v665_v34 = vpop.f32.mrf.mxu1 }
 0x119   : > { %703 = vst [vmem:[#allocation2 + $0x20] sm:$0xff] %v687_v31  ;;  %v688_v36 = vadd.f32 %v663_v29, %v470_v32  ;;  %v471_v37 = vadd.f32 %v447_v33, %v254_v30 }
 0x11a   : > { %v451_v38 = vpop.f32.mrf.mxu0  ;;  %v669_v39 = vpop.f32.mrf.mxu1 }
 0x11b   : > { %704 = vst [vmem:[#allocation2 + $0x10] sm:$0xff] %v688_v36  ;;  %v689_v41 = vadd.f32 %v665_v34, %v471_v37  ;;  %v472_v42 = vadd.f32 %v451_v38, %v255_v35 }
 0x11c   : > { %v453_v43 = vpop.f32.mrf.mxu0  ;;  %v671_v44 = vpop.f32.mrf.mxu1 }
 0x11d   : > { %705 = vst [vmem:[#allocation2 + $0x38] sm:$0xff] %v689_v41  ;;  %v690_v46 = vadd.f32 %v669_v39, %v472_v42  ;;  %v473_v47 = vadd.f32 %v453_v43, %v256_v40 }
 0x11e   : > { %v455_v48 = vpop.f32.mrf.mxu0  ;;  %v673_v49 = vpop.f32.mrf.mxu1 }
 0x11f   : > { %706 = vst [vmem:[#allocation2 + $0x60] sm:$0xff] %v690_v46  ;;  %v691_v51 = vadd.f32 %v671_v44, %v473_v47  ;;  %v474_v52 = vadd.f32 %v455_v48, %v257_v45 }
 0x120   : > { %v457_v53 = vpop.f32.mrf.mxu0  ;;  %v675_v56 = vpop.f32.mrf.mxu1 }
 0x121   : > { %707 = vst [vmem:[#allocation2 + $0x70] sm:$0xff] %v691_v51  ;;  %v692_v54 = vadd.f32 %v673_v49, %v474_v52  ;;  %v475_v55 = vadd.f32 %v457_v53, %v258_v50  ;;  %713 = sbr.rel (%p1017_p9) target bundleno = 325 (0x145), region = 40 }
 0x123   : > { %708 = vst [vmem:[#allocation2 + $0x78] sm:$0xff] %v692_v54  ;;  %v693_v57 = vadd.f32 %v675_v56, %v475_v55 }
 0x125   : > { %709 = vst [vmem:[#allocation2 + $0x28] sm:$0xff] %v693_v57 }
 0x126   : > { %v732_v58 = vlaneseq  ;;  %v730_v60 = vld [vmem:[%s1349_s2] sm:$0x3]  ;;  %v714_v61 = vld [vmem:[#allocation2 + $0x30] sm:$0xff]  ;;  %v716_v1 = vld [vmem:[#allocation2 + $0x58] sm:$0xff] }
 0x127   : > { %v715_v62 = vld [vmem:[#allocation2] sm:$0xff]  ;;  %v717_v2 = vld [vmem:[#allocation2 + $0x18] sm:$0xff]  ;;  %v718_v3 = vld [vmem:[#allocation2 + $0x50] sm:$0xff] }
 0x128   : > { %v733_v59 = vshrl.u32 %v732_v58, 7  ;;  %v719_v6 = vld [vmem:[#allocation2 + $0x68] sm:$0xff]  ;;  %v722_v23 = vld [vmem:[#allocation2 + $0x40] sm:$0xff]  ;;  %v724_v29 = vld [vmem:[#allocation2 + $0x10] sm:$0xff] }
 0x129   : > { %v720_v7 = vld [vmem:[#allocation2 + $0x8] sm:$0xff]  ;;  %v723_v28 = vld [vmem:[#allocation2 + $0x20] sm:$0xff]  ;;  %v725_v30 = vld [vmem:[#allocation2 + $0x38] sm:$0xff] }
 0x12a   : > { %v734_v63 = vsub.s32 0, %v733_v59  ;;  %v738_v0 = vsub.s32 1, %v733_v59  ;;  %v721_v8 = vld [vmem:[#allocation2 + $0x48] sm:$0xff]  ;;  %v726_v44 = vld [vmem:[#allocation2 + $0x60] sm:$0xff]  ;;  %v727_v45 = vld [vmem:[#allocation2 + $0x70] sm:$0xff] }
 0x12b   : > { %v728_v49 = vld [vmem:[#allocation2 + $0x78] sm:$0xff] }
 0x12c   : > { %v1303_v4 = vrot.slane %v730_v60, %v734_v63  ;;  %v1305_v5 = vrot.slane %v730_v60, %v738_v0  ;;  %v729_v56 = vld [vmem:[#allocation2 + $0x28] sm:$0xff] }
 0x12e   : > { %v742_v9 = vadd.f32 %v1303_v4, %v714_v61  ;;  %v743_v10 = vadd.f32 %v1305_v5, %v715_v62  ;;  %v744_v11 = vadd.f32 %v1303_v4, %v716_v1  ;;  %v745_v12 = vadd.f32 %v1305_v5, %v717_v2 }
 0x12f   : > { %v746_v13 = vadd.f32 %v1303_v4, %v718_v3  ;;  %v747_v14 = vadd.f32 %v1305_v5, %v719_v6  ;;  %v748_v15 = vadd.f32 %v1303_v4, %v720_v7  ;;  %v749_v16 = vadd.f32 %v1305_v5, %v721_v8 }
 0x130   : > { %vm758_vm0 = vcmp.ge.f32.partialorder %v742_v9, 0.0  ;;  %vm759_vm1 = vcmp.ge.f32.partialorder %v743_v10, 0.0  ;;  %v774_v17 = vmul.f32 0.2, %v742_v9  ;;  %v775_v18 = vmul.f32 0.2, %v743_v10 }
 0x131   : > { %vm760_vm2 = vcmp.ge.f32.partialorder %v744_v11, 0.0  ;;  %vm761_vm3 = vcmp.ge.f32.partialorder %v745_v12, 0.0  ;;  %v776_v19 = vmul.f32 0.2, %v744_v11  ;;  %v777_v20 = vmul.f32 0.2, %v745_v12 }
 0x132   : > { %v790_v21 = vsel %vm758_vm0, %v742_v9, %v774_v17  ;;  %v791_v22 = vsel %vm759_vm1, %v743_v10, %v775_v18  ;;  %vm762_vm4 = vcmp.ge.f32.partialorder %v746_v13, 0.0  ;;  %vm763_vm5 = vcmp.ge.f32.partialorder %v747_v14, 0.0 }
 0x133   : > { %v1030_v24 = vpack.c.bf16 %v791_v22, %v790_v21  ;;  %v792_v25 = vsel %vm760_vm2, %v744_v11, %v776_v19  ;;  %v793_v26 = vsel %vm761_vm3, %v745_v12, %v777_v20  ;;  %v778_v27 = vmul.f32 0.2, %v746_v13 }
 0x134   : > { %v1031_v31 = vpack.c.bf16 %v793_v26, %v792_v25  ;;  %v779_v32 = vmul.f32 0.2, %v747_v14  ;;  %vm764_vm6 = vcmp.ge.f32.partialorder %v748_v15, 0.0  ;;  %vm765_vm7 = vcmp.ge.f32.partialorder %v749_v16, 0.0 }
 0x135   : > { %854 = vst [vmem:[%s1238_s27] sm:$0xff] %v1030_v24  ;;  %v794_v33 = vsel %vm762_vm4, %v746_v13, %v778_v27  ;;  %v780_v34 = vmul.f32 0.2, %v748_v15  ;;  %v781_v35 = vmul.f32 0.2, %v749_v16  ;;  %v750_v36 = vadd.f32 %v1303_v4, %v722_v23 }
 0x136   : > { %855 = vst [vmem:[%s1238_s27 + $0x8] sm:$0xff] %v1031_v31  ;;  %v795_v37 = vsel %vm763_vm5, %v747_v14, %v779_v32  ;;  %v751_v38 = vadd.f32 %v1305_v5, %v723_v28  ;;  %v752_v39 = vadd.f32 %v1303_v4, %v724_v29  ;;  %v753_v40 = vadd.f32 %v1305_v5, %v725_v30 }
 0x137   : > { %v1032_v41 = vpack.c.bf16 %v795_v37, %v794_v33  ;;  %v796_v42 = vsel %vm764_vm6, %v748_v15, %v780_v34  ;;  %v797_v43 = vsel %vm765_vm7, %v749_v16, %v781_v35  ;;  %vm766_vm8 = vcmp.ge.f32.partialorder %v750_v36, 0.0 }
 0x138   : > { %v1033_v46 = vpack.c.bf16 %v797_v43, %v796_v42  ;;  %vm767_vm9 = vcmp.ge.f32.partialorder %v751_v38, 0.0  ;;  %v782_v47 = vmul.f32 0.2, %v750_v36  ;;  %v783_v48 = vmul.f32 0.2, %v751_v38 }
 0x139   : > { %856 = vst [vmem:[%s1238_s27 + $0x10] sm:$0xff] %v1032_v41  ;;  %vm768_vm10 = vcmp.ge.f32.partialorder %v752_v39, 0.0  ;;  %vm769_vm11 = vcmp.ge.f32.partialorder %v753_v40, 0.0  ;;  %v784_v50 = vmul.f32 0.2, %v752_v39  ;;  %v754_v54 = vadd.f32 %v1303_v4, %v726_v44 }
 0x13a   : > { %v785_v51 = vmul.f32 0.2, %v753_v40  ;;  %857 = vst [vmem:[%s1238_s27 + $0x18] sm:$0xff] %v1033_v46  ;;  %v798_v52 = vsel %vm766_vm8, %v750_v36, %v782_v47  ;;  %v799_v53 = vsel %vm767_vm9, %v751_v38, %v783_v48  ;;  %v755_v55 = vadd.f32 %v1305_v5, %v727_v45 }
 0x13b   : > { %v1034_v57 = vpack.c.bf16 %v799_v53, %v798_v52  ;;  %v800_v58 = vsel %vm768_vm10, %v752_v39, %v784_v50  ;;  %v756_v60 = vadd.f32 %v1303_v4, %v728_v49  ;;  %vm770_vm12 = vcmp.ge.f32.partialorder %v754_v54, 0.0 }
 0x13c   : > { %v801_v59 = vsel %vm769_vm11, %v753_v40, %v785_v51  ;;  %vm771_vm13 = vcmp.ge.f32.partialorder %v755_v55, 0.0  ;;  %v786_v62 = vmul.f32 0.2, %v754_v54  ;;  %v787_v63 = vmul.f32 0.2, %v755_v55 }
 0x13d   : > { %v1035_v61 = vpack.c.bf16 %v801_v59, %v800_v58  ;;  %858 = vst [vmem:[%s1238_s27 + $0x20] sm:$0xff] %v1034_v57  ;;  %v757_v0 = vadd.f32 %v1305_v5, %v729_v56  ;;  %vm772_vm14 = vcmp.ge.f32.partialorder %v756_v60, 0.0  ;;  %v788_v1 = vmul.f32 0.2, %v756_v60 }
 0x13e   : > { %v802_v2 = vsel %vm770_vm12, %v754_v54, %v786_v62  ;;  %v803_v3 = vsel %vm771_vm13, %v755_v55, %v787_v63 }
 0x13f   : > { %859 = vst [vmem:[%s1238_s27 + $0x28] sm:$0xff] %v1035_v61  ;;  %vm773_vm15 = vcmp.ge.f32.partialorder %v757_v0, 0.0  ;;  %v789_v6 = vmul.f32 0.2, %v757_v0  ;;  %v804_v7 = vsel %vm772_vm14, %v756_v60, %v788_v1  ;;  %v1036_v8 = vpack.c.bf16 %v803_v3, %v802_v2 }
 0x141   : > { %v805_v4 = vsel %vm773_vm15, %v757_v0, %v789_v6  ;;  %860 = vst [vmem:[%s1238_s27 + $0x30] sm:$0xff] %v1036_v8 }
 0x142   : > { %v1037_v9 = vpack.c.bf16 %v805_v4, %v804_v7 }
 0x144   : > { %861 = vst [vmem:[%s1238_s27 + $0x38] sm:$0xff] %v1037_v9 }
 0x145 PF: > { %s13_s16 = sadd.s32 1, %s1176_s16   ;;  %s1351_s12 = smov %s1168_s14 }
 0x146   : > { %p10_p10 = scmp.ge.s32.totalorder %s13_s16, 18   ;;  %s1352_s13 = smov %s1172_s15 }
 0x147   : > { %s1353_s14 = smov %s1356_s17  ;;  %s1354_s15 = smov %s1360_s18 }
 0x148   :  { %12 = sbr.rel (!%p10_p10) target bundleno = 3 (0x3), region = 74 }

// kernel: discriminator_forward.8
= control target key start
LH: loop header
LB: loop body
LE: loop exit
PB: predicated region body
PF: predicated region fallthrough
CT: control target
= control target key end

     0   :  { %s3916_s12 = smov 0   ;;  %s3918_s13 = smov 0   ;;  %s4541_s0 = inlined_call_operand.vmem [shape: bf16[4,2,96,256], index: 0, kind: input, shape index: {}]   ;;  %s4542_s1 = inlined_call_operand.vmem [shape: bf16[16,256,512], index: 1, kind: input, shape index: {}]   ;;  %s4543_s2 = inlined_call_operand.vmem [shape: f32[1,512], index: 2, kind: input, shape index: {}]   ;;  %s4544_s3 = inlined_call_operand.vmem [shape: bf16[2,48,512], index: 3, kind: output, shape index: {}]  }
   0x1   :  { %s3920_s14 = smov 0   ;;  %s3922_s15 = smov 0  }
   0x2   :  { %s3924_s16 = smov 0  }
   0x3 LB: > { %s22_s17 = sadd.s32 1, %s3885_s14  ;;  %s25_s18 = sadd.s32 1, %s3889_s15  ;;  %s3893_s16 = sphi %s3924_s16, %s13_s16   ;;  %s3889_s15 = sphi %s3922_s15, %s4598_s15   ;;  %s3885_s14 = sphi %s3920_s14, %s4597_s14   ;;  %s3881_s13 = sphi %s3918_s13, %s4596_s13   ;;  %s3877_s12 = sphi %s3916_s12, %s4595_s12  }
   0x4   : > { %p23_p0 = scmp.ge.s32.totalorder %s22_s17, 4  ;;  %p2902_p1 = scmp.ge.s32.totalorder %s3893_s16, 1 }
   0x5   : > { %p167_p2 = scmp.lt.s32.totalorder %s3893_s16, 9 }
   0x6   : > { %s4600_s17 = smov (%p23_p0, %s22_s17), 0  ;;  %s4602_s18 = smov (!%p23_p0, %s25_s18), %s3889_s15 }
   0x7   : > { %p168_p3 = pnand %p2902_p1, %p167_p2  ;;  %p27_p4 = scmp.ge.s32.totalorder %s4602_s18, 2 }
   0x9   : > { %s4604_s18 = smov (%p27_p4, %s4602_s18), 0  ;;  %171 = sbr.rel (%p168_p3) target bundleno = 556 (0x22c), region = 32 }
   0xe   : > { %p201_p5 = scmp.lt.s32.totalorder %s3877_s12, 3  ;;  %p203_p6 = scmp.lt.s32.totalorder %s3881_s13, 1 }
   0xf   : > { %s2904_s19 = sshll.u32 %s3877_s12, 2  ;;  %p2908_p8 = scmp.ne.s32.totalorder %s3877_s12, 0 }
  0x10   : > { %s202_s20 = scalar_select %p201_p5, %s3877_s12, 3 }
  0x11   : > { %s4606_s13 = smov (!%p203_p6, %s3881_s13), 1  ;;  %p211_p7 = scmp.lt.s32.totalorder %s2904_s19, 15 }
  0x12   : > { %s3410_s21 = smul.u32 48, %s202_s20 }
  0x13   : > { %s3409_s22 = smul.u32 24, %s4606_s13  ;;  %s4608_s19 = smov (!%p211_p7, %s2904_s19), 15 }
  0x14   : > { %s3411_s24 = smul.u32 96, %s4606_s13  ;;  %s3396_s26 = sshll.u32 %s4608_s19, 9 }
  0x15   : > { %s207_s23 = sadd.s32 %s3410_s21, %s3409_s22  ;;  %s3959_s5 = scalar_lea.vmem %s4542_s1, %s3396_s26 }
  0x16   : > { %s2903_s25 = sshll.u32 %s207_s23, 2  ;;  %s3964_s8 = scalar_lea.vmem %s4544_s3, %s3411_s24 }
  0x17   : > { %s3954_s29 = scalar_lea.vmem %s4541_s0, %s2903_s25  ;;  %225 = sbr.rel (%p2908_p8) target bundleno = 41 (0x29), region = 36 }
  0x1c   : > { %v3895_v0 = vmov 0.0  }
  0x1d   : > { %226 = vst [vmem:[#allocation2 + $0xb0] sm:$0xff] %v3895_v0  ;;  %227 = vst [vmem:[#allocation2] sm:$0xff] %v3895_v0 }
  0x1e   : > { %228 = vst [vmem:[#allocation2 + $0x10] sm:$0xff] %v3895_v0  ;;  %229 = vst [vmem:[#allocation2 + $0x48] sm:$0xff] %v3895_v0 }
  0x1f   : > { %230 = vst [vmem:[#allocation2 + $0x60] sm:$0xff] %v3895_v0  ;;  %231 = vst [vmem:[#allocation2 + $0x28] sm:$0xff] %v3895_v0 }
  0x20   : > { %232 = vst [vmem:[#allocation2 + $0x40] sm:$0xff] %v3895_v0  ;;  %233 = vst [vmem:[#allocation2 + $0x78] sm:$0xff] %v3895_v0 }
  0x21   : > { %234 = vst [vmem:[#allocation2 + $0x88] sm:$0xff] %v3895_v0  ;;  %235 = vst [vmem:[#allocation2 + $0x90] sm:$0xff] %v3895_v0 }
  0x22   : > { %236 = vst [vmem:[#allocation2 + $0x18] sm:$0xff] %v3895_v0  ;;  %237 = vst [vmem:[#allocation2 + $0x98] sm:$0xff] %v3895_v0 }
  0x23   : > { %238 = vst [vmem:[#allocation2 + $0x38] sm:$0xff] %v3895_v0  ;;  %239 = vst [vmem:[#allocation2 + $0x50] sm:$0xff] %v3895_v0 }
  0x24   : > { %240 = vst [vmem:[#allocation2 + $0x70] sm:$0xff] %v3895_v0  ;;  %241 = vst [vmem:[#allocation2 + $0xa0] sm:$0xff] %v3895_v0 }
  0x25   : > { %242 = vst [vmem:[#allocation2 + $0xa8] sm:$0xff] %v3895_v0  ;;  %243 = vst [vmem:[#allocation2 + $0x68] sm:$0xff] %v3895_v0 }
  0x26   : > { %244 = vst [vmem:[#allocation2 + $0x30] sm:$0xff] %v3895_v0  ;;  %245 = vst [vmem:[#allocation2 + $0x58] sm:$0xff] %v3895_v0 }
  0x27   : > { %246 = vst [vmem:[#allocation2 + $0x80] sm:$0xff] %v3895_v0  ;;  %247 = vst [vmem:[#allocation2 + $0xb8] sm:$0xff] %v3895_v0 }
  0x28   : > { %248 = vst [vmem:[#allocation2 + $0x20] sm:$0xff] %v3895_v0  ;;  %249 = vst [vmem:[#allocation2 + $0x8] sm:$0xff] %v3895_v0 }
  0x29 PF: > { %v3453_v1 = vld [vmem:[%s3959_s5 + $0xe4] ss:$16 sps:$4 sm:$0xff]   ;;  %v3455_v2 = vld [vmem:[%s3959_s5 + $0xec] ss:$16 sps:$4 sm:$0xff]   ;;  %v3457_v3 = vld [vmem:[%s3959_s5 + $0xe0] ss:$16 sps:$4 sm:$0xff]  }
  0x2a   : > { %694 = vmatprep.subr.bf16.mxu0 %v3453_v1  ;;  %v3458_v4 = vld [vmem:[%s3959_s5 + $0xe8] ss:$16 sps:$4 sm:$0xff]   ;;  %757 = vmatprep.subr.bf16.mxu1 %v3455_v2  ;;  %v3459_v5 = vld [vmem:[%s3959_s5 + $0xc4] ss:$16 sps:$4 sm:$0xff]   ;;  %v3461_v6 = vld [vmem:[%s3959_s5 + $0xcc] ss:$16 sps:$4 sm:$0xff]  }
  0x2b   : > { %695 = vmatpush1.bf16.msra.mxu0 %v3457_v3  ;;  %758 = vmatpush1.bf16.msra.mxu1 %v3458_v4  ;;  %v3463_v7 = vld [vmem:[%s3959_s5 + $0xc0] ss:$16 sps:$4 sm:$0xff]   ;;  %v3464_v8 = vld [vmem:[%s3959_s5 + $0xc8] ss:$16 sps:$4 sm:$0xff]   ;;  %v3465_v9 = vld [vmem:[%s3959_s5 + $0xa4] ss:$16 sps:$4 sm:$0xff]  }
  0x2c   : > { %696 = vmatprep.subr.bf16.mxu0 %v3459_v5  ;;  %759 = vmatprep.subr.bf16.mxu1 %v3461_v6  ;;  %v3467_v10 = vld [vmem:[%s3959_s5 + $0xac] ss:$16 sps:$4 sm:$0xff]   ;;  %v3469_v11 = vld [vmem:[%s3959_s5 + $0xa0] ss:$16 sps:$4 sm:$0xff]   ;;  %v3470_v12 = vld [vmem:[%s3959_s5 + $0xa8] ss:$16 sps:$4 sm:$0xff]  }
  0x2d   : > { %v3471_v13 = vld [vmem:[%s3959_s5 + $0x84] ss:$16 sps:$4 sm:$0xff]   ;;  %v3473_v14 = vld [vmem:[%s3959_s5 + $0x8c] ss:$16 sps:$4 sm:$0xff]   ;;  %v3475_v15 = vld [vmem:[%s3959_s5 + $0x80] ss:$16 sps:$4 sm:$0xff]  }
  0x2e   : > { %v3476_v16 = vld [vmem:[%s3959_s5 + $0x88] ss:$16 sps:$4 sm:$0xff]   ;;  %v3477_v17 = vld [vmem:[%s3959_s5 + $0x64] ss:$16 sps:$4 sm:$0xff]   ;;  %v3479_v18 = vld [vmem:[%s3959_s5 + $0x6c] ss:$16 sps:$4 sm:$0xff]  }
  0x2f   : > { %697 = vmatpush1.bf16.msra.mxu0 %v3463_v7  ;;  %760 = vmatpush1.bf16.msra.mxu1 %v3464_v8  ;;  %v3481_v19 = vld [vmem:[%s3959_s5 + $0x60] ss:$16 sps:$4 sm:$0xff]   ;;  %v3482_v20 = vld [vmem:[%s3959_s5 + $0x68] ss:$16 sps:$4 sm:$0xff]   ;;  %v3483_v21 = vld [vmem:[%s3959_s5 + $0x44] ss:$16 sps:$4 sm:$0xff]  }
  0x30   : > { %698 = vmatprep.subr.bf16.mxu0 %v3465_v9  ;;  %761 = vmatprep.subr.bf16.mxu1 %v3467_v10  ;;  %v3485_v22 = vld [vmem:[%s3959_s5 + $0x4c] ss:$16 sps:$4 sm:$0xff]   ;;  %v3487_v23 = vld [vmem:[%s3959_s5 + $0x40] ss:$16 sps:$4 sm:$0xff]   ;;  %v3488_v24 = vld [vmem:[%s3959_s5 + $0x48] ss:$16 sps:$4 sm:$0xff]  }
  0x31   : > { %v3489_v25 = vld [vmem:[%s3959_s5 + $0x24] ss:$16 sps:$4 sm:$0xff]   ;;  %v3491_v26 = vld [vmem:[%s3959_s5 + $0x2c] ss:$16 sps:$4 sm:$0xff]   ;;  %v3493_v27 = vld [vmem:[%s3959_s5 + $0x20] ss:$16 sps:$4 sm:$0xff]  }
  0x32   : > { %v3494_v28 = vld [vmem:[%s3959_s5 + $0x28] ss:$16 sps:$4 sm:$0xff]   ;;  %v3495_v29 = vld [vmem:[%s3959_s5 + $0x4] ss:$16 sps:$4 sm:$0xff]   ;;  %v3497_v30 = vld [vmem:[%s3959_s5 + $0xc] ss:$16 sps:$4 sm:$0xff]  }
  0x33   : > { %699 = vmatpush1.bf16.msra.mxu0 %v3469_v11  ;;  %762 = vmatpush1.bf16.msra.mxu1 %v3470_v12  ;;  %v3499_v31 = vld [vmem:[%s3959_s5] ss:$16 sps:$4 sm:$0xff]   ;;  %v3500_v32 = vld [vmem:[%s3959_s5 + $0x8] ss:$16 sps:$4 sm:$0xff]   ;;  %v3501_v33 = vld [vmem:[%s3959_s5 + $0x1e4] ss:$16 sps:$4 sm:$0xff]  }
  0x34   : > { %700 = vmatprep.subr.bf16.mxu0 %v3471_v13  ;;  %763 = vmatprep.subr.bf16.mxu1 %v3473_v14  ;;  %v3503_v34 = vld [vmem:[%s3959_s5 + $0x1ec] ss:$16 sps:$4 sm:$0xff]   ;;  %v3505_v35 = vld [vmem:[%s3959_s5 + $0x1e0] ss:$16 sps:$4 sm:$0xff]   ;;  %v3506_v36 = vld [vmem:[%s3959_s5 + $0x1e8] ss:$16 sps:$4 sm:$0xff]  }
  0x35   : > { %v3507_v37 = vld [vmem:[%s3959_s5 + $0x1c4] ss:$16 sps:$4 sm:$0xff]   ;;  %v3509_v38 = vld [vmem:[%s3959_s5 + $0x1cc] ss:$16 sps:$4 sm:$0xff]   ;;  %v3511_v39 = vld [vmem:[%s3959_s5 + $0x1c0] ss:$16 sps:$4 sm:$0xff]  }
  0x36   : > { %v3512_v40 = vld [vmem:[%s3959_s5 + $0x1c8] ss:$16 sps:$4 sm:$0xff]   ;;  %v3513_v41 = vld [vmem:[%s3959_s5 + $0x1a4] ss:$16 sps:$4 sm:$0xff]   ;;  %v3515_v42 = vld [vmem:[%s3959_s5 + $0x1ac] ss:$16 sps:$4 sm:$0xff]  }
  0x37   : > { %701 = vmatpush1.bf16.msra.mxu0 %v3475_v15  ;;  %764 = vmatpush1.bf16.msra.mxu1 %v3476_v16  ;;  %v3517_v43 = vld [vmem:[%s3959_s5 + $0x1a0] ss:$16 sps:$4 sm:$0xff]   ;;  %v3518_v44 = vld [vmem:[%s3959_s5 + $0x1a8] ss:$16 sps:$4 sm:$0xff]   ;;  %v3519_v45 = vld [vmem:[%s3959_s5 + $0x184] ss:$16 sps:$4 sm:$0xff]  }
  0x38   : > { %702 = vmatprep.subr.bf16.mxu0 %v3477_v17  ;;  %765 = vmatprep.subr.bf16.mxu1 %v3479_v18  ;;  %v3521_v46 = vld [vmem:[%s3959_s5 + $0x18c] ss:$16 sps:$4 sm:$0xff]   ;;  %v3523_v47 = vld [vmem:[%s3959_s5 + $0x180] ss:$16 sps:$4 sm:$0xff]   ;;  %v3524_v48 = vld [vmem:[%s3959_s5 + $0x188] ss:$16 sps:$4 sm:$0xff]  }
  0x39   : > { %v3551_v49 = vld [vmem:[%s3954_s29 + $0x4] ss:$8 sps:$4 sm:$0xff]   ;;  %v3529_v52 = vld [vmem:[%s3959_s5 + $0x160] ss:$16 sps:$4 sm:$0xff]   ;;  %v3530_v53 = vld [vmem:[%s3959_s5 + $0x168] ss:$16 sps:$4 sm:$0xff]  }
  0x3a   : > { %v3525_v50 = vld [vmem:[%s3959_s5 + $0x164] ss:$16 sps:$4 sm:$0xff]   ;;  %v3527_v51 = vld [vmem:[%s3959_s5 + $0x16c] ss:$16 sps:$4 sm:$0xff]   ;;  %726 = vmatprep.mubr.bf16.mxu0 %v3551_v49  ;;  %789 = vmatprep.mubr.bf16.mxu1 %v3551_v49  ;;  %v3535_v56 = vld [vmem:[%s3959_s5 + $0x140] ss:$16 sps:$4 sm:$0xff]  }
  0x3b   : > { %703 = vmatpush1.bf16.msra.mxu0 %v3481_v19  ;;  %766 = vmatpush1.bf16.msra.mxu1 %v3482_v20  ;;  %v3531_v54 = vld [vmem:[%s3959_s5 + $0x144] ss:$16 sps:$4 sm:$0xff]   ;;  %v3533_v55 = vld [vmem:[%s3959_s5 + $0x14c] ss:$16 sps:$4 sm:$0xff]   ;;  %v3536_v57 = vld [vmem:[%s3959_s5 + $0x148] ss:$16 sps:$4 sm:$0xff]  }
  0x3c   : > { %704 = vmatprep.subr.bf16.mxu0 %v3483_v21  ;;  %767 = vmatprep.subr.bf16.mxu1 %v3485_v22  ;;  %v3537_v58 = vld [vmem:[%s3959_s5 + $0x124] ss:$16 sps:$4 sm:$0xff]   ;;  %v3539_v59 = vld [vmem:[%s3959_s5 + $0x12c] ss:$16 sps:$4 sm:$0xff]   ;;  %v3541_v60 = vld [vmem:[%s3959_s5 + $0x120] ss:$16 sps:$4 sm:$0xff]  }
  0x3d   : > { %v3542_v61 = vld [vmem:[%s3959_s5 + $0x128] ss:$16 sps:$4 sm:$0xff]   ;;  %v3543_v62 = vld [vmem:[%s3959_s5 + $0x104] ss:$16 sps:$4 sm:$0xff]   ;;  %v3545_v63 = vld [vmem:[%s3959_s5 + $0x10c] ss:$16 sps:$4 sm:$0xff]  }
  0x3e   : > { %v3547_v0 = vld [vmem:[%s3959_s5 + $0x100] ss:$16 sps:$4 sm:$0xff]   ;;  %v3548_v1 = vld [vmem:[%s3959_s5 + $0x108] ss:$16 sps:$4 sm:$0xff]   ;;  %v3554_v2 = vld [vmem:[%s3959_s5 + $0x2e4] ss:$16 sps:$4 sm:$0xff]  }
  0x3f   : > { %705 = vmatpush1.bf16.msra.mxu0 %v3487_v23  ;;  %768 = vmatpush1.bf16.msra.mxu1 %v3488_v24  ;;  %v3557_v3 = vld [vmem:[%s3959_s5 + $0x2ec] ss:$16 sps:$4 sm:$0xff]   ;;  %v3549_v4 = vld [vmem:[%s3954_s29] ss:$8 sps:$4 sm:$0xff]   ;;  %v3560_v7 = vld [vmem:[%s3959_s5 + $0x2c4] ss:$16 sps:$4 sm:$0xff]  }
  0x40   : > { %706 = vmatprep.subr.bf16.mxu0 %v3489_v25  ;;  %769 = vmatprep.subr.bf16.mxu1 %v3491_v26  ;;  %v3552_v5 = vld [vmem:[%s3959_s5 + $0x2e0] ss:$16 sps:$4 sm:$0xff]   ;;  %v3555_v6 = vld [vmem:[%s3959_s5 + $0x2e8] ss:$16 sps:$4 sm:$0xff]   ;;  %v3563_v8 = vld [vmem:[%s3959_s5 + $0x2cc] ss:$16 sps:$4 sm:$0xff]  }
  0x41   : > { %v3558_v9 = vld [vmem:[%s3959_s5 + $0x2c0] ss:$16 sps:$4 sm:$0xff]   ;;  %v3561_v10 = vld [vmem:[%s3959_s5 + $0x2c8] ss:$16 sps:$4 sm:$0xff]   ;;  %v3566_v11 = vld [vmem:[%s3959_s5 + $0x2a4] ss:$16 sps:$4 sm:$0xff]  }
  0x42   : > { %v3569_v12 = vld [vmem:[%s3959_s5 + $0x2ac] ss:$16 sps:$4 sm:$0xff]   ;;  %v3564_v13 = vld [vmem:[%s3959_s5 + $0x2a0] ss:$16 sps:$4 sm:$0xff]   ;;  %v3567_v14 = vld [vmem:[%s3959_s5 + $0x2a8] ss:$16 sps:$4 sm:$0xff]  }
  0x43   : > { %707 = vmatpush1.bf16.msra.mxu0 %v3493_v27  ;;  %770 = vmatpush1.bf16.msra.mxu1 %v3494_v28  ;;  %v3572_v15 = vld [vmem:[%s3959_s5 + $0x284] ss:$16 sps:$4 sm:$0xff]   ;;  %v3575_v16 = vld [vmem:[%s3959_s5 + $0x28c] ss:$16 sps:$4 sm:$0xff]   ;;  %v3570_v17 = vld [vmem:[%s3959_s5 + $0x280] ss:$16 sps:$4 sm:$0xff]  }
  0x44   : > { %708 = vmatprep.subr.bf16.mxu0 %v3495_v29  ;;  %771 = vmatprep.subr.bf16.mxu1 %v3497_v30  ;;  %v3618_v18 = vld [vmem:[%s3954_s29 + $0x14] ss:$8 sps:$4 sm:$0xff]   ;;  %v3573_v19 = vld [vmem:[%s3959_s5 + $0x288] ss:$16 sps:$4 sm:$0xff]   ;;  %v3576_v23 = vld [vmem:[%s3959_s5 + $0x260] ss:$16 sps:$4 sm:$0xff]  }
  0x45   : > { %v4051_v20 = vld [vmem:[%s3954_s29 + $0x10] ss:$8 sps:$4 sm:$0xff]   ;;  %v3578_v21 = vld [vmem:[%s3959_s5 + $0x264] ss:$16 sps:$4 sm:$0xff]   ;;  %v3581_v22 = vld [vmem:[%s3959_s5 + $0x26c] ss:$16 sps:$4 sm:$0xff]  }
  0x46   : > { %v3579_v24 = vld [vmem:[%s3959_s5 + $0x268] ss:$16 sps:$4 sm:$0xff]   ;;  %v3584_v25 = vld [vmem:[%s3959_s5 + $0x244] ss:$16 sps:$4 sm:$0xff]   ;;  %v3587_v27 = vld [vmem:[%s3959_s5 + $0x24c] ss:$16 sps:$4 sm:$0xff]  }
  0x47   : > { %709 = vmatpush1.bf16.msra.mxu0 %v3499_v31  ;;  %772 = vmatpush1.bf16.msra.mxu1 %v3500_v32  ;;  %v4061_v26 = vld [vmem:[%s3954_s29 + $0x24] ss:$8 sps:$4 sm:$0xff]   ;;  %v3582_v28 = vld [vmem:[%s3959_s5 + $0x240] ss:$16 sps:$4 sm:$0xff]   ;;  %v3585_v29 = vld [vmem:[%s3959_s5 + $0x248] ss:$16 sps:$4 sm:$0xff]  }
  0x48   : > { %710 = vmatprep.subr.bf16.mxu0 %v3501_v33  ;;  %773 = vmatprep.subr.bf16.mxu1 %v3503_v34  ;;  %v4069_v30 = vld [vmem:[%s3954_s29 + $0x20] ss:$8 sps:$4 sm:$0xff]   ;;  %v3590_v31 = vld [vmem:[%s3959_s5 + $0x224] ss:$16 sps:$4 sm:$0xff]   ;;  %v3593_v32 = vld [vmem:[%s3959_s5 + $0x22c] ss:$16 sps:$4 sm:$0xff]  }
  0x49   : > { %v3588_v33 = vld [vmem:[%s3959_s5 + $0x220] ss:$16 sps:$4 sm:$0xff]   ;;  %v3591_v34 = vld [vmem:[%s3959_s5 + $0x228] ss:$16 sps:$4 sm:$0xff]   ;;  %p3381_p9 = scmp.ne.s32.totalorder %s3877_s12, 3 }
  0x4a   : > { %v3612_v49 = vld [vmem:[%s3959_s5 + $0x3a0] ss:$16 sps:$4 sm:$0xff]  }
  0x4b   : > { %711 = vmatpush2.bf16.msra.mxu0 %v3505_v35  ;;  %774 = vmatpush2.bf16.msra.mxu1 %v3506_v36  ;;  %v3596_v35 = vld [vmem:[%s3959_s5 + $0x204] ss:$16 sps:$4 sm:$0xff]   ;;  %v3599_v36 = vld [vmem:[%s3959_s5 + $0x20c] ss:$16 sps:$4 sm:$0xff]  }
  0x4c   : > { %712 = vmatprep.subr.bf16.mxu0 %v3507_v37  ;;  %775 = vmatprep.subr.bf16.mxu1 %v3509_v38  ;;  %v3594_v37 = vld [vmem:[%s3959_s5 + $0x200] ss:$16 sps:$4 sm:$0xff]   ;;  %v3597_v38 = vld [vmem:[%s3959_s5 + $0x208] ss:$16 sps:$4 sm:$0xff]  }
  0x4f   : > { %713 = vmatpush2.bf16.msra.mxu0 %v3511_v39  ;;  %776 = vmatpush2.bf16.msra.mxu1 %v3512_v40  ;;  %v3602_v39 = vld [vmem:[%s3959_s5 + $0x3e4] ss:$16 sps:$4 sm:$0xff]   ;;  %v3605_v40 = vld [vmem:[%s3959_s5 + $0x3ec] ss:$16 sps:$4 sm:$0xff]  }
  0x50   : > { %714 = vmatprep.subr.bf16.mxu0 %v3513_v41  ;;  %777 = vmatprep.subr.bf16.mxu1 %v3515_v42  ;;  %v3600_v41 = vld [vmem:[%s3959_s5 + $0x3e0] ss:$16 sps:$4 sm:$0xff]   ;;  %v3603_v42 = vld [vmem:[%s3959_s5 + $0x3e8] ss:$16 sps:$4 sm:$0xff]  }
  0x53   : > { %715 = vmatpush2.bf16.msra.mxu0 %v3517_v43  ;;  %778 = vmatpush2.bf16.msra.mxu1 %v3518_v44  ;;  %v3608_v43 = vld [vmem:[%s3959_s5 + $0x3c4] ss:$16 sps:$4 sm:$0xff]   ;;  %v3611_v44 = vld [vmem:[%s3959_s5 + $0x3cc] ss:$16 sps:$4 sm:$0xff]  }
  0x54   : > { %716 = vmatprep.subr.bf16.mxu0 %v3519_v45  ;;  %779 = vmatprep.subr.bf16.mxu1 %v3521_v46  ;;  %v3606_v45 = vld [vmem:[%s3959_s5 + $0x3c0] ss:$16 sps:$4 sm:$0xff]   ;;  %v3609_v46 = vld [vmem:[%s3959_s5 + $0x3c8] ss:$16 sps:$4 sm:$0xff]  }
  0x57   : > { %717 = vmatpush2.bf16.msra.mxu0 %v3523_v47  ;;  %780 = vmatpush2.bf16.msra.mxu1 %v3524_v48  ;;  %v3614_v47 = vld [vmem:[%s3959_s5 + $0x3a4] ss:$16 sps:$4 sm:$0xff]   ;;  %v3617_v48 = vld [vmem:[%s3959_s5 + $0x3ac] ss:$16 sps:$4 sm:$0xff]  }
  0x58   : > { %718 = vmatprep.subr.bf16.mxu0 %v3525_v50  ;;  %781 = vmatprep.subr.bf16.mxu1 %v3527_v51  ;;  %v3615_v50 = vld [vmem:[%s3959_s5 + $0x3a8] ss:$16 sps:$4 sm:$0xff]   ;;  %v3623_v51 = vld [vmem:[%s3959_s5 + $0x384] ss:$16 sps:$4 sm:$0xff]  }
  0x5b   : > { %719 = vmatpush2.bf16.msra.mxu0 %v3529_v52  ;;  %782 = vmatpush2.bf16.msra.mxu1 %v3530_v53  ;;  %v3626_v52 = vld [vmem:[%s3959_s5 + $0x38c] ss:$16 sps:$4 sm:$0xff]   ;;  %v3621_v53 = vld [vmem:[%s3959_s5 + $0x380] ss:$16 sps:$4 sm:$0xff]  }
  0x5c   : > { %720 = vmatprep.subr.bf16.mxu0 %v3531_v54  ;;  %783 = vmatprep.subr.bf16.mxu1 %v3533_v55  ;;  %v3624_v54 = vld [vmem:[%s3959_s5 + $0x388] ss:$16 sps:$4 sm:$0xff]   ;;  %v3629_v55 = vld [vmem:[%s3959_s5 + $0x364] ss:$16 sps:$4 sm:$0xff]  }
  0x5f   : > { %721 = vmatpush2.bf16.msra.mxu0 %v3535_v56  ;;  %784 = vmatpush2.bf16.msra.mxu1 %v3536_v57  ;;  %v3632_v56 = vld [vmem:[%s3959_s5 + $0x36c] ss:$16 sps:$4 sm:$0xff]   ;;  %v3627_v57 = vld [vmem:[%s3959_s5 + $0x360] ss:$16 sps:$4 sm:$0xff]  }
  0x60   : > { %722 = vmatprep.subr.bf16.mxu0 %v3537_v58  ;;  %785 = vmatprep.subr.bf16.mxu1 %v3539_v59  ;;  %v3630_v58 = vld [vmem:[%s3959_s5 + $0x368] ss:$16 sps:$4 sm:$0xff]   ;;  %v3638_v59 = vld [vmem:[%s3959_s5 + $0x344] ss:$16 sps:$4 sm:$0xff]  }
  0x63   : > { %723 = vmatpush2.bf16.msra.mxu0 %v3541_v60  ;;  %786 = vmatpush2.bf16.msra.mxu1 %v3542_v61  ;;  %v3641_v60 = vld [vmem:[%s3959_s5 + $0x34c] ss:$16 sps:$4 sm:$0xff]   ;;  %v3636_v61 = vld [vmem:[%s3959_s5 + $0x340] ss:$16 sps:$4 sm:$0xff]  }
  0x64   : > { %724 = vmatprep.subr.bf16.mxu0 %v3543_v62  ;;  %787 = vmatprep.subr.bf16.mxu1 %v3545_v63  ;;  %v3639_v62 = vld [vmem:[%s3959_s5 + $0x348] ss:$16 sps:$4 sm:$0xff]   ;;  %v3644_v63 = vld [vmem:[%s3959_s5 + $0x324] ss:$16 sps:$4 sm:$0xff]  }
  0x67   : > { %725 = vmatpush2.bf16.msra.mxu0 %v3547_v0  ;;  %788 = vmatpush2.bf16.msra.mxu1 %v3548_v1  ;;  %v3647_v0 = vld [vmem:[%s3959_s5 + $0x32c] ss:$16 sps:$4 sm:$0xff]   ;;  %v3642_v1 = vld [vmem:[%s3959_s5 + $0x320] ss:$16 sps:$4 sm:$0xff]  }
  0x68   : > { %1265 = vmatprep.subr.bf16.mxu0 %v3554_v2  ;;  %1328 = vmatprep.subr.bf16.mxu1 %v3557_v3  ;;  %v3645_v2 = vld [vmem:[%s3959_s5 + $0x328] ss:$16 sps:$4 sm:$0xff]   ;;  %v3650_v3 = vld [vmem:[%s3959_s5 + $0x304] ss:$16 sps:$4 sm:$0xff]  }
  0x6a   : > { %727 = vmatmul.mubr.bf16.vlgmr.msra.gmra.mxu0 %v3549_v4  ;;  %790 = vmatmul.mubr.bf16.vlgmr.msra.gmra.mxu1 %v3549_v4  ;;  %v3653_v4 = vld [vmem:[%s3959_s5 + $0x30c] ss:$16 sps:$4 sm:$0xff]  }
  0x6b   : > { %1266 = vmatpush1.bf16.msra.mxu0 %v3552_v5  ;;  %1329 = vmatpush1.bf16.msra.mxu1 %v3555_v6  ;;  %v3648_v5 = vld [vmem:[%s3959_s5 + $0x300] ss:$16 sps:$4 sm:$0xff]   ;;  %v3651_v6 = vld [vmem:[%s3959_s5 + $0x308] ss:$16 sps:$4 sm:$0xff]  }
  0x6c   : > { %1267 = vmatprep.subr.bf16.mxu0 %v3560_v7  ;;  %1330 = vmatprep.subr.bf16.mxu1 %v3563_v8  ;;  %v3656_v7 = vld [vmem:[%s3959_s5 + $0x4e4] ss:$16 sps:$4 sm:$0xff]   ;;  %v3659_v8 = vld [vmem:[%s3959_s5 + $0x4ec] ss:$16 sps:$4 sm:$0xff]  }
  0x6d   : > { %736 = vmatprep.mubr.bf16.mxu0 %v3618_v18  ;;  %799 = vmatprep.mubr.bf16.mxu1 %v3618_v18 }
  0x6f   : > { %1268 = vmatpush1.bf16.msra.mxu0 %v3558_v9  ;;  %1331 = vmatpush1.bf16.msra.mxu1 %v3561_v10  ;;  %v3654_v9 = vld [vmem:[%s3959_s5 + $0x4e0] ss:$16 sps:$4 sm:$0xff]   ;;  %v3657_v10 = vld [vmem:[%s3959_s5 + $0x4e8] ss:$16 sps:$4 sm:$0xff]  }
  0x70   : > { %1269 = vmatprep.subr.bf16.mxu0 %v3566_v11  ;;  %1332 = vmatprep.subr.bf16.mxu1 %v3569_v12  ;;  %v3662_v11 = vld [vmem:[%s3959_s5 + $0x4c4] ss:$16 sps:$4 sm:$0xff]   ;;  %v3665_v12 = vld [vmem:[%s3959_s5 + $0x4cc] ss:$16 sps:$4 sm:$0xff]  }
  0x72   : > { %737 = vmatmul.mubr.bf16.gmra.mxu0 %v4051_v20  ;;  %800 = vmatmul.mubr.bf16.gmra.mxu1 %v4051_v20 }
  0x73   : > { %1270 = vmatpush1.bf16.msra.mxu0 %v3564_v13  ;;  %1333 = vmatpush1.bf16.msra.mxu1 %v3567_v14  ;;  %v3660_v13 = vld [vmem:[%s3959_s5 + $0x4c0] ss:$16 sps:$4 sm:$0xff]   ;;  %v3663_v14 = vld [vmem:[%s3959_s5 + $0x4c8] ss:$16 sps:$4 sm:$0xff]  }
  0x74   : > { %1271 = vmatprep.subr.bf16.mxu0 %v3572_v15  ;;  %1334 = vmatprep.subr.bf16.mxu1 %v3575_v16  ;;  %v3668_v15 = vld [vmem:[%s3959_s5 + $0x4a4] ss:$16 sps:$4 sm:$0xff]   ;;  %v3671_v16 = vld [vmem:[%s3959_s5 + $0x4ac] ss:$16 sps:$4 sm:$0xff]  }
  0x75   : > { %746 = vmatprep.mubr.bf16.mxu0 %v4061_v26  ;;  %809 = vmatprep.mubr.bf16.mxu1 %v4061_v26 }
  0x77   : > { %1272 = vmatpush1.bf16.msra.mxu0 %v3570_v17  ;;  %1335 = vmatpush1.bf16.msra.mxu1 %v3573_v19  ;;  %v3666_v17 = vld [vmem:[%s3959_s5 + $0x4a0] ss:$16 sps:$4 sm:$0xff]   ;;  %v3674_v19 = vld [vmem:[%s3959_s5 + $0x484] ss:$16 sps:$4 sm:$0xff]  }
  0x78   : > { %1273 = vmatprep.subr.bf16.mxu0 %v3578_v21  ;;  %1336 = vmatprep.subr.bf16.mxu1 %v3581_v22  ;;  %v4132_v21 = vld [vmem:[%s3954_s29 + $0x34] ss:$8 sps:$4 sm:$0xff]   ;;  %v3672_v22 = vld [vmem:[%s3959_s5 + $0x480] ss:$16 sps:$4 sm:$0xff]  }
  0x7a   : > { %747 = vmatmul.mubr.bf16.gmra.mxu0 %v4069_v30  ;;  %810 = vmatmul.mubr.bf16.gmra.mxu1 %v4069_v30 }
  0x7b   : > { %1274 = vmatpush1.bf16.msra.mxu0 %v3576_v23  ;;  %1337 = vmatpush1.bf16.msra.mxu1 %v3579_v24  ;;  %v3675_v23 = vld [vmem:[%s3959_s5 + $0x488] ss:$16 sps:$4 sm:$0xff]   ;;  %v3683_v24 = vld [vmem:[%s3959_s5 + $0x464] ss:$16 sps:$4 sm:$0xff]  }
  0x7c   : > { %1275 = vmatprep.subr.bf16.mxu0 %v3584_v25  ;;  %1338 = vmatprep.subr.bf16.mxu1 %v3587_v27  ;;  %v3686_v25 = vld [vmem:[%s3959_s5 + $0x46c] ss:$16 sps:$4 sm:$0xff]   ;;  %v4143_v27 = vld [vmem:[%s3954_s29 + $0x30] ss:$8 sps:$4 sm:$0xff]  }
  0x7d   : > { %1297 = vmatprep.mubr.bf16.mxu0 %v3618_v18  ;;  %1360 = vmatprep.mubr.bf16.mxu1 %v3618_v18  ;;  %v3669_v18 = vld [vmem:[%s3959_s5 + $0x4a8] ss:$16 sps:$4 sm:$0xff]  }
  0x7f   : > { %1276 = vmatpush1.bf16.msra.mxu0 %v3582_v28  ;;  %1339 = vmatpush1.bf16.msra.mxu1 %v3585_v29  ;;  %v3681_v28 = vld [vmem:[%s3959_s5 + $0x460] ss:$16 sps:$4 sm:$0xff]   ;;  %v3684_v29 = vld [vmem:[%s3959_s5 + $0x468] ss:$16 sps:$4 sm:$0xff]  }
  0x80   : > { %1277 = vmatprep.subr.bf16.mxu0 %v3590_v31  ;;  %1340 = vmatprep.subr.bf16.mxu1 %v3593_v32  ;;  %v3689_v31 = vld [vmem:[%s3959_s5 + $0x444] ss:$16 sps:$4 sm:$0xff]   ;;  %v3692_v32 = vld [vmem:[%s3959_s5 + $0x44c] ss:$16 sps:$4 sm:$0xff]  }
  0x83   : > { %1278 = vmatpush1.bf16.msra.mxu0 %v3588_v33  ;;  %1341 = vmatpush1.bf16.msra.mxu1 %v3591_v34  ;;  %v3687_v33 = vld [vmem:[%s3959_s5 + $0x440] ss:$16 sps:$4 sm:$0xff]   ;;  %v3690_v34 = vld [vmem:[%s3959_s5 + $0x448] ss:$16 sps:$4 sm:$0xff]  }
  0x84   : > { %1279 = vmatprep.subr.bf16.mxu0 %v3596_v35  ;;  %1342 = vmatprep.subr.bf16.mxu1 %v3599_v36  ;;  %v3695_v35 = vld [vmem:[%s3959_s5 + $0x424] ss:$16 sps:$4 sm:$0xff]   ;;  %v3698_v36 = vld [vmem:[%s3959_s5 + $0x42c] ss:$16 sps:$4 sm:$0xff]  }
  0x87   : > { %1280 = vmatpush1.bf16.msra.mxu0 %v3594_v37  ;;  %1343 = vmatpush1.bf16.msra.mxu1 %v3597_v38  ;;  %v3693_v37 = vld [vmem:[%s3959_s5 + $0x420] ss:$16 sps:$4 sm:$0xff]   ;;  %v3696_v38 = vld [vmem:[%s3959_s5 + $0x428] ss:$16 sps:$4 sm:$0xff]  }
  0x88   : > { %1281 = vmatprep.subr.bf16.mxu0 %v3602_v39  ;;  %1344 = vmatprep.subr.bf16.mxu1 %v3605_v40  ;;  %v3701_v39 = vld [vmem:[%s3959_s5 + $0x404] ss:$16 sps:$4 sm:$0xff]   ;;  %v3704_v40 = vld [vmem:[%s3959_s5 + $0x40c] ss:$16 sps:$4 sm:$0xff]  }
  0x8b   : > { %1282 = vmatpush2.bf16.msra.mxu0 %v3600_v41  ;;  %1345 = vmatpush2.bf16.msra.mxu1 %v3603_v42  ;;  %v3699_v41 = vld [vmem:[%s3959_s5 + $0x400] ss:$16 sps:$4 sm:$0xff]   ;;  %v3702_v42 = vld [vmem:[%s3959_s5 + $0x408] ss:$16 sps:$4 sm:$0xff]  }
  0x8c   : > { %1283 = vmatprep.subr.bf16.mxu0 %v3608_v43  ;;  %1346 = vmatprep.subr.bf16.mxu1 %v3611_v44  ;;  %v3710_v43 = vld [vmem:[%s3959_s5 + $0x5ec] ss:$16 sps:$4 sm:$0xff]   ;;  %v3705_v44 = vld [vmem:[%s3959_s5 + $0x5e0] ss:$16 sps:$4 sm:$0xff]  }
  0x8f   : > { %1284 = vmatpush2.bf16.msra.mxu0 %v3606_v45  ;;  %1347 = vmatpush2.bf16.msra.mxu1 %v3609_v46  ;;  %v3708_v45 = vld [vmem:[%s3959_s5 + $0x5e8] ss:$16 sps:$4 sm:$0xff]   ;;  %v3713_v46 = vld [vmem:[%s3959_s5 + $0x5c4] ss:$16 sps:$4 sm:$0xff]  }
  0x90   : > { %1285 = vmatprep.subr.bf16.mxu0 %v3614_v47  ;;  %1348 = vmatprep.subr.bf16.mxu1 %v3617_v48  ;;  %v3716_v47 = vld [vmem:[%s3959_s5 + $0x5cc] ss:$16 sps:$4 sm:$0xff]   ;;  %v3711_v48 = vld [vmem:[%s3959_s5 + $0x5c0] ss:$16 sps:$4 sm:$0xff]  }
  0x93   : > { %1286 = vmatpush2.bf16.msra.mxu0 %v3612_v49  ;;  %1349 = vmatpush2.bf16.msra.mxu1 %v3615_v50  ;;  %v3714_v49 = vld [vmem:[%s3959_s5 + $0x5c8] ss:$16 sps:$4 sm:$0xff]   ;;  %v3719_v50 = vld [vmem:[%s3959_s5 + $0x5a4] ss:$16 sps:$4 sm:$0xff]  }
  0x94   : > { %1287 = vmatprep.subr.bf16.mxu0 %v3623_v51  ;;  %1350 = vmatprep.subr.bf16.mxu1 %v3626_v52  ;;  %v3722_v51 = vld [vmem:[%s3959_s5 + $0x5ac] ss:$16 sps:$4 sm:$0xff]   ;;  %v3717_v52 = vld [vmem:[%s3959_s5 + $0x5a0] ss:$16 sps:$4 sm:$0xff]  }
  0x97   : > { %1288 = vmatpush2.bf16.msra.mxu0 %v3621_v53  ;;  %1351 = vmatpush2.bf16.msra.mxu1 %v3624_v54  ;;  %v3720_v53 = vld [vmem:[%s3959_s5 + $0x5a8] ss:$16 sps:$4 sm:$0xff]   ;;  %v3725_v54 = vld [vmem:[%s3959_s5 + $0x584] ss:$16 sps:$4 sm:$0xff]  }
  0x98   : > { %1289 = vmatprep.subr.bf16.mxu0 %v3629_v55  ;;  %1352 = vmatprep.subr.bf16.mxu1 %v3632_v56  ;;  %v3728_v55 = vld [vmem:[%s3959_s5 + $0x58c] ss:$16 sps:$4 sm:$0xff]   ;;  %v3723_v56 = vld [vmem:[%s3959_s5 + $0x580] ss:$16 sps:$4 sm:$0xff]  }
  0x9b   : > { %1290 = vmatpush2.bf16.msra.mxu0 %v3627_v57  ;;  %1353 = vmatpush2.bf16.msra.mxu1 %v3630_v58  ;;  %v3726_v57 = vld [vmem:[%s3959_s5 + $0x588] ss:$16 sps:$4 sm:$0xff]   ;;  %v3731_v58 = vld [vmem:[%s3959_s5 + $0x564] ss:$16 sps:$4 sm:$0xff]  }
  0x9c   : > { %1291 = vmatprep.subr.bf16.mxu0 %v3638_v59  ;;  %1354 = vmatprep.subr.bf16.mxu1 %v3641_v60  ;;  %v3734_v59 = vld [vmem:[%s3959_s5 + $0x56c] ss:$16 sps:$4 sm:$0xff]   ;;  %v3729_v60 = vld [vmem:[%s3959_s5 + $0x560] ss:$16 sps:$4 sm:$0xff]  }
  0x9f   : > { %1292 = vmatpush2.bf16.msra.mxu0 %v3636_v61  ;;  %1355 = vmatpush2.bf16.msra.mxu1 %v3639_v62  ;;  %v3732_v61 = vld [vmem:[%s3959_s5 + $0x568] ss:$16 sps:$4 sm:$0xff]   ;;  %v3737_v62 = vld [vmem:[%s3959_s5 + $0x544] ss:$16 sps:$4 sm:$0xff]  }
  0xa0   : > { %1293 = vmatprep.subr.bf16.mxu0 %v3644_v63  ;;  %1356 = vmatprep.subr.bf16.mxu1 %v3647_v0  ;;  %v3740_v63 = vld [vmem:[%s3959_s5 + $0x54c] ss:$16 sps:$4 sm:$0xff]   ;;  %v3735_v0 = vld [vmem:[%s3959_s5 + $0x540] ss:$16 sps:$4 sm:$0xff]  }
  0xa3   : > { %1294 = vmatpush2.bf16.msra.mxu0 %v3642_v1  ;;  %1357 = vmatpush2.bf16.msra.mxu1 %v3645_v2  ;;  %v3738_v1 = vld [vmem:[%s3959_s5 + $0x548] ss:$16 sps:$4 sm:$0xff]   ;;  %v3743_v2 = vld [vmem:[%s3959_s5 + $0x524] ss:$16 sps:$4 sm:$0xff]  }
  0xa4   : > { %1295 = vmatprep.subr.bf16.mxu0 %v3650_v3  ;;  %1358 = vmatprep.subr.bf16.mxu1 %v3653_v4  ;;  %v3746_v3 = vld [vmem:[%s3959_s5 + $0x52c] ss:$16 sps:$4 sm:$0xff]   ;;  %v3741_v4 = vld [vmem:[%s3959_s5 + $0x520] ss:$16 sps:$4 sm:$0xff]  }
  0xa7   : > { %1296 = vmatpush2.bf16.msra.mxu0 %v3648_v5  ;;  %1359 = vmatpush2.bf16.msra.mxu1 %v3651_v6  ;;  %v3744_v5 = vld [vmem:[%s3959_s5 + $0x528] ss:$16 sps:$4 sm:$0xff]   ;;  %v3749_v6 = vld [vmem:[%s3959_s5 + $0x504] ss:$16 sps:$4 sm:$0xff]  }
  0xa8   : > { %1836 = vmatprep.subr.bf16.mxu0 %v3656_v7  ;;  %1899 = vmatprep.subr.bf16.mxu1 %v3659_v8  ;;  %v3752_v7 = vld [vmem:[%s3959_s5 + $0x50c] ss:$16 sps:$4 sm:$0xff]   ;;  %v3747_v8 = vld [vmem:[%s3959_s5 + $0x500] ss:$16 sps:$4 sm:$0xff]  }
  0xaa   : > { %1298 = vmatmul.mubr.bf16.vlgmr.msra.gmra.mxu0 %v4051_v20  ;;  %1361 = vmatmul.mubr.bf16.vlgmr.msra.gmra.mxu1 %v4051_v20  ;;  %v3677_v20 = vld [vmem:[%s3959_s5 + $0x48c] ss:$16 sps:$4 sm:$0xff]  }
  0xab   : > { %1837 = vmatpush1.bf16.msra.mxu0 %v3654_v9  ;;  %1900 = vmatpush1.bf16.msra.mxu1 %v3657_v10  ;;  %v3750_v9 = vld [vmem:[%s3959_s5 + $0x508] ss:$16 sps:$4 sm:$0xff]   ;;  %v3755_v10 = vld [vmem:[%s3959_s5 + $0x6e4] ss:$16 sps:$4 sm:$0xff]  }
  0xac   : > { %1838 = vmatprep.subr.bf16.mxu0 %v3662_v11  ;;  %1901 = vmatprep.subr.bf16.mxu1 %v3665_v12  ;;  %v3758_v11 = vld [vmem:[%s3959_s5 + $0x6ec] ss:$16 sps:$4 sm:$0xff]   ;;  %v3753_v12 = vld [vmem:[%s3959_s5 + $0x6e0] ss:$16 sps:$4 sm:$0xff]  }
  0xad   : > { %1307 = vmatprep.mubr.bf16.mxu0 %v4061_v26  ;;  %1370 = vmatprep.mubr.bf16.mxu1 %v4061_v26 }
  0xaf   : > { %1839 = vmatpush1.bf16.msra.mxu0 %v3660_v13  ;;  %1902 = vmatpush1.bf16.msra.mxu1 %v3663_v14  ;;  %v3756_v13 = vld [vmem:[%s3959_s5 + $0x6e8] ss:$16 sps:$4 sm:$0xff]   ;;  %v3761_v14 = vld [vmem:[%s3959_s5 + $0x6c4] ss:$16 sps:$4 sm:$0xff]  }
  0xb0   : > { %1840 = vmatprep.subr.bf16.mxu0 %v3668_v15  ;;  %1903 = vmatprep.subr.bf16.mxu1 %v3671_v16  ;;  %v3764_v15 = vld [vmem:[%s3959_s5 + $0x6cc] ss:$16 sps:$4 sm:$0xff]   ;;  %v3759_v16 = vld [vmem:[%s3959_s5 + $0x6c0] ss:$16 sps:$4 sm:$0xff]  }
  0xb2   : > { %1308 = vmatmul.mubr.bf16.gmra.mxu0 %v4069_v30  ;;  %1371 = vmatmul.mubr.bf16.gmra.mxu1 %v4069_v30 }
  0xb3   : > { %1841 = vmatpush1.bf16.msra.mxu0 %v3666_v17  ;;  %1904 = vmatpush1.bf16.msra.mxu1 %v3669_v18  ;;  %v3762_v17 = vld [vmem:[%s3959_s5 + $0x6c8] ss:$16 sps:$4 sm:$0xff]   ;;  %v3767_v18 = vld [vmem:[%s3959_s5 + $0x6a4] ss:$16 sps:$4 sm:$0xff]  }
  0xb4   : > { %1842 = vmatprep.subr.bf16.mxu0 %v3674_v19  ;;  %1905 = vmatprep.subr.bf16.mxu1 %v3677_v20  ;;  %v3770_v19 = vld [vmem:[%s3959_s5 + $0x6ac] ss:$16 sps:$4 sm:$0xff]   ;;  %v3768_v20 = vld [vmem:[%s3959_s5 + $0x6a8] ss:$16 sps:$4 sm:$0xff]  }
  0xb5   : > { %1317 = vmatprep.mubr.bf16.mxu0 %v4132_v21  ;;  %1380 = vmatprep.mubr.bf16.mxu1 %v4132_v21 }
  0xb7   : > { %1843 = vmatpush1.bf16.msra.mxu0 %v3672_v22  ;;  %1906 = vmatpush1.bf16.msra.mxu1 %v3675_v23  ;;  %v3773_v22 = vld [vmem:[%s3959_s5 + $0x684] ss:$16 sps:$4 sm:$0xff]   ;;  %v3776_v23 = vld [vmem:[%s3959_s5 + $0x68c] ss:$16 sps:$4 sm:$0xff]  }
  0xb8   : > { %1844 = vmatprep.subr.bf16.mxu0 %v3683_v24  ;;  %1907 = vmatprep.subr.bf16.mxu1 %v3686_v25  ;;  %v4214_v24 = vld [vmem:[%s3954_s29 + $0x44] ss:$8 sps:$4 sm:$0xff]   ;;  %v3771_v25 = vld [vmem:[%s3959_s5 + $0x680] ss:$16 sps:$4 sm:$0xff]  }
  0xba   : > { %1318 = vmatmul.mubr.bf16.gmra.mxu0 %v4143_v27  ;;  %1381 = vmatmul.mubr.bf16.gmra.mxu1 %v4143_v27 }
  0xbb   : > { %1845 = vmatpush1.bf16.msra.mxu0 %v3681_v28  ;;  %1908 = vmatpush1.bf16.msra.mxu1 %v3684_v29  ;;  %v3774_v28 = vld [vmem:[%s3959_s5 + $0x688] ss:$16 sps:$4 sm:$0xff]   ;;  %v3782_v29 = vld [vmem:[%s3959_s5 + $0x664] ss:$16 sps:$4 sm:$0xff]  }
  0xbc   : > { %1846 = vmatprep.subr.bf16.mxu0 %v3689_v31  ;;  %1909 = vmatprep.subr.bf16.mxu1 %v3692_v32  ;;  %v3785_v31 = vld [vmem:[%s3959_s5 + $0x66c] ss:$16 sps:$4 sm:$0xff]   ;;  %v4225_v32 = vld [vmem:[%s3954_s29 + $0x40] ss:$8 sps:$4 sm:$0xff]  }
  0xbd   : > { %1868 = vmatprep.mubr.bf16.mxu0 %v4061_v26  ;;  %1931 = vmatprep.mubr.bf16.mxu1 %v4061_v26  ;;  %v3707_v26 = vld [vmem:[%s3959_s5 + $0x5e4] ss:$16 sps:$4 sm:$0xff]  }
  0xbf   : > { %1847 = vmatpush1.bf16.msra.mxu0 %v3687_v33  ;;  %1910 = vmatpush1.bf16.msra.mxu1 %v3690_v34  ;;  %v3780_v33 = vld [vmem:[%s3959_s5 + $0x660] ss:$16 sps:$4 sm:$0xff]   ;;  %v3783_v34 = vld [vmem:[%s3959_s5 + $0x668] ss:$16 sps:$4 sm:$0xff]  }
  0xc0   : > { %1848 = vmatprep.subr.bf16.mxu0 %v3695_v35  ;;  %1911 = vmatprep.subr.bf16.mxu1 %v3698_v36  ;;  %v3788_v35 = vld [vmem:[%s3959_s5 + $0x644] ss:$16 sps:$4 sm:$0xff]   ;;  %v3791_v36 = vld [vmem:[%s3959_s5 + $0x64c] ss:$16 sps:$4 sm:$0xff]  }
  0xc3   : > { %1849 = vmatpush1.bf16.msra.mxu0 %v3693_v37  ;;  %1912 = vmatpush1.bf16.msra.mxu1 %v3696_v38  ;;  %v3786_v37 = vld [vmem:[%s3959_s5 + $0x640] ss:$16 sps:$4 sm:$0xff]   ;;  %v3789_v38 = vld [vmem:[%s3959_s5 + $0x648] ss:$16 sps:$4 sm:$0xff]  }
  0xc4   : > { %1850 = vmatprep.subr.bf16.mxu0 %v3701_v39  ;;  %1913 = vmatprep.subr.bf16.mxu1 %v3704_v40  ;;  %v3794_v39 = vld [vmem:[%s3959_s5 + $0x624] ss:$16 sps:$4 sm:$0xff]   ;;  %v3797_v40 = vld [vmem:[%s3959_s5 + $0x62c] ss:$16 sps:$4 sm:$0xff]  }
  0xc7   : > { %1851 = vmatpush1.bf16.msra.mxu0 %v3699_v41  ;;  %1914 = vmatpush1.bf16.msra.mxu1 %v3702_v42  ;;  %v3792_v41 = vld [vmem:[%s3959_s5 + $0x620] ss:$16 sps:$4 sm:$0xff]   ;;  %v3795_v42 = vld [vmem:[%s3959_s5 + $0x628] ss:$16 sps:$4 sm:$0xff]  }
  0xc8   : > { %1852 = vmatprep.subr.bf16.mxu0 %v3707_v26  ;;  %1915 = vmatprep.subr.bf16.mxu1 %v3710_v43  ;;  %v3800_v26 = vld [vmem:[%s3959_s5 + $0x604] ss:$16 sps:$4 sm:$0xff]   ;;  %v3803_v43 = vld [vmem:[%s3959_s5 + $0x60c] ss:$16 sps:$4 sm:$0xff]  }
  0xcb   : > { %1853 = vmatpush2.bf16.msra.mxu0 %v3705_v44  ;;  %1916 = vmatpush2.bf16.msra.mxu1 %v3708_v45  ;;  %v3798_v44 = vld [vmem:[%s3959_s5 + $0x600] ss:$16 sps:$4 sm:$0xff]   ;;  %v3801_v45 = vld [vmem:[%s3959_s5 + $0x608] ss:$16 sps:$4 sm:$0xff]  }
  0xcc   : > { %1854 = vmatprep.subr.bf16.mxu0 %v3713_v46  ;;  %1917 = vmatprep.subr.bf16.mxu1 %v3716_v47  ;;  %v3809_v46 = vld [vmem:[%s3959_s5 + $0x7ec] ss:$16 sps:$4 sm:$0xff]   ;;  %v3804_v47 = vld [vmem:[%s3959_s5 + $0x7e0] ss:$16 sps:$4 sm:$0xff]  }
  0xcf   : > { %1855 = vmatpush2.bf16.msra.mxu0 %v3711_v48  ;;  %1918 = vmatpush2.bf16.msra.mxu1 %v3714_v49  ;;  %v3807_v48 = vld [vmem:[%s3959_s5 + $0x7e8] ss:$16 sps:$4 sm:$0xff]   ;;  %v3812_v49 = vld [vmem:[%s3959_s5 + $0x7c4] ss:$16 sps:$4 sm:$0xff]  }
  0xd0   : > { %1856 = vmatprep.subr.bf16.mxu0 %v3719_v50  ;;  %1919 = vmatprep.subr.bf16.mxu1 %v3722_v51  ;;  %v3815_v50 = vld [vmem:[%s3959_s5 + $0x7cc] ss:$16 sps:$4 sm:$0xff]   ;;  %v3810_v51 = vld [vmem:[%s3959_s5 + $0x7c0] ss:$16 sps:$4 sm:$0xff]  }
  0xd3   : > { %1857 = vmatpush2.bf16.msra.mxu0 %v3717_v52  ;;  %1920 = vmatpush2.bf16.msra.mxu1 %v3720_v53  ;;  %v3813_v52 = vld [vmem:[%s3959_s5 + $0x7c8] ss:$16 sps:$4 sm:$0xff]   ;;  %v3818_v53 = vld [vmem:[%s3959_s5 + $0x7a4] ss:$16 sps:$4 sm:$0xff]  }
  0xd4   : > { %1858 = vmatprep.subr.bf16.mxu0 %v3725_v54  ;;  %1921 = vmatprep.subr.bf16.mxu1 %v3728_v55  ;;  %v3821_v54 = vld [vmem:[%s3959_s5 + $0x7ac] ss:$16 sps:$4 sm:$0xff]   ;;  %v3816_v55 = vld [vmem:[%s3959_s5 + $0x7a0] ss:$16 sps:$4 sm:$0xff]  }
  0xd7   : > { %1859 = vmatpush2.bf16.msra.mxu0 %v3723_v56  ;;  %1922 = vmatpush2.bf16.msra.mxu1 %v3726_v57  ;;  %v3819_v56 = vld [vmem:[%s3959_s5 + $0x7a8] ss:$16 sps:$4 sm:$0xff]   ;;  %v3824_v57 = vld [vmem:[%s3959_s5 + $0x784] ss:$16 sps:$4 sm:$0xff]  }
  0xd8   : > { %1860 = vmatprep.subr.bf16.mxu0 %v3731_v58  ;;  %1923 = vmatprep.subr.bf16.mxu1 %v3734_v59  ;;  %v3827_v58 = vld [vmem:[%s3959_s5 + $0x78c] ss:$16 sps:$4 sm:$0xff]   ;;  %v3822_v59 = vld [vmem:[%s3959_s5 + $0x780] ss:$16 sps:$4 sm:$0xff]  }
  0xdb   : > { %1861 = vmatpush2.bf16.msra.mxu0 %v3729_v60  ;;  %1924 = vmatpush2.bf16.msra.mxu1 %v3732_v61  ;;  %v3825_v60 = vld [vmem:[%s3959_s5 + $0x788] ss:$16 sps:$4 sm:$0xff]   ;;  %v3830_v61 = vld [vmem:[%s3959_s5 + $0x764] ss:$16 sps:$4 sm:$0xff]  }
  0xdc   : > { %1862 = vmatprep.subr.bf16.mxu0 %v3737_v62  ;;  %1925 = vmatprep.subr.bf16.mxu1 %v3740_v63  ;;  %v3833_v62 = vld [vmem:[%s3959_s5 + $0x76c] ss:$16 sps:$4 sm:$0xff]   ;;  %v3828_v63 = vld [vmem:[%s3959_s5 + $0x760] ss:$16 sps:$4 sm:$0xff]  }
  0xdf   : > { %1863 = vmatpush2.bf16.msra.mxu0 %v3735_v0  ;;  %1926 = vmatpush2.bf16.msra.mxu1 %v3738_v1  ;;  %v3831_v0 = vld [vmem:[%s3959_s5 + $0x768] ss:$16 sps:$4 sm:$0xff]   ;;  %v3836_v1 = vld [vmem:[%s3959_s5 + $0x744] ss:$16 sps:$4 sm:$0xff]  }
  0xe0   : > { %1864 = vmatprep.subr.bf16.mxu0 %v3743_v2  ;;  %1927 = vmatprep.subr.bf16.mxu1 %v3746_v3  ;;  %v3839_v2 = vld [vmem:[%s3959_s5 + $0x74c] ss:$16 sps:$4 sm:$0xff]   ;;  %v3834_v3 = vld [vmem:[%s3959_s5 + $0x740] ss:$16 sps:$4 sm:$0xff]  }
  0xe3   : > { %1865 = vmatpush2.bf16.msra.mxu0 %v3741_v4  ;;  %1928 = vmatpush2.bf16.msra.mxu1 %v3744_v5  ;;  %v3837_v4 = vld [vmem:[%s3959_s5 + $0x748] ss:$16 sps:$4 sm:$0xff]   ;;  %v3842_v5 = vld [vmem:[%s3959_s5 + $0x724] ss:$16 sps:$4 sm:$0xff]  }
  0xe4   : > { %1866 = vmatprep.subr.bf16.mxu0 %v3749_v6  ;;  %1929 = vmatprep.subr.bf16.mxu1 %v3752_v7  ;;  %v3845_v6 = vld [vmem:[%s3959_s5 + $0x72c] ss:$16 sps:$4 sm:$0xff]   ;;  %v3840_v7 = vld [vmem:[%s3959_s5 + $0x720] ss:$16 sps:$4 sm:$0xff]  }
  0xe7   : > { %1867 = vmatpush2.bf16.msra.mxu0 %v3747_v8  ;;  %1930 = vmatpush2.bf16.msra.mxu1 %v3750_v9  ;;  %v3843_v8 = vld [vmem:[%s3959_s5 + $0x728] ss:$16 sps:$4 sm:$0xff]   ;;  %v3848_v9 = vld [vmem:[%s3959_s5 + $0x704] ss:$16 sps:$4 sm:$0xff]  }
  0xe8   : > { %2407 = vmatprep.subr.bf16.mxu0 %v3755_v10  ;;  %2470 = vmatprep.subr.bf16.mxu1 %v3758_v11  ;;  %v3851_v10 = vld [vmem:[%s3959_s5 + $0x70c] ss:$16 sps:$4 sm:$0xff]   ;;  %v3846_v11 = vld [vmem:[%s3959_s5 + $0x700] ss:$16 sps:$4 sm:$0xff]  }
  0xea   : > { %1869 = vmatmul.mubr.bf16.vlgmr.msra.gmra.mxu0 %v4069_v30  ;;  %1932 = vmatmul.mubr.bf16.vlgmr.msra.gmra.mxu1 %v4069_v30  ;;  %v3765_v30 = vld [vmem:[%s3959_s5 + $0x6a0] ss:$16 sps:$4 sm:$0xff]  }
  0xeb   : > { %2408 = vmatpush1.bf16.msra.mxu0 %v3753_v12  ;;  %2471 = vmatpush1.bf16.msra.mxu1 %v3756_v13  ;;  %v3849_v12 = vld [vmem:[%s3959_s5 + $0x708] ss:$16 sps:$4 sm:$0xff]   ;;  %v3852_v13 = vld [vmem:[%s3954_s29 + $0x54] ss:$8 sps:$4 sm:$0xff]  }
  0xec   : > { %2409 = vmatprep.subr.bf16.mxu0 %v3761_v14  ;;  %2472 = vmatprep.subr.bf16.mxu1 %v3764_v15  ;;  %v3854_v14 = vld [vmem:[%s3954_s29 + $0x50] ss:$8 sps:$4 sm:$0xff]  }
  0xed   : > { %1878 = vmatprep.mubr.bf16.mxu0 %v4132_v21  ;;  %1941 = vmatprep.mubr.bf16.mxu1 %v4132_v21 }
  0xef   : > { %2410 = vmatpush1.bf16.msra.mxu0 %v3759_v16  ;;  %2473 = vmatpush1.bf16.msra.mxu1 %v3762_v17 }
  0xf0   : > { %2411 = vmatprep.subr.bf16.mxu0 %v3767_v18  ;;  %2474 = vmatprep.subr.bf16.mxu1 %v3770_v19 }
  0xf2   : > { %1879 = vmatmul.mubr.bf16.gmra.mxu0 %v4143_v27  ;;  %1942 = vmatmul.mubr.bf16.gmra.mxu1 %v4143_v27 }
  0xf3   : > { %2412 = vmatpush1.bf16.msra.mxu0 %v3765_v30  ;;  %2475 = vmatpush1.bf16.msra.mxu1 %v3768_v20 }
  0xf4   : > { %2413 = vmatprep.subr.bf16.mxu0 %v3773_v22  ;;  %2476 = vmatprep.subr.bf16.mxu1 %v3776_v23 }
  0xf5   : > { %1888 = vmatprep.mubr.bf16.mxu0 %v4214_v24  ;;  %1951 = vmatprep.mubr.bf16.mxu1 %v4214_v24 }
  0xf7   : > { %2414 = vmatpush1.bf16.msra.mxu0 %v3771_v25  ;;  %2477 = vmatpush1.bf16.msra.mxu1 %v3774_v28 }
  0xf8   : > { %2415 = vmatprep.subr.bf16.mxu0 %v3782_v29  ;;  %2478 = vmatprep.subr.bf16.mxu1 %v3785_v31 }
  0xfa   : > { %1889 = vmatmul.mubr.bf16.gmra.mxu0 %v4225_v32  ;;  %1952 = vmatmul.mubr.bf16.gmra.mxu1 %v4225_v32 }
  0xfb   : > { %2416 = vmatpush1.bf16.msra.mxu0 %v3780_v33  ;;  %2479 = vmatpush1.bf16.msra.mxu1 %v3783_v34 }
  0xfc   : > { %2417 = vmatprep.subr.bf16.mxu0 %v3788_v35  ;;  %2480 = vmatprep.subr.bf16.mxu1 %v3791_v36 }
  0xfd   : > { %2439 = vmatprep.mubr.bf16.mxu0 %v4132_v21  ;;  %2502 = vmatprep.mubr.bf16.mxu1 %v4132_v21  ;;  %v3806_v21 = vld [vmem:[%s3959_s5 + $0x7e4] ss:$16 sps:$4 sm:$0xff]  }
  0xff   : > { %2418 = vmatpush1.bf16.msra.mxu0 %v3786_v37  ;;  %2481 = vmatpush1.bf16.msra.mxu1 %v3789_v38 }
 0x100   : > { %2419 = vmatprep.subr.bf16.mxu0 %v3794_v39  ;;  %2482 = vmatprep.subr.bf16.mxu1 %v3797_v40 }
 0x103   : > { %2420 = vmatpush1.bf16.msra.mxu0 %v3792_v41  ;;  %2483 = vmatpush1.bf16.msra.mxu1 %v3795_v42 }
 0x104   : > { %2421 = vmatprep.subr.bf16.mxu0 %v3800_v26  ;;  %2484 = vmatprep.subr.bf16.mxu1 %v3803_v43 }
 0x107   : > { %2422 = vmatpush1.bf16.msra.mxu0 %v3798_v44  ;;  %2485 = vmatpush1.bf16.msra.mxu1 %v3801_v45 }
 0x108   : > { %2423 = vmatprep.subr.bf16.mxu0 %v3806_v21  ;;  %2486 = vmatprep.subr.bf16.mxu1 %v3809_v46 }
 0x10b   : > { %2424 = vmatpush2.bf16.msra.mxu0 %v3804_v47  ;;  %2487 = vmatpush2.bf16.msra.mxu1 %v3807_v48 }
 0x10c   : > { %2425 = vmatprep.subr.bf16.mxu0 %v3812_v49  ;;  %2488 = vmatprep.subr.bf16.mxu1 %v3815_v50 }
 0x10f   : > { %2426 = vmatpush2.bf16.msra.mxu0 %v3810_v51  ;;  %2489 = vmatpush2.bf16.msra.mxu1 %v3813_v52 }
 0x110   : > { %2427 = vmatprep.subr.bf16.mxu0 %v3818_v53  ;;  %2490 = vmatprep.subr.bf16.mxu1 %v3821_v54 }
 0x113   : > { %2428 = vmatpush2.bf16.msra.mxu0 %v3816_v55  ;;  %2491 = vmatpush2.bf16.msra.mxu1 %v3819_v56 }
 0x114   : > { %2429 = vmatprep.subr.bf16.mxu0 %v3824_v57  ;;  %2492 = vmatprep.subr.bf16.mxu1 %v3827_v58 }
 0x117   : > { %2430 = vmatpush2.bf16.msra.mxu0 %v3822_v59  ;;  %2493 = vmatpush2.bf16.msra.mxu1 %v3825_v60 }
 0x118   : > { %2431 = vmatprep.subr.bf16.mxu0 %v3830_v61  ;;  %2494 = vmatprep.subr.bf16.mxu1 %v3833_v62 }
 0x11b   : > { %2432 = vmatpush2.bf16.msra.mxu0 %v3828_v63  ;;  %2495 = vmatpush2.bf16.msra.mxu1 %v3831_v0 }
 0x11c   : > { %2433 = vmatprep.subr.bf16.mxu0 %v3836_v1  ;;  %2496 = vmatprep.subr.bf16.mxu1 %v3839_v2 }
 0x11f   : > { %2434 = vmatpush2.bf16.msra.mxu0 %v3834_v3  ;;  %2497 = vmatpush2.bf16.msra.mxu1 %v3837_v4 }
 0x120   : > { %2435 = vmatprep.subr.bf16.mxu0 %v3842_v5  ;;  %2498 = vmatprep.subr.bf16.mxu1 %v3845_v6 }
 0x123   : > { %2436 = vmatpush2.bf16.msra.mxu0 %v3840_v7  ;;  %2499 = vmatpush2.bf16.msra.mxu1 %v3843_v8 }
 0x124   : > { %2437 = vmatprep.subr.bf16.mxu0 %v3848_v9  ;;  %2500 = vmatprep.subr.bf16.mxu1 %v3851_v10 }
 0x127   : > { %2438 = vmatpush2.bf16.msra.mxu0 %v3846_v11  ;;  %2501 = vmatpush2.bf16.msra.mxu1 %v3849_v12 }
 0x12a   : > { %2440 = vmatmul.mubr.bf16.vlgmr.msra.gmra.mxu0 %v4143_v27  ;;  %2503 = vmatmul.mubr.bf16.vlgmr.msra.gmra.mxu1 %v4143_v27  ;;  %v4285_v15 = vpop.f32.mrf.mxu0  ;;  %v4287_v16 = vpop.f32.mrf.mxu1 }
 0x12b   : > { %2449 = vmatprep.mubr.bf16.mxu0 %v4214_v24  ;;  %2512 = vmatprep.mubr.bf16.mxu1 %v4214_v24 }
 0x12c   : > { %v4289_v17 = vpop.f32.mrf.mxu0  ;;  %v4291_v27 = vpop.f32.mrf.mxu1 }
 0x12e   : > { %v4293_v18 = vpop.f32.mrf.mxu0  ;;  %v4295_v19 = vpop.f32.mrf.mxu1 }
 0x130   : > { %v4297_v30 = vpop.f32.mrf.mxu0  ;;  %v4299_v20 = vpop.f32.mrf.mxu1 }
 0x132   : > { %2450 = vmatmul.mubr.bf16.gmra.mxu0 %v4225_v32  ;;  %2513 = vmatmul.mubr.bf16.gmra.mxu1 %v4225_v32  ;;  %v4301_v22 = vpop.f32.mrf.mxu0  ;;  %v4303_v23 = vpop.f32.mrf.mxu1 }
 0x133   : > { %2459 = vmatprep.mubr.bf16.mxu0 %v3852_v13  ;;  %2522 = vmatprep.mubr.bf16.mxu1 %v3852_v13 }
 0x134   : > { %v4305_v24 = vpop.f32.mrf.mxu0  ;;  %v4307_v25 = vpop.f32.mrf.mxu1 }
 0x136   : > { %v4309_v28 = vpop.f32.mrf.mxu0  ;;  %v4311_v29 = vpop.f32.mrf.mxu1 }
 0x138   : > { %v4313_v31 = vpop.f32.mrf.mxu0  ;;  %v4315_v32 = vpop.f32.mrf.mxu1 }
 0x13a   : > { %2460 = vmatmul.mubr.bf16.gmra.mxu0 %v3854_v14  ;;  %2523 = vmatmul.mubr.bf16.gmra.mxu1 %v3854_v14  ;;  %v4317_v33 = vpop.f32.mrf.mxu0  ;;  %v4319_v34 = vpop.f32.mrf.mxu1 }
 0x13c   : > { %v4321_v35 = vpop.f32.mrf.mxu0  ;;  %v4323_v36 = vpop.f32.mrf.mxu1 }
 0x13d   : > { %4545 = vst [vmem:[#allocation3_spill] sm:$0xff] %v4321_v35  ;;  %4546 = vst [vmem:[#allocation4_spill] sm:$0xff] %v4323_v36 }
 0x13e   : > { %v4325_v37 = vpop.f32.mrf.mxu0  ;;  %v4327_v38 = vpop.f32.mrf.mxu1 }
 0x13f   : > { %4547 = vst [vmem:[#allocation5_spill] sm:$0xff] %v4325_v37  ;;  %4548 = vst [vmem:[#allocation6_spill] sm:$0xff] %v4327_v38 }
 0x140   : > { %v4329_v39 = vpop.f32.mrf.mxu0  ;;  %v4331_v40 = vpop.f32.mrf.mxu1 }
 0x141   : > { %4549 = vst [vmem:[#allocation7_spill] sm:$0xff] %v4329_v39  ;;  %4550 = vst [vmem:[#allocation8_spill] sm:$0xff] %v4331_v40  ;;  %v250_v40 = vld [vmem:[#allocation2 + $0xb0] sm:$0xff] }
 0x142   : > { %v252_v39 = vld [vmem:[#allocation2 + $0x10] sm:$0xff] }
 0x16a   : > { %v1299_v41 = vpop.f32.mrf.mxu0  ;;  %v1362_v42 = vpop.f32.mrf.mxu1 }
 0x16c   : > { %v4333_v26 = vpop.f32.mrf.mxu0  ;;  %v4335_v43 = vpop.f32.mrf.mxu1 }
 0x16e   : > { %v4337_v44 = vpop.f32.mrf.mxu0  ;;  %v4339_v45 = vpop.f32.mrf.mxu1 }
 0x170   : > { %v4341_v21 = vpop.f32.mrf.mxu0  ;;  %v4343_v46 = vpop.f32.mrf.mxu1 }
 0x172   : > { %v4345_v47 = vpop.f32.mrf.mxu0  ;;  %v4347_v48 = vpop.f32.mrf.mxu1 }
 0x174   : > { %v4349_v49 = vpop.f32.mrf.mxu0  ;;  %v4351_v50 = vpop.f32.mrf.mxu1 }
 0x176   : > { %v4353_v51 = vpop.f32.mrf.mxu0  ;;  %v4355_v52 = vpop.f32.mrf.mxu1 }
 0x178   : > { %v4357_v53 = vpop.f32.mrf.mxu0  ;;  %v4359_v54 = vpop.f32.mrf.mxu1 }
 0x17a   : > { %v4361_v55 = vpop.f32.mrf.mxu0  ;;  %v4363_v56 = vpop.f32.mrf.mxu1 }
 0x17b   : > { %4551 = vst [vmem:[#allocation9_spill] sm:$0xff] %v4361_v55  ;;  %4552 = vst [vmem:[#allocation10_spill] sm:$0xff] %v4363_v56  ;;  %v254_v56 = vld [vmem:[#allocation2 + $0x60] sm:$0xff]  ;;  %v255_v55 = vld [vmem:[#allocation2 + $0x28] sm:$0xff] }
 0x17c   : > { %v4365_v57 = vpop.f32.mrf.mxu0  ;;  %v4367_v58 = vpop.f32.mrf.mxu1 }
 0x17d   : > { %4553 = vst [vmem:[#allocation11_spill] sm:$0xff] %v4365_v57  ;;  %4554 = vst [vmem:[#allocation12_spill] sm:$0xff] %v4367_v58  ;;  %v251_v58 = vld [vmem:[#allocation2] sm:$0xff]  ;;  %v253_v57 = vld [vmem:[#allocation2 + $0x48] sm:$0xff] }
 0x17e   : > { %v4369_v59 = vpop.f32.mrf.mxu0  ;;  %v4371_v60 = vpop.f32.mrf.mxu1 }
 0x17f   : > { %4555 = vst [vmem:[#allocation13_spill] sm:$0xff] %v4369_v59  ;;  %4556 = vst [vmem:[#allocation14_spill] sm:$0xff] %v4371_v60 }
 0x180   : > { %v4373_v61 = vpop.f32.mrf.mxu0  ;;  %v4375_v62 = vpop.f32.mrf.mxu1 }
 0x181   : > { %4557 = vst [vmem:[#allocation15_spill] sm:$0xff] %v4373_v61  ;;  %4558 = vst [vmem:[#allocation16_spill] sm:$0xff] %v4375_v62 }
 0x1aa   : > { %v1870_v63 = vpop.f32.mrf.mxu0  ;;  %v1933_v0 = vpop.f32.mrf.mxu1 }
 0x1ac   : > { %v1872_v1 = vpop.f32.mrf.mxu0  ;;  %v1935_v2 = vpop.f32.mrf.mxu1 }
 0x1ae   : > { %v1874_v3 = vpop.f32.mrf.mxu0  ;;  %v1937_v4 = vpop.f32.mrf.mxu1 }
 0x1b0   : > { %v4377_v5 = vpop.f32.mrf.mxu0  ;;  %v4379_v6 = vpop.f32.mrf.mxu1 }
 0x1b2   : > { %v4381_v7 = vpop.f32.mrf.mxu0  ;;  %v4383_v8 = vpop.f32.mrf.mxu1 }
 0x1b4   : > { %v4385_v9 = vpop.f32.mrf.mxu0  ;;  %v4387_v10 = vpop.f32.mrf.mxu1 }
 0x1b6   : > { %v4389_v11 = vpop.f32.mrf.mxu0  ;;  %v4391_v12 = vpop.f32.mrf.mxu1 }
 0x1b7   : > { %4559 = vst [vmem:[#allocation17_spill] sm:$0xff] %v4389_v11  ;;  %4560 = vst [vmem:[#allocation18_spill] sm:$0xff] %v4391_v12  ;;  %v824_v12 = vadd.f32 %v4293_v18, %v254_v56 }
 0x1b8   : > { %v4393_v13 = vpop.f32.mrf.mxu0  ;;  %v4395_v14 = vpop.f32.mrf.mxu1 }
 0x1b9   : > { %4561 = vst [vmem:[#allocation19_spill] sm:$0xff] %v4393_v13  ;;  %4562 = vst [vmem:[#allocation20_spill] sm:$0xff] %v4395_v14  ;;  %v820_v13 = vadd.f32 %v4285_v15, %v250_v40  ;;  %v822_v14 = vadd.f32 %v4287_v16, %v252_v39  ;;  %v258_v15 = vld [vmem:[#allocation2 + $0x88] sm:$0xff]  ;;  %v260_v16 = vld [vmem:[#allocation2 + $0x18] sm:$0xff]  ;;  %v1395_v18 = vadd.f32 %v4337_v44, %v824_v12 }
 0x1ba   : > { %v4397_v62 = vpop.f32.mrf.mxu0  ;;  %v4399_v61 = vpop.f32.mrf.mxu1 }
 0x1bb   : > { %4563 = vst [vmem:[#allocation21_spill] sm:$0xff] %v4397_v62  ;;  %4564 = vst [vmem:[#allocation22_spill] sm:$0xff] %v4399_v61  ;;  %v256_v62 = vld [vmem:[#allocation2 + $0x40] sm:$0xff]  ;;  %v821_v61 = vadd.f32 %v4289_v17, %v251_v58  ;;  %v1391_v36 = vadd.f32 %v1299_v41, %v820_v13  ;;  %v1393_v35 = vadd.f32 %v1362_v42, %v822_v14  ;;  %v259_v58 = vld [vmem:[#allocation2 + $0x90] sm:$0xff] }
 0x1bc   : > { %v4401_v60 = vpop.f32.mrf.mxu0  ;;  %v4403_v59 = vpop.f32.mrf.mxu1 }
 0x1bd   : > { %4565 = vst [vmem:[#allocation23_spill] sm:$0xff] %v4401_v60  ;;  %4566 = vst [vmem:[#allocation24_spill] sm:$0xff] %v4403_v59  ;;  %v823_v60 = vadd.f32 %v4291_v27, %v253_v57  ;;  %v257_v59 = vld [vmem:[#allocation2 + $0x78] sm:$0xff]  ;;  %v1392_v39 = vadd.f32 %v4333_v26, %v821_v61  ;;  %v1962_v40 = vadd.f32 %v1870_v63, %v1391_v36 }
 0x1be   : > { %v4405_v38 = vpop.f32.mrf.mxu0  ;;  %v4407_v37 = vpop.f32.mrf.mxu1  ;;  %v1964_v27 = vadd.f32 %v1933_v0, %v1393_v35  ;;  %v825_v57 = vadd.f32 %v4297_v30, %v255_v55  ;;  %v827_v41 = vadd.f32 %v4299_v20, %v257_v59  ;;  %v830_v35 = vadd.f32 %v4303_v23, %v260_v16  ;;  %v262_v55 = vld [vmem:[#allocation2 + $0x38] sm:$0xff] }
 0x1bf   : > { %4567 = vst [vmem:[#allocation25_spill] sm:$0xff] %v4405_v38  ;;  %4568 = vst [vmem:[#allocation26_spill] sm:$0xff] %v4407_v37  ;;  %v826_v38 = vadd.f32 %v4295_v19, %v256_v62  ;;  %v1394_v17 = vadd.f32 %v4335_v43, %v823_v60  ;;  %v261_v62 = vld [vmem:[#allocation2 + $0x98] sm:$0xff]  ;;  %v1963_v13 = vadd.f32 %v1872_v1, %v1392_v39  ;;  %v263_v1 = vld [vmem:[#allocation2 + $0x50] sm:$0xff] }
 0x1c0   : > { %v4415_v11 = vpop.f32.mrf.mxu0  ;;  %v4417_v37 = vpop.f32.mrf.mxu1  ;;  %v828_v43 = vadd.f32 %v4301_v22, %v258_v15  ;;  %v1396_v30 = vadd.f32 %v4341_v21, %v825_v57  ;;  %v1398_v20 = vadd.f32 %v4343_v46, %v827_v41  ;;  %v829_v63 = vadd.f32 %v4305_v24, %v259_v58  ;;  %v266_v39 = vld [vmem:[#allocation2 + $0xa8] sm:$0xff] }
 0x1c1   : > { %4569 = vst [vmem:[#allocation27_spill] sm:$0xff] %v4417_v37  ;;  %v1397_v19 = vadd.f32 %v4339_v45, %v826_v38  ;;  %v1965_v14 = vadd.f32 %v1935_v2, %v1394_v17  ;;  %v264_v38 = vld [vmem:[#allocation2 + $0x70] sm:$0xff]  ;;  %v1966_v45 = vadd.f32 %v1874_v3, %v1395_v18  ;;  %v831_v22 = vadd.f32 %v4307_v25, %v261_v62  ;;  %v265_v2 = vld [vmem:[#allocation2 + $0xa0] sm:$0xff]  ;;  %v267_v18 = vld [vmem:[#allocation2 + $0x68] sm:$0xff] }
 0x1c2   : > { %v1399_v23 = vadd.f32 %v4345_v47, %v828_v43  ;;  %v1401_v21 = vadd.f32 %v4347_v48, %v830_v35  ;;  %v1967_v12 = vadd.f32 %v4377_v5, %v1396_v30  ;;  %v1969_v3 = vadd.f32 %v4379_v6, %v1398_v20  ;;  %v268_v17 = vld [vmem:[#allocation2 + $0x30] sm:$0xff]  ;;  %v4571_v43 = vld [vmem:[#allocation18_spill] sm:$0xff]  ;;  %v4572_v20 = vld [vmem:[#allocation3_spill] sm:$0xff] }
 0x1c3   : > { %v1968_v59 = vadd.f32 %v1937_v4, %v1397_v19  ;;  %v832_v24 = vadd.f32 %v4309_v28, %v262_v55  ;;  %v834_v25 = vadd.f32 %v4311_v29, %v264_v38  ;;  %v1400_v47 = vadd.f32 %v4349_v49, %v829_v63  ;;  %v269_v19 = vld [vmem:[#allocation2 + $0x58] sm:$0xff] }
 0x1c4   : > { %v1402_v48 = vadd.f32 %v4351_v50, %v831_v22  ;;  %v1970_v5 = vadd.f32 %v4381_v7, %v1399_v23  ;;  %v1972_v6 = vadd.f32 %v4383_v8, %v1401_v21  ;;  %v833_v28 = vadd.f32 %v4313_v31, %v263_v1  ;;  %v4575_v55 = vld [vmem:[#allocation10_spill] sm:$0xff]  ;;  %v4577_v22 = vld [vmem:[#allocation20_spill] sm:$0xff] }
 0x1c5   : > { %v835_v29 = vadd.f32 %v4315_v32, %v265_v2  ;;  %v1403_v49 = vadd.f32 %v4353_v51, %v832_v24  ;;  %v1405_v50 = vadd.f32 %v4355_v52, %v834_v25  ;;  %v1971_v7 = vadd.f32 %v4385_v9, %v1400_v47  ;;  %v4579_v2 = vld [vmem:[#allocation6_spill] sm:$0xff] }
 0x1c6   : > { %v1973_v8 = vadd.f32 %v4387_v10, %v1402_v48  ;;  %v836_v31 = vadd.f32 %v4317_v33, %v266_v39  ;;  %v838_v32 = vadd.f32 %v4319_v34, %v268_v17  ;;  %v1404_v51 = vadd.f32 %v4357_v53, %v833_v28  ;;  %v4582_v48 = vld [vmem:[#allocation21_spill] sm:$0xff] }
 0x1c7   : > { %v1406_v52 = vadd.f32 %v4359_v54, %v835_v29  ;;  %v1976_v10 = vadd.f32 %v4571_v43, %v1405_v50  ;;  %v837_v33 = vadd.f32 %v4572_v20, %v267_v18  ;;  %v4586_v29 = vld [vmem:[#allocation13_spill] sm:$0xff]  ;;  %v4587_v50 = vld [vmem:[#allocation14_spill] sm:$0xff] }
 0x1c8   : > { %v1409_v54 = vadd.f32 %v4575_v55, %v838_v32  ;;  %v4590_v32 = vld [vmem:[#allocation15_spill] sm:$0xff] }
 0x1c9   : > { %v1977_v23 = vadd.f32 %v4577_v22, %v1406_v52  ;;  %v4591_v52 = vld [vmem:[#allocation16_spill] sm:$0xff] }
 0x1ea   : > { %v2441_v42 = vpop.f32.mrf.mxu0  ;;  %v2504_v56 = vpop.f32.mrf.mxu1 }
 0x1eb   : > { %v2533_v37 = vadd.f32 %v2441_v42, %v1962_v40  ;;  %v2535_v26 = vadd.f32 %v2504_v56, %v1964_v27 }
 0x1ec   : > { %v2443_v36 = vpop.f32.mrf.mxu0  ;;  %v2506_v44 = vpop.f32.mrf.mxu1 }
 0x1ed   : > { %2557 = vst [vmem:[#allocation2 + $0xb0] sm:$0xff] %v2533_v37  ;;  %2559 = vst [vmem:[#allocation2 + $0x10] sm:$0xff] %v2535_v26  ;;  %v2534_v60 = vadd.f32 %v2443_v36, %v1963_v13  ;;  %v2536_v61 = vadd.f32 %v2506_v44, %v1965_v14  ;;  %v270_v13 = vld [vmem:[#allocation2 + $0x80] sm:$0xff]  ;;  %v4570_v26 = vld [vmem:[#allocation17_spill] sm:$0xff] }
 0x1ee   : > { %v2445_v0 = vpop.f32.mrf.mxu0  ;;  %v2508_v46 = vpop.f32.mrf.mxu1  ;;  %v272_v14 = vld [vmem:[#allocation2 + $0x20] sm:$0xff]  ;;  %v1974_v9 = vadd.f32 %v4570_v26, %v1403_v49  ;;  %v4573_v36 = vld [vmem:[#allocation4_spill] sm:$0xff]  ;;  %v4574_v44 = vld [vmem:[#allocation9_spill] sm:$0xff] }
 0x1ef   : > { %2558 = vst [vmem:[#allocation2] sm:$0xff] %v2534_v60  ;;  %2560 = vst [vmem:[#allocation2 + $0x48] sm:$0xff] %v2536_v61  ;;  %v2537_v37 = vadd.f32 %v2445_v0, %v1966_v45  ;;  %v2539_v4 = vadd.f32 %v2508_v46, %v1968_v59  ;;  %v839_v34 = vadd.f32 %v4573_v36, %v269_v19  ;;  %v271_v59 = vld [vmem:[#allocation2 + $0xb8] sm:$0xff]  ;;  %v273_v60 = vld [vmem:[#allocation2 + $0x8] sm:$0xff] }
 0x1f0   : > { %v2447_v15 = vpop.f32.mrf.mxu0  ;;  %v2510_v16 = vpop.f32.mrf.mxu1  ;;  %v1407_v53 = vadd.f32 %v4574_v44, %v836_v31  ;;  %v4576_v61 = vld [vmem:[#allocation19_spill] sm:$0xff]  ;;  %v4578_v46 = vld [vmem:[#allocation5_spill] sm:$0xff] }
 0x1f1   : > { %2561 = vst [vmem:[#allocation2 + $0x60] sm:$0xff] %v2537_v37  ;;  %2563 = vst [vmem:[#allocation2 + $0x40] sm:$0xff] %v2539_v4  ;;  %v2538_v40 = vadd.f32 %v2447_v15, %v1967_v12  ;;  %v2540_v27 = vadd.f32 %v2510_v16, %v1969_v3  ;;  %v1975_v63 = vadd.f32 %v4576_v61, %v1404_v51  ;;  %v4580_v3 = vld [vmem:[#allocation11_spill] sm:$0xff]  ;;  %v4581_v4 = vld [vmem:[#allocation12_spill] sm:$0xff] }
 0x1f2   : > { %v2451_v57 = vpop.f32.mrf.mxu0  ;;  %v2514_v41 = vpop.f32.mrf.mxu1  ;;  %v840_v1 = vadd.f32 %v4578_v46, %v270_v13  ;;  %v842_v12 = vadd.f32 %v4579_v2, %v272_v14  ;;  %v1408_v37 = vadd.f32 %v4580_v3, %v837_v33  ;;  %v1410_v24 = vadd.f32 %v4581_v4, %v839_v34  ;;  %v4583_v16 = vld [vmem:[#allocation22_spill] sm:$0xff]  ;;  %v4588_v19 = vld [vmem:[#allocation23_spill] sm:$0xff]  ;;  %v4592_v14 = vld [vmem:[#allocation25_spill] sm:$0xff] }
 0x1f3   : > { %2562 = vst [vmem:[#allocation2 + $0x28] sm:$0xff] %v2538_v40  ;;  %2564 = vst [vmem:[#allocation2 + $0x78] sm:$0xff] %v2540_v27  ;;  %v2541_v42 = vadd.f32 %v2451_v57, %v1970_v5  ;;  %v2543_v56 = vadd.f32 %v2514_v41, %v1972_v6  ;;  %v1978_v15 = vadd.f32 %v4582_v48, %v1407_v53  ;;  %v4584_v6 = vld [vmem:[#allocation7_spill] sm:$0xff]  ;;  %v4585_v27 = vld [vmem:[#allocation8_spill] sm:$0xff] }
 0x1f4   : > { %v2453_v58 = vpop.f32.mrf.mxu0  ;;  %v2516_v62 = vpop.f32.mrf.mxu1  ;;  %v1980_v39 = vadd.f32 %v4583_v16, %v1409_v54  ;;  %v841_v40 = vadd.f32 %v4584_v6, %v271_v59  ;;  %v843_v28 = vadd.f32 %v4585_v27, %v273_v60  ;;  %v1411_v49 = vadd.f32 %v4586_v29, %v840_v1  ;;  %v4594_v36 = vld [vmem:[#allocation27_spill] sm:$0xff] }
 0x1f5   : > { %2565 = vst [vmem:[#allocation2 + $0x88] sm:$0xff] %v2541_v42  ;;  %2567 = vst [vmem:[#allocation2 + $0x18] sm:$0xff] %v2543_v56  ;;  %v2542_v35 = vadd.f32 %v2453_v58, %v1971_v7  ;;  %v2544_v30 = vadd.f32 %v2516_v62, %v1973_v8  ;;  %v1413_v57 = vadd.f32 %v4587_v50, %v842_v12  ;;  %v4589_v8 = vld [vmem:[#allocation24_spill] sm:$0xff] }
 0x1f6   : > { %v2455_v38 = vpop.f32.mrf.mxu0  ;;  %v2518_v45 = vpop.f32.mrf.mxu1  ;;  %v1979_v7 = vadd.f32 %v4588_v19, %v1408_v37  ;;  %v1981_v42 = vadd.f32 %v4589_v8, %v1410_v24  ;;  %v1412_v51 = vadd.f32 %v4590_v32, %v841_v40  ;;  %v1414_v58 = vadd.f32 %v4591_v52, %v843_v28 }
 0x1f7   : > { %2566 = vst [vmem:[#allocation2 + $0x90] sm:$0xff] %v2542_v35  ;;  %2568 = vst [vmem:[#allocation2 + $0x98] sm:$0xff] %v2544_v30  ;;  %v2545_v21 = vadd.f32 %v2455_v38, %v1974_v9  ;;  %v2547_v0 = vadd.f32 %v2518_v45, %v1976_v10  ;;  %v1982_v26 = vadd.f32 %v4592_v14, %v1411_v49  ;;  %v4593_v9 = vld [vmem:[#allocation26_spill] sm:$0xff] }
 0x1f8   : > { %v2457_v25 = vpop.f32.mrf.mxu0  ;;  %v2520_v47 = vpop.f32.mrf.mxu1  ;;  %v1984_v43 = vadd.f32 %v4593_v9, %v1413_v57  ;;  %v1983_v33 = vadd.f32 %v4415_v11, %v1412_v51  ;;  %v1985_v34 = vadd.f32 %v4594_v36, %v1414_v58 }
 0x1f9   : > { %2569 = vst [vmem:[#allocation2 + $0x38] sm:$0xff] %v2545_v21  ;;  %2571 = vst [vmem:[#allocation2 + $0x70] sm:$0xff] %v2547_v0  ;;  %v2546_v17 = vadd.f32 %v2457_v25, %v1975_v63  ;;  %v2548_v5 = vadd.f32 %v2520_v47, %v1977_v23 }
 0x1fa   : > { %v2461_v41 = vpop.f32.mrf.mxu0  ;;  %v2524_v18 = vpop.f32.mrf.mxu1 }
 0x1fb   : > { %2570 = vst [vmem:[#allocation2 + $0x50] sm:$0xff] %v2546_v17  ;;  %2572 = vst [vmem:[#allocation2 + $0xa0] sm:$0xff] %v2548_v5  ;;  %v2549_v56 = vadd.f32 %v2461_v41, %v1978_v15  ;;  %v2551_v31 = vadd.f32 %v2524_v18, %v1980_v39 }
 0x1fc   : > { %v2463_v62 = vpop.f32.mrf.mxu0  ;;  %v2526_v13 = vpop.f32.mrf.mxu1 }
 0x1fd   : > { %2573 = vst [vmem:[#allocation2 + $0xa8] sm:$0xff] %v2549_v56  ;;  %2575 = vst [vmem:[#allocation2 + $0x30] sm:$0xff] %v2551_v31  ;;  %v2550_v10 = vadd.f32 %v2463_v62, %v1979_v7  ;;  %v2552_v35 = vadd.f32 %v2526_v13, %v1981_v42 }
 0x1fe   : > { %v2465_v30 = vpop.f32.mrf.mxu0  ;;  %v2528_v20 = vpop.f32.mrf.mxu1 }
 0x1ff   : > { %2574 = vst [vmem:[#allocation2 + $0x68] sm:$0xff] %v2550_v10  ;;  %2576 = vst [vmem:[#allocation2 + $0x58] sm:$0xff] %v2552_v35  ;;  %v2553_v44 = vadd.f32 %v2465_v30, %v1982_v26  ;;  %v2555_v53 = vadd.f32 %v2528_v20, %v1984_v43  ;;  %2584 = sbr.rel (%p3381_p9) target bundleno = 556 (0x22c), region = 40 }
 0x200   : > { %v2467_v55 = vpop.f32.mrf.mxu0  ;;  %v2530_v54 = vpop.f32.mrf.mxu1 }
 0x201   : > { %2577 = vst [vmem:[#allocation2 + $0x80] sm:$0xff] %v2553_v44  ;;  %2579 = vst [vmem:[#allocation2 + $0x20] sm:$0xff] %v2555_v53  ;;  %v2554_v38 = vadd.f32 %v2467_v55, %v1983_v33  ;;  %v2556_v45 = vadd.f32 %v2530_v54, %v1985_v34 }
 0x203   : > { %2578 = vst [vmem:[#allocation2 + $0xb8] sm:$0xff] %v2554_v38  ;;  %2580 = vst [vmem:[#allocation2 + $0x8] sm:$0xff] %v2556_v45 }
 0x204   : > { %v2611_v59 = vlaneseq  ;;  %v2609_v11 = vld [vmem:[%s4543_s2] sm:$0xf]  ;;  %v2585_v61 = vld [vmem:[#allocation2 + $0xb0] sm:$0xff]  ;;  %v2588_v1 = vld [vmem:[#allocation2 + $0x48] sm:$0xff] }
 0x205   : > { %v2586_v63 = vld [vmem:[#allocation2] sm:$0xff]  ;;  %v2587_v46 = vld [vmem:[#allocation2 + $0x10] sm:$0xff]  ;;  %v2590_v24 = vld [vmem:[#allocation2 + $0x28] sm:$0xff] }
 0x206   : > { %v2612_v60 = vshrl.u32 %v2611_v59, 7  ;;  %v2589_v2 = vld [vmem:[#allocation2 + $0x60] sm:$0xff]  ;;  %v2592_v47 = vld [vmem:[#allocation2 + $0x78] sm:$0xff]  ;;  %v2593_v41 = vld [vmem:[#allocation2 + $0x88] sm:$0xff] }
 0x207   : > { %v2591_v25 = vld [vmem:[#allocation2 + $0x40] sm:$0xff]  ;;  %v2594_v42 = vld [vmem:[#allocation2 + $0x90] sm:$0xff]  ;;  %v2595_v56 = vld [vmem:[#allocation2 + $0x18] sm:$0xff] }
 0x208   : > { %v2613_v22 = vsub.s32 0, %v2612_v60  ;;  %v2617_v23 = vsub.s32 1, %v2612_v60  ;;  %v2621_v21 = vsub.s32 2, %v2612_v60  ;;  %v2625_v0 = vsub.s32 3, %v2612_v60  ;;  %v2596_v31 = vld [vmem:[#allocation2 + $0x98] sm:$0xff]  ;;  %v2598_v33 = vld [vmem:[#allocation2 + $0x50] sm:$0xff] }
 0x209   : > { %v2597_v20 = vld [vmem:[#allocation2 + $0x38] sm:$0xff]  ;;  %v2599_v53 = vld [vmem:[#allocation2 + $0x70] sm:$0xff] }
 0x20a   : > { %v4481_v12 = vrot.slane %v2609_v11, %v2613_v22  ;;  %v4483_v3 = vrot.slane %v2609_v11, %v2617_v23  ;;  %v4485_v37 = vrot.slane %v2609_v11, %v2621_v21  ;;  %v4487_v4 = vrot.slane %v2609_v11, %v2625_v0  ;;  %v2600_v11 = vld [vmem:[#allocation2 + $0xa0] sm:$0xff]  ;;  %v2601_v21 = vld [vmem:[#allocation2 + $0xa8] sm:$0xff] }
 0x20b   : > { %v2602_v0 = vld [vmem:[#allocation2 + $0x68] sm:$0xff] }
 0x20c   : > { %v2631_v48 = vadd.f32 %v4481_v12, %v2585_v61  ;;  %v2632_v15 = vadd.f32 %v4483_v3, %v2586_v63  ;;  %v2633_v16 = vadd.f32 %v4485_v37, %v2587_v46  ;;  %v2634_v39 = vadd.f32 %v4487_v4, %v2588_v1  ;;  %v2603_v46 = vld [vmem:[#allocation2 + $0x30] sm:$0xff] }
 0x20d   : > { %v2635_v17 = vadd.f32 %v4481_v12, %v2589_v2  ;;  %v2636_v5 = vadd.f32 %v4483_v3, %v2590_v24  ;;  %v2637_v6 = vadd.f32 %v4485_v37, %v2591_v25  ;;  %v2638_v40 = vadd.f32 %v4487_v4, %v2592_v47 }
 0x20e   : > { %vm2655_vm0 = vcmp.ge.f32.partialorder %v2631_v48, 0.0  ;;  %vm2656_vm1 = vcmp.ge.f32.partialorder %v2632_v15, 0.0  ;;  %v2679_v27 = vmul.f32 0.2, %v2631_v48  ;;  %v2680_v28 = vmul.f32 0.2, %v2632_v15 }
 0x20f   : > { %vm2657_vm2 = vcmp.ge.f32.partialorder %v2633_v16, 0.0  ;;  %vm2658_vm3 = vcmp.ge.f32.partialorder %v2634_v39, 0.0  ;;  %v2681_v29 = vmul.f32 0.2, %v2633_v16  ;;  %v2682_v49 = vmul.f32 0.2, %v2634_v39 }
 0x210   : > { %v2703_v50 = vsel %vm2655_vm0, %v2631_v48, %v2679_v27  ;;  %v2704_v57 = vsel %vm2656_vm1, %v2632_v15, %v2680_v28  ;;  %vm2659_vm4 = vcmp.ge.f32.partialorder %v2635_v17, 0.0  ;;  %vm2660_vm5 = vcmp.ge.f32.partialorder %v2636_v5, 0.0  ;;  %v2605_v27 = vld [vmem:[#allocation2 + $0x80] sm:$0xff] }
 0x211   : > { %v3397_v18 = vpack.c.bf16 %v2704_v57, %v2703_v50  ;;  %v2705_v19 = vsel %vm2657_vm2, %v2633_v16, %v2681_v29  ;;  %v2706_v7 = vsel %vm2658_vm3, %v2634_v39, %v2682_v49  ;;  %v2683_v8 = vmul.f32 0.2, %v2635_v17  ;;  %v2604_v39 = vld [vmem:[#allocation2 + $0x58] sm:$0xff] }
 0x212   : > { %v3398_v32 = vpack.c.bf16 %v2706_v7, %v2705_v19  ;;  %v2684_v51 = vmul.f32 0.2, %v2636_v5  ;;  %vm2661_vm6 = vcmp.ge.f32.partialorder %v2637_v6, 0.0  ;;  %vm2662_vm7 = vcmp.ge.f32.partialorder %v2638_v40, 0.0  ;;  %v2606_v49 = vld [vmem:[#allocation2 + $0xb8] sm:$0xff] }
 0x213   : > { %2799 = vst [vmem:[%s3964_s8] sm:$0xff] %v3397_v18  ;;  %v2707_v52 = vsel %vm2659_vm4, %v2635_v17, %v2683_v8  ;;  %v2685_v58 = vmul.f32 0.2, %v2637_v6  ;;  %v2686_v62 = vmul.f32 0.2, %v2638_v40  ;;  %v2639_v13 = vadd.f32 %v4481_v12, %v2593_v41 }
 0x214   : > { %2800 = vst [vmem:[%s3964_s8 + $0x8] sm:$0xff] %v3398_v32  ;;  %v2708_v14 = vsel %vm2660_vm5, %v2636_v5, %v2684_v51  ;;  %v2640_v26 = vadd.f32 %v4483_v3, %v2594_v42  ;;  %v2641_v9 = vadd.f32 %v4485_v37, %v2595_v56  ;;  %v2642_v43 = vadd.f32 %v4487_v4, %v2596_v31  ;;  %v2607_v42 = vld [vmem:[#allocation2 + $0x20] sm:$0xff]  ;;  %v2608_v51 = vld [vmem:[#allocation2 + $0x8] sm:$0xff] }
 0x215   : > { %v3399_v10 = vpack.c.bf16 %v2708_v14, %v2707_v52  ;;  %v2709_v35 = vsel %vm2661_vm6, %v2637_v6, %v2685_v58  ;;  %v2710_v30 = vsel %vm2662_vm7, %v2638_v40, %v2686_v62  ;;  %vm2663_vm8 = vcmp.ge.f32.partialorder %v2639_v13, 0.0 }
 0x216   : > { %v3400_v36 = vpack.c.bf16 %v2710_v30, %v2709_v35  ;;  %vm2664_vm9 = vcmp.ge.f32.partialorder %v2640_v26, 0.0  ;;  %v2687_v34 = vmul.f32 0.2, %v2639_v13  ;;  %v2688_v44 = vmul.f32 0.2, %v2640_v26 }
 0x217   : > { %2801 = vst [vmem:[%s3964_s8 + $0x10] sm:$0xff] %v3399_v10  ;;  %vm2665_vm10 = vcmp.ge.f32.partialorder %v2641_v9, 0.0  ;;  %vm2666_vm11 = vcmp.ge.f32.partialorder %v2642_v43, 0.0  ;;  %v2689_v55 = vmul.f32 0.2, %v2641_v9  ;;  %v2643_v59 = vadd.f32 %v4481_v12, %v2597_v20 }
 0x218   : > { %v2690_v54 = vmul.f32 0.2, %v2642_v43  ;;  %2802 = vst [vmem:[%s3964_s8 + $0x18] sm:$0xff] %v3400_v36  ;;  %v2711_v38 = vsel %vm2663_vm8, %v2639_v13, %v2687_v34  ;;  %v2712_v45 = vsel %vm2664_vm9, %v2640_v26, %v2688_v44  ;;  %v2644_v60 = vadd.f32 %v4483_v3, %v2598_v33 }
 0x219   : > { %v3401_v61 = vpack.c.bf16 %v2712_v45, %v2711_v38  ;;  %v2713_v63 = vsel %vm2665_vm10, %v2641_v9, %v2689_v55  ;;  %v2645_v23 = vadd.f32 %v4485_v37, %v2599_v53  ;;  %vm2667_vm12 = vcmp.ge.f32.partialorder %v2643_v59, 0.0 }
 0x21a   : > { %v2714_v22 = vsel %vm2666_vm11, %v2642_v43, %v2690_v54  ;;  %vm2668_vm13 = vcmp.ge.f32.partialorder %v2644_v60, 0.0  ;;  %v2691_v2 = vmul.f32 0.2, %v2643_v59  ;;  %v2692_v24 = vmul.f32 0.2, %v2644_v60 }
 0x21b   : > { %v3402_v1 = vpack.c.bf16 %v2714_v22, %v2713_v63  ;;  %2803 = vst [vmem:[%s3964_s8 + $0x20] sm:$0xff] %v3401_v61  ;;  %v2646_v25 = vadd.f32 %v4487_v4, %v2600_v11  ;;  %vm2669_vm14 = vcmp.ge.f32.partialorder %v2645_v23, 0.0  ;;  %v2693_v47 = vmul.f32 0.2, %v2645_v23 }
 0x21c   : > { %v2715_v48 = vsel %vm2667_vm12, %v2643_v59, %v2691_v2  ;;  %v2647_v15 = vadd.f32 %v4481_v12, %v2601_v21  ;;  %v2648_v16 = vadd.f32 %v4483_v3, %v2602_v0  ;;  %v2649_v17 = vadd.f32 %v4485_v37, %v2603_v46 }
 0x21d   : > { %2804 = vst [vmem:[%s3964_s8 + $0x28] sm:$0xff] %v3402_v1  ;;  %v2716_v5 = vsel %vm2668_vm13, %v2644_v60, %v2692_v24  ;;  %vm2670_vm15 = vcmp.ge.f32.partialorder %v2646_v25, 0.0  ;;  %v2694_v6 = vmul.f32 0.2, %v2646_v25  ;;  %v2717_v40 = vsel %vm2669_vm14, %v2645_v23, %v2693_v47 }
 0x21e   : > { %v3403_v28 = vpack.c.bf16 %v2716_v5, %v2715_v48  ;;  %vm2671_vm0 = vcmp.ge.f32.partialorder %v2647_v15, 0.0  ;;  %vm2672_vm1 = vcmp.ge.f32.partialorder %v2648_v16, 0.0  ;;  %v2695_v29 = vmul.f32 0.2, %v2647_v15 }
 0x21f   : > { %v2718_v50 = vsel %vm2670_vm15, %v2646_v25, %v2694_v6  ;;  %v2696_v57 = vmul.f32 0.2, %v2648_v16  ;;  %v2650_v41 = vadd.f32 %v4487_v4, %v2604_v39  ;;  %vm2673_vm2 = vcmp.ge.f32.partialorder %v2649_v17, 0.0 }
 0x220   : > { %2805 = vst [vmem:[%s3964_s8 + $0x30] sm:$0xff] %v3403_v28  ;;  %v3404_v18 = vpack.c.bf16 %v2718_v50, %v2717_v40  ;;  %v2719_v19 = vsel %vm2671_vm0, %v2647_v15, %v2695_v29  ;;  %v2697_v7 = vmul.f32 0.2, %v2649_v17  ;;  %v2651_v8 = vadd.f32 %v4481_v12, %v2605_v27 }
 0x221   : > { %v2720_v56 = vsel %vm2672_vm1, %v2648_v16, %v2696_v57  ;;  %vm2674_vm3 = vcmp.ge.f32.partialorder %v2650_v41, 0.0  ;;  %v2698_v31 = vmul.f32 0.2, %v2650_v41  ;;  %v2652_v32 = vadd.f32 %v4483_v3, %v2606_v49 }
 0x222   : > { %2806 = vst [vmem:[%s3964_s8 + $0x38] sm:$0xff] %v3404_v18  ;;  %v3405_v52 = vpack.c.bf16 %v2720_v56, %v2719_v19  ;;  %v2721_v58 = vsel %vm2673_vm2, %v2649_v17, %v2697_v7  ;;  %vm2675_vm4 = vcmp.ge.f32.partialorder %v2651_v8, 0.0  ;;  %v2699_v62 = vmul.f32 0.2, %v2651_v8 }
 0x223   : > { %v2722_v13 = vsel %vm2674_vm3, %v2650_v41, %v2698_v31  ;;  %vm2676_vm5 = vcmp.ge.f32.partialorder %v2652_v32, 0.0  ;;  %v2700_v14 = vmul.f32 0.2, %v2652_v32  ;;  %v2653_v12 = vadd.f32 %v4485_v37, %v2607_v42 }
 0x224   : > { %2807 = vst [vmem:[%s3964_s8 + $0x40] sm:$0xff] %v3405_v52  ;;  %v3406_v26 = vpack.c.bf16 %v2722_v13, %v2721_v58  ;;  %v2723_v9 = vsel %vm2675_vm4, %v2651_v8, %v2699_v62  ;;  %v2654_v43 = vadd.f32 %v4487_v4, %v2608_v51 }
 0x225   : > { %v2724_v3 = vsel %vm2676_vm5, %v2652_v32, %v2700_v14  ;;  %vm2677_vm6 = vcmp.ge.f32.partialorder %v2653_v12, 0.0  ;;  %v2701_v10 = vmul.f32 0.2, %v2653_v12 }
 0x226   : > { %2808 = vst [vmem:[%s3964_s8 + $0x48] sm:$0xff] %v3406_v26  ;;  %v3407_v35 = vpack.c.bf16 %v2724_v3, %v2723_v9  ;;  %vm2678_vm7 = vcmp.ge.f32.partialorder %v2654_v43, 0.0  ;;  %v2702_v30 = vmul.f32 0.2, %v2654_v43 }
 0x227   : > { %v2725_v20 = vsel %vm2677_vm6, %v2653_v12, %v2701_v10 }
 0x228   : > { %2809 = vst [vmem:[%s3964_s8 + $0x50] sm:$0xff] %v3407_v35  ;;  %v2726_v33 = vsel %vm2678_vm7, %v2654_v43, %v2702_v30 }
 0x229   : > { %v3408_v36 = vpack.c.bf16 %v2726_v33, %v2725_v20 }
 0x22b   : > { %2810 = vst [vmem:[%s3964_s8 + $0x58] sm:$0xff] %v3408_v36 }
 0x22c PF: > { %s13_s16 = sadd.s32 1, %s3893_s16   ;;  %s4595_s12 = smov %s3885_s14 }
 0x22d   : > { %p10_p10 = scmp.ge.s32.totalorder %s13_s16, 10   ;;  %s4596_s13 = smov %s3889_s15 }
 0x22e   : > { %s4597_s14 = smov %s4600_s17  ;;  %s4598_s15 = smov %s4604_s18 }
 0x22f   :  { %12 = sbr.rel (!%p10_p10) target bundleno = 3 (0x3), region = 76 }

// kernel: discriminator_forward.9
= control target key start
LH: loop header
LB: loop body
LE: loop exit
PB: predicated region body
PF: predicated region fallthrough
CT: control target
= control target key end

     0   :  { %s2832_s12 = smov 0   ;;  %s2834_s13 = smov 0   ;;  %s3078_s0 = inlined_call_operand.vmem [shape: bf16[4,2,80,512], index: 0, kind: input, shape index: {}]   ;;  %s3079_s1 = inlined_call_operand.vmem [shape: bf16[16,512,128], index: 1, kind: input, shape index: {}]   ;;  %s3080_s2 = inlined_call_operand.vmem [shape: f32[1,128], index: 2, kind: input, shape index: {}]   ;;  %s3081_s3 = inlined_call_operand.vmem [shape: f32[2,32,128], index: 3, kind: output, shape index: {}]  }
   0x1   :  { %s2836_s14 = smov 0   ;;  %s2838_s15 = smov 0  }
   0x2   :  { %s2840_s16 = smov 0  }
   0x3 LB: > { %s22_s17 = sadd.s32 1, %s2801_s14  ;;  %s25_s18 = sadd.s32 1, %s2805_s15  ;;  %s2809_s16 = sphi %s2840_s16, %s13_s16   ;;  %s2805_s15 = sphi %s2838_s15, %s3085_s15   ;;  %s2801_s14 = sphi %s2836_s14, %s3084_s14   ;;  %s2797_s13 = sphi %s2834_s13, %s3083_s13   ;;  %s2793_s12 = sphi %s2832_s12, %s3082_s12  }
   0x4   : > { %p23_p0 = scmp.ge.s32.totalorder %s22_s17, 4  ;;  %p1980_p1 = scmp.ge.s32.totalorder %s2809_s16, 1 }
   0x5   : > { %p167_p2 = scmp.lt.s32.totalorder %s2809_s16, 9 }
   0x6   : > { %s3087_s17 = smov (%p23_p0, %s22_s17), 0  ;;  %s3089_s18 = smov (!%p23_p0, %s25_s18), %s2805_s15 }
   0x7   : > { %p168_p3 = pnand %p1980_p1, %p167_p2  ;;  %p27_p4 = scmp.ge.s32.totalorder %s3089_s18, 2 }
   0x8   : > { %p201_p5 = scmp.lt.s32.totalorder (!%p168_p3), %s2793_s12, 3  ;;  %p203_p6 = scmp.lt.s32.totalorder (!%p168_p3), %s2797_s13, 1 }
   0x9   : > { %s3091_s18 = smov (%p27_p4, %s3089_s18), 0  ;;  %171 = sbr.rel (%p168_p3) target bundleno = 383 (0x17f), region = 32 }
   0xa   : > { %s1982_s19 = sshll.u32 (!%p168_p3), %s2793_s12, 2  ;;  %p1987_p8 = scmp.ne.s32.totalorder (!%p168_p3), %s2793_s12, 0 }
   0xb   : > { %p211_p7 = scmp.lt.s32.totalorder (!%p168_p3), %s1982_s19, 15 }
   0xe   : > { %s202_s20 = scalar_select %p201_p5, %s2793_s12, 3 }
   0xf   : > { %s3093_s13 = smov (!%p203_p6, %s2797_s13), 1  ;;  %s3095_s19 = smov (!%p211_p7, %s1982_s19), 15 }
  0x10   : > { %s2571_s21 = smul.u32 80, %s202_s20  ;;  %s2345_s23 = sshll.u32 %s3093_s13, 5 }
  0x11   : > { %s2570_s22 = smul.u32 40, %s3093_s13  ;;  %s2870_s27 = scalar_lea.vmem %s3081_s3, %s2345_s23 }
  0x12   : > { %s2344_s29 = sshll.u32 %s3095_s19, 8  ;;  %226 = sbr.rel (%p1987_p8) target bundleno = 26 (0x1a), region = 36 }
  0x13   : > { %s207_s24 = sadd.s32 %s2571_s21, %s2570_s22  ;;  %s2880_s8 = scalar_lea.vmem %s3079_s1, %s2344_s29 }
  0x14   : > { %s1981_s28 = sshll.u32 %s207_s24, 2 }
  0x15   : > { %s2875_s5 = scalar_lea.vmem %s3078_s0, %s1981_s28 }
  0x17   : > { %v2811_v0 = vmov 0.0  }
  0x18   : > { %227 = vst [vmem:[#allocation2 + $0x10] sm:$0xff] %v2811_v0  ;;  %228 = vst [vmem:[#allocation2] sm:$0xff] %v2811_v0 }
  0x19   : > { %229 = vst [vmem:[#allocation2 + $0x18] sm:$0xff] %v2811_v0  ;;  %230 = vst [vmem:[#allocation2 + $0x8] sm:$0xff] %v2811_v0 }
  0x1a PF: > { %v2613_v1 = vld [vmem:[%s2880_s8 + $0x78] sm:$0xff]   ;;  %v2617_v5 = vld [vmem:[%s2880_s8 + $0x70] sm:$0xff]   ;;  %v2621_v9 = vld [vmem:[%s2880_s8 + $0x68] sm:$0xff]   ;;  %p2340_p9 = scmp.ne.s32.totalorder %s2793_s12, 3 }
  0x1b   : > { %v2614_v2 = vld [vmem:[%s2880_s8 + $0xf8] sm:$0xff]   ;;  %2346 = vmatprep.subr.bf16.mxu0 %v2613_v1  ;;  %v2618_v6 = vld [vmem:[%s2880_s8 + $0xf0] sm:$0xff]   ;;  %v2622_v10 = vld [vmem:[%s2880_s8 + $0xe8] sm:$0xff]  }
  0x1c   : > { %v2615_v3 = vld [vmem:[%s2880_s8 + $0x38] sm:$0xff]   ;;  %2374 = vmatprep.subr.bf16.mxu1 %v2614_v2  ;;  %v2619_v7 = vld [vmem:[%s2880_s8 + $0x30] sm:$0xff]   ;;  %v2623_v11 = vld [vmem:[%s2880_s8 + $0x28] sm:$0xff]  }
  0x1d   : > { %v2616_v4 = vld [vmem:[%s2880_s8 + $0xb8] sm:$0xff]   ;;  %2347 = vmatpush3.bf16.msra.mxu0 %v2615_v3  ;;  %v2620_v8 = vld [vmem:[%s2880_s8 + $0xb0] sm:$0xff]   ;;  %v2624_v12 = vld [vmem:[%s2880_s8 + $0xa8] sm:$0xff]  }
  0x1e   : > { %2375 = vmatpush3.bf16.msra.mxu1 %v2616_v4  ;;  %2348 = vmatprep.subr.bf16.mxu0 %v2617_v5  ;;  %v2625_v13 = vld [vmem:[%s2880_s8 + $0x60] sm:$0xff]   ;;  %v2629_v17 = vld [vmem:[%s2880_s8 + $0x58] sm:$0xff]   ;;  %v2633_v21 = vld [vmem:[%s2880_s8 + $0x50] sm:$0xff]  }
  0x1f   : > { %2376 = vmatprep.subr.bf16.mxu1 %v2618_v6  ;;  %v2626_v14 = vld [vmem:[%s2880_s8 + $0xe0] sm:$0xff]   ;;  %v2630_v18 = vld [vmem:[%s2880_s8 + $0xd8] sm:$0xff]   ;;  %v2634_v22 = vld [vmem:[%s2880_s8 + $0xd0] sm:$0xff]  }
  0x20   : > { %v2627_v15 = vld [vmem:[%s2880_s8 + $0x20] sm:$0xff]   ;;  %v2631_v19 = vld [vmem:[%s2880_s8 + $0x18] sm:$0xff]   ;;  %v2635_v23 = vld [vmem:[%s2880_s8 + $0x10] sm:$0xff]  }
  0x21   : > { %2349 = vmatpush3.bf16.msra.mxu0 %v2619_v7  ;;  %v2628_v16 = vld [vmem:[%s2880_s8 + $0xa0] sm:$0xff]   ;;  %v2632_v20 = vld [vmem:[%s2880_s8 + $0x98] sm:$0xff]   ;;  %v2636_v24 = vld [vmem:[%s2880_s8 + $0x90] sm:$0xff]  }
  0x22   : > { %2377 = vmatpush3.bf16.msra.mxu1 %v2620_v8  ;;  %2350 = vmatprep.subr.bf16.mxu0 %v2621_v9  ;;  %v2637_v25 = vld [vmem:[%s2880_s8 + $0x48] sm:$0xff]   ;;  %v2641_v29 = vld [vmem:[%s2880_s8 + $0x40] sm:$0xff]   ;;  %v2651_v37 = vld [vmem:[%s2880_s8 + $0x178] sm:$0xff]  }
  0x23   : > { %2378 = vmatprep.subr.bf16.mxu1 %v2622_v10  ;;  %v2638_v26 = vld [vmem:[%s2880_s8 + $0xc8] sm:$0xff]   ;;  %v2642_v30 = vld [vmem:[%s2880_s8 + $0xc0] sm:$0xff]   ;;  %v2652_v38 = vld [vmem:[%s2880_s8 + $0x1f8] sm:$0xff]  }
  0x24   : > { %v2639_v27 = vld [vmem:[%s2880_s8 + $0x8] sm:$0xff]   ;;  %v2643_v31 = vld [vmem:[%s2880_s8] sm:$0xff]   ;;  %v2653_v39 = vld [vmem:[%s2880_s8 + $0x138] sm:$0xff]  }
  0x25   : > { %2351 = vmatpush3.bf16.msra.mxu0 %v2623_v11  ;;  %v2640_v28 = vld [vmem:[%s2880_s8 + $0x88] sm:$0xff]   ;;  %v2644_v32 = vld [vmem:[%s2880_s8 + $0x80] sm:$0xff]   ;;  %v2654_v40 = vld [vmem:[%s2880_s8 + $0x1b8] sm:$0xff]  }
  0x26   : > { %2379 = vmatpush3.bf16.msra.mxu1 %v2624_v12  ;;  %2352 = vmatprep.subr.bf16.mxu0 %v2625_v13  ;;  %v2645_v33 = vld [vmem:[%s2875_s5] ss:$16 sps:$4 sm:$0xff]   ;;  %v2647_v34 = vld [vmem:[%s2875_s5 + $0x4] ss:$16 sps:$4 sm:$0xff]   ;;  %v2648_v35 = vld [vmem:[%s2875_s5 + $0x8] ss:$16 sps:$4 sm:$0xff]  }
  0x27   : > { %2380 = vmatprep.subr.bf16.mxu1 %v2626_v14  ;;  %v2650_v36 = vld [vmem:[%s2875_s5 + $0xc] ss:$16 sps:$4 sm:$0xff]   ;;  %571 = vmatprep.mubr.bf16.mxu0 %v2647_v34  ;;  %v2655_v41 = vld [vmem:[%s2880_s8 + $0x170] sm:$0xff]   ;;  %v2663_v49 = vld [vmem:[%s2880_s8 + $0x160] sm:$0xff]  }
  0x28   : > { %620 = vmatprep.mubr.bf16.mxu1 %v2650_v36  ;;  %v2656_v42 = vld [vmem:[%s2880_s8 + $0x1f0] sm:$0xff]   ;;  %v2659_v45 = vld [vmem:[%s2880_s8 + $0x168] sm:$0xff]   ;;  %v2664_v50 = vld [vmem:[%s2880_s8 + $0x1e0] sm:$0xff]  }
  0x29   : > { %2353 = vmatpush3.bf16.msra.mxu0 %v2627_v15  ;;  %v2657_v43 = vld [vmem:[%s2880_s8 + $0x130] sm:$0xff]   ;;  %v2660_v46 = vld [vmem:[%s2880_s8 + $0x1e8] sm:$0xff]   ;;  %v2665_v51 = vld [vmem:[%s2880_s8 + $0x120] sm:$0xff]  }
  0x2a   : > { %2381 = vmatpush3.bf16.msra.mxu1 %v2628_v16  ;;  %2354 = vmatprep.subr.bf16.mxu0 %v2629_v17  ;;  %v2658_v44 = vld [vmem:[%s2880_s8 + $0x1b0] sm:$0xff]   ;;  %v2661_v47 = vld [vmem:[%s2880_s8 + $0x128] sm:$0xff]   ;;  %v2666_v52 = vld [vmem:[%s2880_s8 + $0x1a0] sm:$0xff]  }
  0x2b   : > { %2382 = vmatprep.subr.bf16.mxu1 %v2630_v18  ;;  %v2662_v48 = vld [vmem:[%s2880_s8 + $0x1a8] sm:$0xff]   ;;  %v2667_v53 = vld [vmem:[%s2880_s8 + $0x158] sm:$0xff]   ;;  %v2671_v57 = vld [vmem:[%s2875_s5 + $0x24] ss:$16 sps:$4 sm:$0xff]  }
  0x2c   : > { %v2668_v54 = vld [vmem:[%s2880_s8 + $0x1d8] sm:$0xff]   ;;  %v2675_v59 = vld [vmem:[%s2875_s5 + $0x20] ss:$16 sps:$4 sm:$0xff]   ;;  %v2681_v1 = vld [vmem:[%s2880_s8 + $0x148] sm:$0xff]  }
  0x2d   : > { %2355 = vmatpush3.bf16.msra.mxu0 %v2631_v19  ;;  %v2669_v55 = vld [vmem:[%s2880_s8 + $0x118] sm:$0xff]   ;;  %v2677_v61 = vld [vmem:[%s2880_s8 + $0x150] sm:$0xff]   ;;  %v2682_v2 = vld [vmem:[%s2880_s8 + $0x1c8] sm:$0xff]  }
  0x2e   : > { %2383 = vmatpush3.bf16.msra.mxu1 %v2632_v20  ;;  %2356 = vmatprep.subr.bf16.mxu0 %v2633_v21  ;;  %v2670_v56 = vld [vmem:[%s2880_s8 + $0x198] sm:$0xff]   ;;  %v2678_v62 = vld [vmem:[%s2880_s8 + $0x1d0] sm:$0xff]   ;;  %v2683_v3 = vld [vmem:[%s2880_s8 + $0x108] sm:$0xff]  }
  0x2f   : > { %2384 = vmatprep.subr.bf16.mxu1 %v2634_v22  ;;  %v2673_v58 = vld [vmem:[%s2875_s5 + $0x2c] ss:$16 sps:$4 sm:$0xff]   ;;  %v2676_v60 = vld [vmem:[%s2875_s5 + $0x28] ss:$16 sps:$4 sm:$0xff]   ;;  %v2679_v63 = vld [vmem:[%s2880_s8 + $0x110] sm:$0xff]  }
  0x30   : > { %v2680_v0 = vld [vmem:[%s2880_s8 + $0x190] sm:$0xff]   ;;  %v2684_v4 = vld [vmem:[%s2880_s8 + $0x188] sm:$0xff]   ;;  %v2685_v5 = vld [vmem:[%s2880_s8 + $0x140] sm:$0xff]  }
  0x31   : > { %2357 = vmatpush3.bf16.msra.mxu0 %v2635_v23  ;;  %v2686_v6 = vld [vmem:[%s2880_s8 + $0x1c0] sm:$0xff]   ;;  %v2689_v9 = vld [vmem:[%s2880_s8 + $0x278] sm:$0xff]   ;;  %v2693_v13 = vld [vmem:[%s2880_s8 + $0x270] sm:$0xff]  }
  0x32   : > { %2385 = vmatpush3.bf16.msra.mxu1 %v2636_v24  ;;  %2358 = vmatprep.subr.bf16.mxu0 %v2637_v25  ;;  %v2687_v7 = vld [vmem:[%s2880_s8 + $0x100] sm:$0xff]   ;;  %v2690_v10 = vld [vmem:[%s2880_s8 + $0x2f8] sm:$0xff]   ;;  %v2694_v14 = vld [vmem:[%s2880_s8 + $0x2f0] sm:$0xff]  }
  0x33   : > { %2386 = vmatprep.subr.bf16.mxu1 %v2638_v26  ;;  %v2688_v8 = vld [vmem:[%s2880_s8 + $0x180] sm:$0xff]   ;;  %v2691_v11 = vld [vmem:[%s2880_s8 + $0x238] sm:$0xff]   ;;  %v2695_v15 = vld [vmem:[%s2880_s8 + $0x230] sm:$0xff]  }
  0x34   : > { %v2692_v12 = vld [vmem:[%s2880_s8 + $0x2b8] sm:$0xff]   ;;  %v2696_v16 = vld [vmem:[%s2880_s8 + $0x2b0] sm:$0xff]   ;;  %v2703_v21 = vld [vmem:[%s2880_s8 + $0x268] sm:$0xff]  }
  0x35   : > { %2359 = vmatpush3.bf16.msra.mxu0 %v2639_v27  ;;  %v2697_v17 = vld [vmem:[%s2875_s5 + $0x44] ss:$16 sps:$4 sm:$0xff]   ;;  %v2699_v18 = vld [vmem:[%s2875_s5 + $0x4c] ss:$16 sps:$4 sm:$0xff]   ;;  %v2701_v19 = vld [vmem:[%s2875_s5 + $0x40] ss:$16 sps:$4 sm:$0xff]  }
  0x36   : > { %2387 = vmatpush3.bf16.msra.mxu1 %v2640_v28  ;;  %2360 = vmatprep.subr.bf16.mxu0 %v2641_v29  ;;  %v2702_v20 = vld [vmem:[%s2875_s5 + $0x48] ss:$16 sps:$4 sm:$0xff]   ;;  %v2707_v25 = vld [vmem:[%s2880_s8 + $0x260] sm:$0xff]   ;;  %v2716_v34 = vld [vmem:[%s2880_s8 + $0x2d0] sm:$0xff]  }
  0x37   : > { %2388 = vmatprep.subr.bf16.mxu1 %v2642_v30  ;;  %v2704_v22 = vld [vmem:[%s2880_s8 + $0x2e8] sm:$0xff]   ;;  %v2708_v26 = vld [vmem:[%s2880_s8 + $0x2e0] sm:$0xff]   ;;  %v2711_v29 = vld [vmem:[%s2880_s8 + $0x258] sm:$0xff]  }
  0x38   : > { %v2705_v23 = vld [vmem:[%s2880_s8 + $0x228] sm:$0xff]   ;;  %v2709_v27 = vld [vmem:[%s2880_s8 + $0x220] sm:$0xff]   ;;  %v2712_v30 = vld [vmem:[%s2880_s8 + $0x2d8] sm:$0xff]  }
  0x39   : > { %2361 = vmatpush3.bf16.msra.mxu0 %v2643_v31  ;;  %v2706_v24 = vld [vmem:[%s2880_s8 + $0x2a8] sm:$0xff]   ;;  %v2710_v28 = vld [vmem:[%s2880_s8 + $0x2a0] sm:$0xff]   ;;  %v2713_v31 = vld [vmem:[%s2880_s8 + $0x218] sm:$0xff]  }
  0x3a   : > { %2389 = vmatpush3.bf16.msra.mxu1 %v2644_v32  ;;  %2402 = vmatprep.subr.bf16.mxu0 %v2651_v37  ;;  %v2714_v32 = vld [vmem:[%s2880_s8 + $0x298] sm:$0xff]   ;;  %v2718_v36 = vld [vmem:[%s2880_s8 + $0x290] sm:$0xff]   ;;  %v2719_v37 = vld [vmem:[%s2880_s8 + $0x248] sm:$0xff]  }
  0x3b   : > { %2430 = vmatprep.subr.bf16.mxu1 %v2652_v38  ;;  %v2720_v38 = vld [vmem:[%s2880_s8 + $0x2c8] sm:$0xff]  }
  0x3c   : > { %572 = vmatmul.mubr.bf16.vlgmr.msra.gmra.mxu0 %v2645_v33  ;;  %v2715_v33 = vld [vmem:[%s2880_s8 + $0x250] sm:$0xff]  }
  0x3d   : > { %621 = vmatmul.mubr.bf16.vlgmr.msra.gmra.mxu1 %v2648_v35  ;;  %2403 = vmatpush3.bf16.msra.mxu0 %v2653_v39  ;;  %v2717_v35 = vld [vmem:[%s2880_s8 + $0x210] sm:$0xff]   ;;  %v2721_v39 = vld [vmem:[%s2880_s8 + $0x208] sm:$0xff]  }
  0x3e   : > { %2431 = vmatpush3.bf16.msra.mxu1 %v2654_v40  ;;  %2404 = vmatprep.subr.bf16.mxu0 %v2655_v41  ;;  %v2722_v40 = vld [vmem:[%s2880_s8 + $0x288] sm:$0xff]   ;;  %v2723_v41 = vld [vmem:[%s2880_s8 + $0x240] sm:$0xff]  }
  0x3f   : > { %2432 = vmatprep.subr.bf16.mxu1 %v2656_v42  ;;  %579 = vmatprep.mubr.bf16.mxu0 %v2671_v57  ;;  %v2724_v42 = vld [vmem:[%s2880_s8 + $0x2c0] sm:$0xff]  }
  0x40   : > { %628 = vmatprep.mubr.bf16.mxu1 %v2673_v58 }
  0x41   : > { %2405 = vmatpush3.bf16.msra.mxu0 %v2657_v43  ;;  %v2725_v43 = vld [vmem:[%s2880_s8 + $0x200] sm:$0xff]  }
  0x42   : > { %2433 = vmatpush3.bf16.msra.mxu1 %v2658_v44  ;;  %2406 = vmatprep.subr.bf16.mxu0 %v2659_v45  ;;  %v2726_v44 = vld [vmem:[%s2880_s8 + $0x280] sm:$0xff]   ;;  %v2727_v45 = vld [vmem:[%s2880_s8 + $0x378] sm:$0xff]  }
  0x43   : > { %2434 = vmatprep.subr.bf16.mxu1 %v2660_v46  ;;  %v2728_v46 = vld [vmem:[%s2880_s8 + $0x3f8] sm:$0xff]  }
  0x44   : > { %580 = vmatmul.mubr.bf16.gmra.mxu0 %v2675_v59 }
  0x45   : > { %2407 = vmatpush3.bf16.msra.mxu0 %v2661_v47  ;;  %629 = vmatmul.mubr.bf16.gmra.mxu1 %v2676_v60  ;;  %v2729_v47 = vld [vmem:[%s2880_s8 + $0x338] sm:$0xff]  }
  0x46   : > { %2435 = vmatpush3.bf16.msra.mxu1 %v2662_v48  ;;  %2408 = vmatprep.subr.bf16.mxu0 %v2663_v49  ;;  %v2730_v48 = vld [vmem:[%s2880_s8 + $0x3b8] sm:$0xff]   ;;  %v2731_v49 = vld [vmem:[%s2880_s8 + $0x370] sm:$0xff]  }
  0x47   : > { %2436 = vmatprep.subr.bf16.mxu1 %v2664_v50  ;;  %978 = vmatprep.mubr.bf16.mxu0 %v2671_v57  ;;  %v2732_v50 = vld [vmem:[%s2880_s8 + $0x3f0] sm:$0xff]   ;;  %v2741_v57 = vld [vmem:[%s2880_s8 + $0x368] sm:$0xff]  }
  0x48   : > { %1027 = vmatprep.mubr.bf16.mxu1 %v2673_v58  ;;  %v2742_v58 = vld [vmem:[%s2880_s8 + $0x3e8] sm:$0xff]  }
  0x49   : > { %2409 = vmatpush3.bf16.msra.mxu0 %v2665_v51  ;;  %v2733_v51 = vld [vmem:[%s2880_s8 + $0x330] sm:$0xff]  }
  0x4a   : > { %2437 = vmatpush3.bf16.msra.mxu1 %v2666_v52  ;;  %2410 = vmatprep.subr.bf16.mxu0 %v2667_v53  ;;  %v2734_v52 = vld [vmem:[%s2880_s8 + $0x3b0] sm:$0xff]  }
  0x4b   : > { %2438 = vmatprep.subr.bf16.mxu1 %v2668_v54  ;;  %v2735_v53 = vld [vmem:[%s2875_s5 + $0x64] ss:$16 sps:$4 sm:$0xff]   ;;  %v2737_v54 = vld [vmem:[%s2875_s5 + $0x6c] ss:$16 sps:$4 sm:$0xff]  }
  0x4d   : > { %2411 = vmatpush3.bf16.msra.mxu0 %v2669_v55  ;;  %v2739_v55 = vld [vmem:[%s2875_s5 + $0x60] ss:$16 sps:$4 sm:$0xff]  }
  0x4e   : > { %2439 = vmatpush3.bf16.msra.mxu1 %v2670_v56  ;;  %2412 = vmatprep.subr.bf16.mxu0 %v2677_v61  ;;  %v2740_v56 = vld [vmem:[%s2875_s5 + $0x68] ss:$16 sps:$4 sm:$0xff]   ;;  %v2745_v61 = vld [vmem:[%s2880_s8 + $0x360] sm:$0xff]  }
  0x4f   : > { %2440 = vmatprep.subr.bf16.mxu1 %v2678_v62  ;;  %v2746_v62 = vld [vmem:[%s2880_s8 + $0x3e0] sm:$0xff]  }
  0x51   : > { %2413 = vmatpush3.bf16.msra.mxu0 %v2679_v63  ;;  %v2747_v63 = vld [vmem:[%s2880_s8 + $0x320] sm:$0xff]  }
  0x52   : > { %2441 = vmatpush3.bf16.msra.mxu1 %v2680_v0  ;;  %2414 = vmatprep.subr.bf16.mxu0 %v2681_v1  ;;  %v2748_v0 = vld [vmem:[%s2880_s8 + $0x3a0] sm:$0xff]   ;;  %v2749_v1 = vld [vmem:[%s2880_s8 + $0x358] sm:$0xff]  }
  0x53   : > { %2442 = vmatprep.subr.bf16.mxu1 %v2682_v2  ;;  %v2750_v2 = vld [vmem:[%s2880_s8 + $0x3d8] sm:$0xff]  }
  0x55   : > { %2415 = vmatpush3.bf16.msra.mxu0 %v2683_v3  ;;  %v2751_v3 = vld [vmem:[%s2880_s8 + $0x318] sm:$0xff]  }
  0x56   : > { %2443 = vmatpush3.bf16.msra.mxu1 %v2684_v4  ;;  %2416 = vmatprep.subr.bf16.mxu0 %v2685_v5  ;;  %v2752_v4 = vld [vmem:[%s2880_s8 + $0x398] sm:$0xff]   ;;  %v2753_v5 = vld [vmem:[%s2880_s8 + $0x350] sm:$0xff]  }
  0x57   : > { %2444 = vmatprep.subr.bf16.mxu1 %v2686_v6  ;;  %v2754_v6 = vld [vmem:[%s2880_s8 + $0x3d0] sm:$0xff]  }
  0x59   : > { %2417 = vmatpush3.bf16.msra.mxu0 %v2687_v7  ;;  %v2755_v7 = vld [vmem:[%s2880_s8 + $0x310] sm:$0xff]  }
  0x5a   : > { %2445 = vmatpush3.bf16.msra.mxu1 %v2688_v8  ;;  %2458 = vmatprep.subr.bf16.mxu0 %v2689_v9  ;;  %v2756_v8 = vld [vmem:[%s2880_s8 + $0x390] sm:$0xff]   ;;  %v2757_v9 = vld [vmem:[%s2880_s8 + $0x348] sm:$0xff]  }
  0x5b   : > { %2486 = vmatprep.subr.bf16.mxu1 %v2690_v10  ;;  %v2758_v10 = vld [vmem:[%s2880_s8 + $0x3c8] sm:$0xff]  }
  0x5c   : > { %979 = vmatmul.mubr.bf16.vlgmr.msra.gmra.mxu0 %v2675_v59  ;;  %v2743_v59 = vld [vmem:[%s2880_s8 + $0x328] sm:$0xff]  }
  0x5d   : > { %1028 = vmatmul.mubr.bf16.vlgmr.msra.gmra.mxu1 %v2676_v60  ;;  %2459 = vmatpush3.bf16.msra.mxu0 %v2691_v11  ;;  %v2744_v60 = vld [vmem:[%s2880_s8 + $0x3a8] sm:$0xff]  }
  0x5e   : > { %2487 = vmatpush3.bf16.msra.mxu1 %v2692_v12  ;;  %2460 = vmatprep.subr.bf16.mxu0 %v2693_v13  ;;  %v2759_v11 = vld [vmem:[%s2880_s8 + $0x308] sm:$0xff]   ;;  %v2761_v13 = vld [vmem:[%s2880_s8 + $0x340] sm:$0xff]  }
  0x5f   : > { %2488 = vmatprep.subr.bf16.mxu1 %v2694_v14  ;;  %986 = vmatprep.mubr.bf16.mxu0 %v2697_v17  ;;  %v2760_v12 = vld [vmem:[%s2880_s8 + $0x388] sm:$0xff]   ;;  %v2762_v14 = vld [vmem:[%s2880_s8 + $0x3c0] sm:$0xff]  }
  0x60   : > { %1035 = vmatprep.mubr.bf16.mxu1 %v2699_v18 }
  0x61   : > { %2461 = vmatpush3.bf16.msra.mxu0 %v2695_v15  ;;  %v2763_v15 = vld [vmem:[%s2880_s8 + $0x300] sm:$0xff]  }
  0x62   : > { %2489 = vmatpush3.bf16.msra.mxu1 %v2696_v16  ;;  %2462 = vmatprep.subr.bf16.mxu0 %v2703_v21  ;;  %v2764_v16 = vld [vmem:[%s2880_s8 + $0x380] sm:$0xff]  }
  0x63   : > { %2490 = vmatprep.subr.bf16.mxu1 %v2704_v22 }
  0x64   : > { %987 = vmatmul.mubr.bf16.gmra.mxu0 %v2701_v19 }
  0x65   : > { %1036 = vmatmul.mubr.bf16.gmra.mxu1 %v2702_v20  ;;  %1385 = vmatprep.mubr.bf16.mxu0 %v2697_v17  ;;  %v2765_v17 = vld [vmem:[%s2875_s5 + $0x84] ss:$16 sps:$4 sm:$0xff]  }
  0x66   : > { %2463 = vmatpush3.bf16.msra.mxu0 %v2705_v23  ;;  %1434 = vmatprep.mubr.bf16.mxu1 %v2699_v18  ;;  %v2767_v18 = vld [vmem:[%s2875_s5 + $0x8c] ss:$16 sps:$4 sm:$0xff]  }
  0x67   : > { %2491 = vmatpush3.bf16.msra.mxu1 %v2706_v24  ;;  %2464 = vmatprep.subr.bf16.mxu0 %v2707_v25 }
  0x68   : > { %2492 = vmatprep.subr.bf16.mxu1 %v2708_v26 }
  0x6a   : > { %2465 = vmatpush3.bf16.msra.mxu0 %v2709_v27 }
  0x6b   : > { %2493 = vmatpush3.bf16.msra.mxu1 %v2710_v28  ;;  %2466 = vmatprep.subr.bf16.mxu0 %v2711_v29 }
  0x6c   : > { %2494 = vmatprep.subr.bf16.mxu1 %v2712_v30 }
  0x6e   : > { %2467 = vmatpush3.bf16.msra.mxu0 %v2713_v31 }
  0x6f   : > { %2495 = vmatpush3.bf16.msra.mxu1 %v2714_v32  ;;  %2468 = vmatprep.subr.bf16.mxu0 %v2715_v33 }
  0x70   : > { %2496 = vmatprep.subr.bf16.mxu1 %v2716_v34 }
  0x72   : > { %2469 = vmatpush3.bf16.msra.mxu0 %v2717_v35 }
  0x73   : > { %2497 = vmatpush3.bf16.msra.mxu1 %v2718_v36  ;;  %2470 = vmatprep.subr.bf16.mxu0 %v2719_v37 }
  0x74   : > { %2498 = vmatprep.subr.bf16.mxu1 %v2720_v38 }
  0x76   : > { %2471 = vmatpush3.bf16.msra.mxu0 %v2721_v39 }
  0x77   : > { %2499 = vmatpush3.bf16.msra.mxu1 %v2722_v40  ;;  %2472 = vmatprep.subr.bf16.mxu0 %v2723_v41 }
  0x78   : > { %2500 = vmatprep.subr.bf16.mxu1 %v2724_v42 }
  0x7a   : > { %2473 = vmatpush3.bf16.msra.mxu0 %v2725_v43 }
  0x7b   : > { %2501 = vmatpush3.bf16.msra.mxu1 %v2726_v44  ;;  %2514 = vmatprep.subr.bf16.mxu0 %v2727_v45 }
  0x7c   : > { %2542 = vmatprep.subr.bf16.mxu1 %v2728_v46 }
  0x7d   : > { %1386 = vmatmul.mubr.bf16.vlgmr.msra.gmra.mxu0 %v2701_v19  ;;  %v2769_v19 = vld [vmem:[%s2875_s5 + $0x80] ss:$16 sps:$4 sm:$0xff]  }
  0x7e   : > { %1435 = vmatmul.mubr.bf16.vlgmr.msra.gmra.mxu1 %v2702_v20  ;;  %2515 = vmatpush3.bf16.msra.mxu0 %v2729_v47  ;;  %v2770_v20 = vld [vmem:[%s2875_s5 + $0x88] ss:$16 sps:$4 sm:$0xff]  }
  0x7f   : > { %2543 = vmatpush3.bf16.msra.mxu1 %v2730_v48  ;;  %2516 = vmatprep.subr.bf16.mxu0 %v2731_v49 }
  0x80   : > { %2544 = vmatprep.subr.bf16.mxu1 %v2732_v50  ;;  %1393 = vmatprep.mubr.bf16.mxu0 %v2735_v53 }
  0x81   : > { %1442 = vmatprep.mubr.bf16.mxu1 %v2737_v54 }
  0x82   : > { %2517 = vmatpush3.bf16.msra.mxu0 %v2733_v51 }
  0x83   : > { %2545 = vmatpush3.bf16.msra.mxu1 %v2734_v52  ;;  %2518 = vmatprep.subr.bf16.mxu0 %v2741_v57 }
  0x84   : > { %2546 = vmatprep.subr.bf16.mxu1 %v2742_v58 }
  0x85   : > { %1394 = vmatmul.mubr.bf16.gmra.mxu0 %v2739_v55 }
  0x86   : > { %1443 = vmatmul.mubr.bf16.gmra.mxu1 %v2740_v56  ;;  %1792 = vmatprep.mubr.bf16.mxu0 %v2735_v53 }
  0x87   : > { %1841 = vmatprep.mubr.bf16.mxu1 %v2737_v54  ;;  %2519 = vmatpush3.bf16.msra.mxu0 %v2743_v59 }
  0x88   : > { %2547 = vmatpush3.bf16.msra.mxu1 %v2744_v60  ;;  %2520 = vmatprep.subr.bf16.mxu0 %v2745_v61 }
  0x89   : > { %2548 = vmatprep.subr.bf16.mxu1 %v2746_v62 }
  0x8b   : > { %2521 = vmatpush3.bf16.msra.mxu0 %v2747_v63 }
  0x8c   : > { %2549 = vmatpush3.bf16.msra.mxu1 %v2748_v0  ;;  %2522 = vmatprep.subr.bf16.mxu0 %v2749_v1 }
  0x8d   : > { %2550 = vmatprep.subr.bf16.mxu1 %v2750_v2 }
  0x8f   : > { %2523 = vmatpush3.bf16.msra.mxu0 %v2751_v3 }
  0x90   : > { %2551 = vmatpush3.bf16.msra.mxu1 %v2752_v4  ;;  %2524 = vmatprep.subr.bf16.mxu0 %v2753_v5 }
  0x91   : > { %2552 = vmatprep.subr.bf16.mxu1 %v2754_v6 }
  0x93   : > { %2525 = vmatpush3.bf16.msra.mxu0 %v2755_v7 }
  0x94   : > { %2553 = vmatpush3.bf16.msra.mxu1 %v2756_v8  ;;  %2526 = vmatprep.subr.bf16.mxu0 %v2757_v9 }
  0x95   : > { %2554 = vmatprep.subr.bf16.mxu1 %v2758_v10 }
  0x97   : > { %2527 = vmatpush3.bf16.msra.mxu0 %v2759_v11 }
  0x98   : > { %2555 = vmatpush3.bf16.msra.mxu1 %v2760_v12  ;;  %2528 = vmatprep.subr.bf16.mxu0 %v2761_v13  ;;  %v231_v13 = vld [vmem:[#allocation2 + $0x10] sm:$0xff] }
  0x99   : > { %2556 = vmatprep.subr.bf16.mxu1 %v2762_v14 }
  0x9b   : > { %2529 = vmatpush3.bf16.msra.mxu0 %v2763_v15 }
  0x9c   : > { %2557 = vmatpush3.bf16.msra.mxu1 %v2764_v16 }
  0x9e   : > { %1793 = vmatmul.mubr.bf16.vlgmr.msra.gmra.mxu0 %v2739_v55 }
  0x9f   : > { %1842 = vmatmul.mubr.bf16.vlgmr.msra.gmra.mxu1 %v2740_v56  ;;  %1800 = vmatprep.mubr.bf16.mxu0 %v2765_v17 }
  0xa0   : > { %1849 = vmatprep.mubr.bf16.mxu1 %v2767_v18 }
  0xa6   : > { %1801 = vmatmul.mubr.bf16.gmra.mxu0 %v2769_v19 }
  0xa7   : > { %1850 = vmatmul.mubr.bf16.gmra.mxu1 %v2770_v20  ;;  %v232_v20 = vld [vmem:[#allocation2] sm:$0xff] }
  0xfc   : > { %v2362_v21 = vpop.f32.mrf.mxu0 }
  0xfd   : > { %v2390_v22 = vpop.f32.mrf.mxu1 }
  0xfe   : > { %v2363_v23 = vpop.f32.mrf.mxu0 }
  0xff   : > { %v2391_v24 = vpop.f32.mrf.mxu1  ;;  %v2364_v1 = vadd.f32 %v2363_v23, %v2362_v21 }
 0x100   : > { %v2365_v25 = vpop.f32.mrf.mxu0  ;;  %v2392_v2 = vadd.f32 %v2391_v24, %v2390_v22 }
 0x101   : > { %v2393_v26 = vpop.f32.mrf.mxu1 }
 0x102   : > { %v2366_v27 = vpop.f32.mrf.mxu0  ;;  %v623_v9 = vadd.f32 %v2392_v2, %v2364_v1 }
 0x103   : > { %v2394_v28 = vpop.f32.mrf.mxu1  ;;  %v2367_v5 = vadd.f32 %v2366_v27, %v2365_v25 }
 0x104   : > { %v2368_v29 = vpop.f32.mrf.mxu0  ;;  %v2395_v6 = vadd.f32 %v2394_v28, %v2393_v26  ;;  %v637_v26 = vadd.f32 %v623_v9, %v231_v13  ;;  %v234_v9 = vld [vmem:[#allocation2 + $0x8] sm:$0xff] }
 0x105   : > { %v2396_v30 = vpop.f32.mrf.mxu1 }
 0x106   : > { %v2369_v31 = vpop.f32.mrf.mxu0  ;;  %v626_v17 = vadd.f32 %v2395_v6, %v2367_v5 }
 0x107   : > { %v2397_v32 = vpop.f32.mrf.mxu1  ;;  %v2370_v21 = vadd.f32 %v2369_v31, %v2368_v29 }
 0x108   : > { %v3031_v33 = vpop.f32.mrf.mxu0  ;;  %v2398_v22 = vadd.f32 %v2397_v32, %v2396_v30 }
 0x109   : > { %v3033_v34 = vpop.f32.mrf.mxu1 }
 0x10a   : > { %v3035_v35 = vpop.f32.mrf.mxu0 }
 0x10b   : > { %v3037_v36 = vpop.f32.mrf.mxu1  ;;  %v2373_v29 = vadd.f32 %v3035_v35, %v3031_v33 }
 0x10c   : > { %v2401_v30 = vadd.f32 %v3037_v36, %v3033_v34 }
 0x10e   : > { %v634_v5 = vadd.f32 %v2401_v30, %v2373_v29 }
 0x11c   : > { %v2418_v37 = vpop.f32.mrf.mxu0 }
 0x11d   : > { %v2446_v38 = vpop.f32.mrf.mxu1 }
 0x11e   : > { %v2419_v39 = vpop.f32.mrf.mxu0 }
 0x11f   : > { %v2447_v40 = vpop.f32.mrf.mxu1  ;;  %v2420_v7 = vadd.f32 %v2419_v39, %v2418_v37 }
 0x120   : > { %v2421_v41 = vpop.f32.mrf.mxu0  ;;  %v2448_v8 = vadd.f32 %v2447_v40, %v2446_v38 }
 0x121   : > { %v2449_v42 = vpop.f32.mrf.mxu1 }
 0x122   : > { %v2422_v43 = vpop.f32.mrf.mxu0  ;;  %v1030_v18 = vadd.f32 %v2448_v8, %v2420_v7 }
 0x123   : > { %v2450_v44 = vpop.f32.mrf.mxu1  ;;  %v2423_v14 = vadd.f32 %v2422_v43, %v2421_v41  ;;  %v638_v41 = vadd.f32 %v626_v17, %v232_v20 }
 0x124   : > { %v2424_v45 = vpop.f32.mrf.mxu0  ;;  %v2451_v15 = vadd.f32 %v2450_v44, %v2449_v42  ;;  %v1044_v42 = vadd.f32 %v1030_v18, %v637_v26 }
 0x125   : > { %v2452_v46 = vpop.f32.mrf.mxu1 }
 0x126   : > { %v2425_v47 = vpop.f32.mrf.mxu0  ;;  %v1033_v37 = vadd.f32 %v2451_v15, %v2423_v14  ;;  %v640_v15 = vadd.f32 %v634_v5, %v234_v9 }
 0x127   : > { %v2453_v48 = vpop.f32.mrf.mxu1  ;;  %v2426_v38 = vadd.f32 %v2425_v47, %v2424_v45 }
 0x128   : > { %v3039_v49 = vpop.f32.mrf.mxu0  ;;  %v2454_v39 = vadd.f32 %v2453_v48, %v2452_v46  ;;  %v1045_v48 = vadd.f32 %v1033_v37, %v638_v41 }
 0x129   : > { %v3041_v50 = vpop.f32.mrf.mxu1 }
 0x12a   : > { %v3043_v51 = vpop.f32.mrf.mxu0 }
 0x12b   : > { %v3045_v52 = vpop.f32.mrf.mxu1  ;;  %v2429_v1 = vadd.f32 %v3043_v51, %v3039_v49 }
 0x12c   : > { %v2457_v33 = vadd.f32 %v3045_v52, %v3041_v50 }
 0x12e   : > { %v1041_v51 = vadd.f32 %v2457_v33, %v2429_v1 }
 0x13d   : > { %v2474_v53 = vpop.f32.mrf.mxu0 }
 0x13e   : > { %v2502_v54 = vpop.f32.mrf.mxu1 }
 0x13f   : > { %v2475_v55 = vpop.f32.mrf.mxu0 }
 0x140   : > { %v2503_v56 = vpop.f32.mrf.mxu1  ;;  %v2476_v10 = vadd.f32 %v2475_v55, %v2474_v53  ;;  %v233_v55 = vld [vmem:[#allocation2 + $0x18] sm:$0xff] }
 0x141   : > { %v2477_v57 = vpop.f32.mrf.mxu0  ;;  %v2504_v11 = vadd.f32 %v2503_v56, %v2502_v54  ;;  %v631_v54 = vadd.f32 %v2398_v22, %v2370_v21 }
 0x142   : > { %v2505_v58 = vpop.f32.mrf.mxu1 }
 0x143   : > { %v2478_v59 = vpop.f32.mrf.mxu0  ;;  %v1437_v27 = vadd.f32 %v2504_v11, %v2476_v10  ;;  %v639_v2 = vadd.f32 %v631_v54, %v233_v55 }
 0x144   : > { %v2506_v60 = vpop.f32.mrf.mxu1  ;;  %v2479_v23 = vadd.f32 %v2478_v59, %v2477_v57 }
 0x145   : > { %v2480_v61 = vpop.f32.mrf.mxu0  ;;  %v2507_v24 = vadd.f32 %v2506_v60, %v2505_v58  ;;  %v1451_v56 = vadd.f32 %v1437_v27, %v1044_v42  ;;  %v1038_v58 = vadd.f32 %v2454_v39, %v2426_v38 }
 0x146   : > { %v2508_v62 = vpop.f32.mrf.mxu1 }
 0x147   : > { %v2481_v63 = vpop.f32.mrf.mxu0  ;;  %v1440_v31 = vadd.f32 %v2507_v24, %v2479_v23  ;;  %v1046_v49 = vadd.f32 %v1038_v58, %v639_v2 }
 0x148   : > { %v2509_v0 = vpop.f32.mrf.mxu1  ;;  %v2482_v57 = vadd.f32 %v2481_v63, %v2480_v61 }
 0x149   : > { %v2483_v3 = vpop.f32.mrf.mxu0  ;;  %v2510_v45 = vadd.f32 %v2509_v0, %v2508_v62  ;;  %v1452_v6 = vadd.f32 %v1440_v31, %v1045_v48 }
 0x14a   : > { %v2511_v4 = vpop.f32.mrf.mxu1 }
 0x14b   : > { %v2484_v12 = vpop.f32.mrf.mxu0  ;;  %v1445_v62 = vadd.f32 %v2510_v45, %v2482_v57 }
 0x14c   : > { %v2512_v16 = vpop.f32.mrf.mxu1  ;;  %v2485_v63 = vadd.f32 %v2484_v12, %v2483_v3  ;;  %v1047_v12 = vadd.f32 %v1041_v51, %v640_v15 }
 0x14d   : > { %v2513_v0 = vadd.f32 %v2512_v16, %v2511_v4  ;;  %v1453_v17 = vadd.f32 %v1445_v62, %v1046_v49 }
 0x14f   : > { %v1448_v18 = vadd.f32 %v2513_v0, %v2485_v63 }
 0x151   : > { %v1454_v22 = vadd.f32 %v1448_v18, %v1047_v12 }
 0x15e   : > { %v2530_v19 = vpop.f32.mrf.mxu0 }
 0x15f   : > { %v2558_v25 = vpop.f32.mrf.mxu1 }
 0x160   : > { %v2531_v28 = vpop.f32.mrf.mxu0 }
 0x161   : > { %v2532_v40 = vadd.f32 %v2531_v28, %v2530_v19  ;;  %v2559_v53 = vpop.f32.mrf.mxu1 }
 0x162   : > { %v2560_v43 = vadd.f32 %v2559_v53, %v2558_v25  ;;  %v2533_v44 = vpop.f32.mrf.mxu0 }
 0x163   : > { %v2561_v32 = vpop.f32.mrf.mxu1 }
 0x164   : > { %v1844_v46 = vadd.f32 %v2560_v43, %v2532_v40  ;;  %v2534_v47 = vpop.f32.mrf.mxu0 }
 0x165   : > { %v2535_v59 = vadd.f32 %v2534_v47, %v2533_v44  ;;  %v2562_v60 = vpop.f32.mrf.mxu1 }
 0x166   : > { %v1858_v35 = vadd.f32 %v1844_v46, %v1451_v56  ;;  %v2563_v34 = vadd.f32 %v2562_v60, %v2561_v32  ;;  %v2536_v36 = vpop.f32.mrf.mxu0 }
 0x167   : > { %v2564_v61 = vpop.f32.mrf.mxu1 }
 0x168   : > { %1862 = vst [vmem:[#allocation2 + $0x10] sm:$0xff] %v1858_v35  ;;  %v1847_v7 = vadd.f32 %v2563_v34, %v2535_v59  ;;  %v2537_v8 = vpop.f32.mrf.mxu0 }
 0x169   : > { %v2538_v10 = vadd.f32 %v2537_v8, %v2536_v36  ;;  %v2565_v11 = vpop.f32.mrf.mxu1 }
 0x16a   : > { %v1859_v13 = vadd.f32 %v1847_v7, %v1452_v6  ;;  %v2566_v50 = vadd.f32 %v2565_v11, %v2564_v61  ;;  %v2539_v52 = vpop.f32.mrf.mxu0 }
 0x16b   : > { %v2567_v14 = vpop.f32.mrf.mxu1 }
 0x16c   : > { %1863 = vst [vmem:[#allocation2] sm:$0xff] %v1859_v13  ;;  %v1852_v19 = vadd.f32 %v2566_v50, %v2538_v10  ;;  %v2540_v20 = vpop.f32.mrf.mxu0 }
 0x16d   : > { %v2541_v3 = vadd.f32 %v2540_v20, %v2539_v52  ;;  %v2568_v4 = vpop.f32.mrf.mxu1 }
 0x16e   : > { %v1860_v16 = vadd.f32 %v1852_v19, %v1453_v17  ;;  %v2569_v21 = vadd.f32 %v2568_v4, %v2567_v14 }
 0x170   : > { %1864 = vst [vmem:[#allocation2 + $0x18] sm:$0xff] %v1860_v16  ;;  %v1855_v23 = vadd.f32 %v2569_v21, %v2541_v3  ;;  %1869 = sbr.rel (%p2340_p9) target bundleno = 383 (0x17f), region = 40 }
 0x172   : > { %v1861_v24 = vadd.f32 %v1855_v23, %v1454_v22 }
 0x174   : > { %1865 = vst [vmem:[#allocation2 + $0x8] sm:$0xff] %v1861_v24 }
 0x175   : > { %v1870_v25 = vld [vmem:[#allocation2 + $0x10] sm:$0xff]  ;;  %v2341_v26 = vld [vmem:[%s3080_s2] ss:$0 sm:$0xff] }
 0x176   : > { %v1871_v27 = vld [vmem:[#allocation2] sm:$0xff]  ;;  %v1881_v28 = vadd.f32 %v2341_v26, %v1870_v25 }
 0x177   : > { %v1882_v37 = vadd.f32 %v2341_v26, %v1871_v27  ;;  %v1872_v38 = vld [vmem:[#allocation2 + $0x18] sm:$0xff] }
 0x178   : > { %v1883_v40 = vadd.f32 %v2341_v26, %v1872_v38  ;;  %1885 = vst [vmem:[%s2870_s27] sm:$0xff] %v1881_v28 }
 0x179   : > { %1886 = vst [vmem:[%s2870_s27 + $0x8] sm:$0xff] %v1882_v37 }
 0x17a   : > { %1887 = vst [vmem:[%s2870_s27 + $0x10] sm:$0xff] %v1883_v40 }
 0x17b   : > { %v1873_v39 = vld [vmem:[#allocation2 + $0x8] sm:$0xff] }
 0x17c   : > { %v1884_v53 = vadd.f32 %v2341_v26, %v1873_v39 }
 0x17e   : > { %1888 = vst [vmem:[%s2870_s27 + $0x18] sm:$0xff] %v1884_v53 }
 0x17f PF: > { %s13_s16 = sadd.s32 1, %s2809_s16   ;;  %s3082_s12 = smov %s2801_s14 }
 0x180   : > { %p10_p10 = scmp.ge.s32.totalorder %s13_s16, 10   ;;  %s3083_s13 = smov %s2805_s15 }
 0x181   : > { %s3084_s14 = smov %s3087_s17  ;;  %s3085_s15 = smov %s3091_s18 }
 0x182   :  { %12 = sbr.rel (!%p10_p10) target bundleno = 3 (0x3), region = 76 }

</bundles_post_ra>
